<compile_context>
chip_gen: v5e
topology: v5e:2x2
jax: 0.10.0
libtpu: 0.0.40
codegen_flags: <defaults>
</compile_context>

<pallas_src>
import functools

import jax
import jax.numpy as jnp
import numpy as np
from jax.experimental import pallas as pl
from jax.experimental.pallas import tpu as pltpu


def _pick_chunk_h(H, W, target_rows=512):
    """Largest divisor of H whose row-chunk (chunk*W spatial rows) <= target."""
    best = 1
    for d in range(1, H + 1):
        if H % d == 0 and d * W <= target_rows:
            best = d
    return best


def _fire_kernel(x_ref, ws_ref, bs_ref, we_ref, be_ref, o_ref, spad_ref, *,
                 H, W, Cin, Csq, Cout, chunk_h):
    # x_ref : (H, W, Cin)       input image (batch dim squeezed away)
    # ws_ref: (Cin, Csq) bf16   squeeze 1x1 weight
    # bs_ref: (1, Csq)   f32    squeeze bias
    # we_ref: (9*Csq, Cout) bf16 fused expand weight (center tap holds 1x1)
    # be_ref: (1, Cout)  f32    fused expand bias
    # o_ref : (H, W, Cout)      concatenated [expand1x1 | expand3x3] output
    # spad  : (H+2, W+2, Csq) bf16 zero-padded squeeze activation

    sdtype = spad_ref.dtype

    # Zero ONLY the 1-pixel halo (interior is fully overwritten below).
    zrow = jnp.zeros((1, W + 2, Csq), sdtype)
    zcol = jnp.zeros((H + 2, 1, Csq), sdtype)
    spad_ref[0:1, :, :] = zrow
    spad_ref[H + 1:H + 2, :, :] = zrow
    spad_ref[:, 0:1, :] = zcol
    spad_ref[:, W + 1:W + 2, :] = zcol

    ws = ws_ref[...]
    bs = bs_ref[...]
    we = we_ref[...]
    be = be_ref[...]

    n_chunks = H // chunk_h
    m = chunk_h * W

    # ---- phase 1: squeeze 1x1 conv + ReLU into padded scratch --------------
    for c in range(n_chunks):
        r0 = c * chunk_h
        xc = x_ref[r0:r0 + chunk_h].reshape(m, Cin).astype(jnp.bfloat16)
        sc = jnp.dot(xc, ws, preferred_element_type=jnp.float32)
        sc = jnp.maximum(sc + bs, 0.0)                      # f32 elementwise
        spad_ref[1 + r0:1 + r0 + chunk_h, 1:W + 1, :] = (
            sc.reshape(chunk_h, W, Csq).astype(sdtype))

    # ---- phase 2: fused expand1x1 + expand3x3 via im2col, one matmul/chunk -
    for c in range(n_chunks):
        r0 = c * chunk_h
        taps = []
        for dy in range(3):
            for dx in range(3):
                taps.append(
                    spad_ref[r0 + dy:r0 + dy + chunk_h, dx:dx + W, :]
                    .reshape(m, Csq))
        patch = jnp.concatenate(taps, axis=-1)              # (m, 9*Csq) bf16
        e = jnp.dot(patch, we, preferred_element_type=jnp.float32)
        e = jnp.maximum(e + be, 0.0)                        # (m, Cout) f32
        o_ref[r0:r0 + chunk_h] = e.reshape(chunk_h, W, Cout).astype(o_ref.dtype)


def fire_module(x_nchw, ws, bs, w1, b1, w3, b3):
    """FireModule forward. x_nchw: (N, Cin, H, W). Returns (N, C1+C3, H, W)."""
    N, Cin, H, W = x_nchw.shape
    Csq = ws.shape[1]
    C1 = w1.shape[1]
    C3 = w3.shape[3]
    Cout = C1 + C3

    # TODO(synk): if the surrounding model is NHWC end-to-end these two
    # transposes (entry/exit) disappear; they are kept only for the PyTorch
    # NCHW interface.
    x_nhwc = jnp.transpose(x_nchw, (0, 2, 3, 1))            # NCHW -> NHWC

    # Fused expand weight: (9*Csq, C1+C3); the 1x1 weights occupy only the
    # center-tap (dy=1, dx=1) rows of the first C1 columns.
    w_exp = jnp.zeros((3, 3, Csq, Cout), jnp.float32)
    w_exp = w_exp.at[1, 1, :, :C1].set(w1)
    w_exp = w_exp.at[:, :, :, C1:].set(w3)
    w_exp = w_exp.reshape(9 * Csq, Cout).astype(jnp.bfloat16)
    b_exp = jnp.concatenate([b1, b3], axis=-1).astype(jnp.float32)   # (1, Cout)

    ws_bf = ws.astype(jnp.bfloat16)
    bs_f32 = bs.astype(jnp.float32)

    chunk_h = _pick_chunk_h(H, W)

    kernel = functools.partial(_fire_kernel, H=H, W=W, Cin=Cin, Csq=Csq,
                               Cout=Cout, chunk_h=chunk_h)

    out_nhwc = pl.pallas_call(
        kernel,
        out_shape=jax.ShapeDtypeStruct((N, H, W, Cout), x_nchw.dtype),
        grid_spec=pltpu.PrefetchScalarGridSpec(
            num_scalar_prefetch=0,
            grid=(N,),
            in_specs=[
                pl.BlockSpec((None, H, W, Cin), lambda n: (n, 0, 0, 0)),
                pl.BlockSpec((Cin, Csq), lambda n: (0, 0)),
                pl.BlockSpec((1, Csq), lambda n: (0, 0)),
                pl.BlockSpec((9 * Csq, Cout), lambda n: (0, 0)),
                pl.BlockSpec((1, Cout), lambda n: (0, 0)),
            ],
            out_specs=pl.BlockSpec((None, H, W, Cout), lambda n: (n, 0, 0, 0)),
            scratch_shapes=[pltpu.VMEM((H + 2, W + 2, Csq), jnp.bfloat16)],
        ),
        compiler_params=pltpu.CompilerParams(
            dimension_semantics=("parallel",),
            vmem_limit_bytes=32 * 1024 * 1024),
    )(x_nhwc, ws_bf, bs_f32, w_exp, b_exp)

    return jnp.transpose(out_nhwc, (0, 3, 1, 2))            # NHWC -> NCHW


def _reference(x_nchw, ws, bs, w1, b1, w3, b3):
    """Pure-JAX f32 reference (matches torch Conv2d semantics)."""
    x = jnp.transpose(x_nchw, (0, 2, 3, 1))
    s = jax.nn.relu(jnp.einsum('nhwc,co->nhwo', x, ws) + bs[0])
    e1 = jax.nn.relu(jnp.einsum('nhwc,co->nhwo', s, w1) + b1[0])
    e3 = jax.lax.conv_general_dilated(
        s, w3, window_strides=(1, 1), padding=((1, 1), (1, 1)),
        dimension_numbers=('NHWC', 'HWIO', 'NHWC'))
    e3 = jax.nn.relu(e3 + b3[0])
    out = jnp.concatenate([e1, e3], axis=-1)
    return jnp.transpose(out, (0, 3, 1, 2))


if __name__ == "__main__":
    # Small shapes: batch=2, in_channels=4, squeeze=3, expand1x1=4, expand3x3=4
    N, Cin, H, W = 2, 4, 16, 16
    Csq, C1, C3 = 3, 4, 4

    key = jax.random.PRNGKey(0)
    k = jax.random.split(key, 8)
    x = jax.random.normal(k[0], (N, Cin, H, W), jnp.float32)

    # Deterministic params (1x1 weights as (Cin, Cout), 3x3 as HWIO).
    ws = 0.1 * jax.random.normal(k[1], (Cin, Csq), jnp.float32)
    bs = 0.1 * jax.random.normal(k[2], (1, Csq), jnp.float32)
    w1 = 0.1 * jax.random.normal(k[3], (Csq, C1), jnp.float32)
    b1 = 0.1 * jax.random.normal(k[4], (1, C1), jnp.float32)
    w3 = 0.1 * jax.random.normal(k[5], (3, 3, Csq, C3), jnp.float32)
    b3 = 0.1 * jax.random.normal(k[6], (1, C3), jnp.float32)

    out = fire_module(x, ws, bs, w1, b1, w3, b3)
    out = jax.block_until_ready(out)

    ref = _reference(x, ws, bs, w1, b1, w3, b3)
    assert out.shape == (N, C1 + C3, H, W)
    # bf16 MXU inputs (f32 accumulation) -> compare against f32 reference with
    # a tolerance that covers bf16 rounding of activations/weights.
    np.testing.assert_allclose(np.asarray(out), np.asarray(ref),
                               rtol=2e-2, atol=2e-2)
    print("KERNEL_OK")
</pallas_src>

<mosaic_0001>
module attributes {stable_mosaic.version = 11 : i64} {
  func.func @_fire_kernel(%arg0: i32, %arg1: memref<1x16x16x4xf32, #tpu.memory_space<vmem>>, %arg2: memref<4x3xbf16, #tpu.memory_space<vmem>>, %arg3: memref<1x3xf32, #tpu.memory_space<vmem>>, %arg4: memref<27x8xbf16, #tpu.memory_space<vmem>>, %arg5: memref<1x8xf32, #tpu.memory_space<vmem>>, %arg6: memref<1x16x16x8xf32, #tpu.memory_space<vmem>>, %arg7: memref<18x18x3xbf16, #tpu.memory_space<vmem>>) attributes {dimension_semantics = [#tpu.dimension_semantics<parallel>], iteration_bounds = array<i64: 2>, scalar_prefetch = 0 : i64, scratch_operands = 1 : i64, tpu.core_type = #tpu.core_type<tc>, window_params = [{transform_indices = @transform_0, window_bounds = array<i64: 1, 16, 16, 4>}, {pipeline_mode = #tpu.pipeline_mode<synchronous>, transform_indices = @transform_1, window_bounds = array<i64: 4, 3>}, {pipeline_mode = #tpu.pipeline_mode<synchronous>, transform_indices = @transform_2, window_bounds = array<i64: 1, 3>}, {pipeline_mode = #tpu.pipeline_mode<synchronous>, transform_indices = @transform_3, window_bounds = array<i64: 27, 8>}, {pipeline_mode = #tpu.pipeline_mode<synchronous>, transform_indices = @transform_4, window_bounds = array<i64: 1, 8>}, {transform_indices = @transform_5, window_bounds = array<i64: 1, 16, 16, 8>}]} {
    %cst = arith.constant 0.000000e+00 : bf16
    %0 = vector.broadcast %cst : bf16 to vector<1x18x3xbf16>
    %cst_0 = arith.constant 0.000000e+00 : bf16
    %1 = vector.broadcast %cst_0 : bf16 to vector<18x1x3xbf16>
    %c0 = arith.constant 0 : index
    %c0_1 = arith.constant 0 : index
    %c0_2 = arith.constant 0 : index
    %2 = vector.load %arg7[%c0, %c0_1, %c0_2] : memref<18x18x3xbf16, #tpu.memory_space<vmem>>, vector<1x18x3xbf16>
    tpu.vector_store %arg7[%c0, %c0_1, %c0_2], %0 {strides = array<i32>} : memref<18x18x3xbf16, #tpu.memory_space<vmem>>, vector<1x18x3xbf16>,
    %c17 = arith.constant 17 : index
    %c0_3 = arith.constant 0 : index
    %c0_4 = arith.constant 0 : index
    %3 = vector.load %arg7[%c17, %c0_3, %c0_4] : memref<18x18x3xbf16, #tpu.memory_space<vmem>>, vector<1x18x3xbf16>
    tpu.vector_store %arg7[%c17, %c0_3, %c0_4], %0 {strides = array<i32>} : memref<18x18x3xbf16, #tpu.memory_space<vmem>>, vector<1x18x3xbf16>,
    %c0_5 = arith.constant 0 : index
    %c0_6 = arith.constant 0 : index
    %c0_7 = arith.constant 0 : index
    %4 = vector.load %arg7[%c0_5, %c0_6, %c0_7] : memref<18x18x3xbf16, #tpu.memory_space<vmem>>, vector<18x1x3xbf16>
    tpu.vector_store %arg7[%c0_5, %c0_6, %c0_7], %1 {strides = array<i32>} : memref<18x18x3xbf16, #tpu.memory_space<vmem>>, vector<18x1x3xbf16>,
    %c0_8 = arith.constant 0 : index
    %c17_9 = arith.constant 17 : index
    %c0_10 = arith.constant 0 : index
    %5 = vector.load %arg7[%c0_8, %c17_9, %c0_10] : memref<18x18x3xbf16, #tpu.memory_space<vmem>>, vector<18x1x3xbf16>
    tpu.vector_store %arg7[%c0_8, %c17_9, %c0_10], %1 {strides = array<i32>} : memref<18x18x3xbf16, #tpu.memory_space<vmem>>, vector<18x1x3xbf16>,
    %c0_11 = arith.constant 0 : index
    %c0_12 = arith.constant 0 : index
    %6 = vector.load %arg2[%c0_11, %c0_12] : memref<4x3xbf16, #tpu.memory_space<vmem>>, vector<4x3xbf16>
    %c0_13 = arith.constant 0 : index
    %c0_14 = arith.constant 0 : index
    %7 = vector.load %arg3[%c0_13, %c0_14] : memref<1x3xf32, #tpu.memory_space<vmem>>, vector<1x3xf32>
    %c0_15 = arith.constant 0 : index
    %c0_16 = arith.constant 0 : index
    %8 = vector.load %arg4[%c0_15, %c0_16] : memref<27x8xbf16, #tpu.memory_space<vmem>>, vector<27x8xbf16>
    %c0_17 = arith.constant 0 : index
    %c0_18 = arith.constant 0 : index
    %9 = vector.load %arg5[%c0_17, %c0_18] : memref<1x8xf32, #tpu.memory_space<vmem>>, vector<1x8xf32>
    %c0_19 = arith.constant 0 : index
    %c0_20 = arith.constant 0 : index
    %c0_21 = arith.constant 0 : index
    %c0_22 = arith.constant 0 : index
    %10 = vector.load %arg1[%c0_19, %c0_20, %c0_21, %c0_22] : memref<1x16x16x4xf32, #tpu.memory_space<vmem>>, vector<1x16x16x4xf32>
    %11 = vector.shape_cast %10 : vector<1x16x16x4xf32> to vector<16x16x4xf32>
    %12 = vector.shape_cast %11 : vector<16x16x4xf32> to vector<256x4xf32>
    %13 = arith.truncf %12 : vector<256x4xf32> to vector<256x4xbf16>
    %cst_23 = arith.constant dense<0.000000e+00> : vector<256x3xf32>
    %14 = tpu.matmul %13, %6, %cst_23 {dimension_numbers = #tpu.dot_dimension_numbers<[1], [0], [0], [1], [0, 0, 1, 1], [], []>} : vector<256x4xbf16>, vector<4x3xbf16>, vector<256x3xf32> -> vector<256x3xf32>
    %15 = vector.broadcast %7 : vector<1x3xf32> to vector<256x3xf32>
    %16 = arith.addf %14, %15 : vector<256x3xf32>
    %cst_24 = arith.constant 0.000000e+00 : f32
    %17 = vector.broadcast %cst_24 : f32 to vector<256x3xf32>
    %18 = arith.maximumf %16, %17 : vector<256x3xf32>
    %19 = vector.shape_cast %18 : vector<256x3xf32> to vector<16x16x3xf32>
    %20 = arith.truncf %19 : vector<16x16x3xf32> to vector<16x16x3xbf16>
    %c1 = arith.constant 1 : index
    %c1_25 = arith.constant 1 : index
    %c0_26 = arith.constant 0 : index
    %21 = vector.load %arg7[%c1, %c1_25, %c0_26] : memref<18x18x3xbf16, #tpu.memory_space<vmem>>, vector<16x16x3xbf16>
    tpu.vector_store %arg7[%c1, %c1_25, %c0_26], %20 {strides = array<i32>} : memref<18x18x3xbf16, #tpu.memory_space<vmem>>, vector<16x16x3xbf16>,
    %c0_27 = arith.constant 0 : index
    %c0_28 = arith.constant 0 : index
    %c0_29 = arith.constant 0 : index
    %22 = vector.load %arg7[%c0_27, %c0_28, %c0_29] : memref<18x18x3xbf16, #tpu.memory_space<vmem>>, vector<16x16x3xbf16>
    %23 = vector.shape_cast %22 : vector<16x16x3xbf16> to vector<256x3xbf16>
    %c0_30 = arith.constant 0 : index
    %c1_31 = arith.constant 1 : index
    %c0_32 = arith.constant 0 : index
    %24 = vector.load %arg7[%c0_30, %c1_31, %c0_32] : memref<18x18x3xbf16, #tpu.memory_space<vmem>>, vector<16x16x3xbf16>
    %25 = vector.shape_cast %24 : vector<16x16x3xbf16> to vector<256x3xbf16>
    %c0_33 = arith.constant 0 : index
    %c2 = arith.constant 2 : index
    %c0_34 = arith.constant 0 : index
    %26 = vector.load %arg7[%c0_33, %c2, %c0_34] : memref<18x18x3xbf16, #tpu.memory_space<vmem>>, vector<16x16x3xbf16>
    %27 = vector.shape_cast %26 : vector<16x16x3xbf16> to vector<256x3xbf16>
    %c1_35 = arith.constant 1 : index
    %c0_36 = arith.constant 0 : index
    %c0_37 = arith.constant 0 : index
    %28 = vector.load %arg7[%c1_35, %c0_36, %c0_37] : memref<18x18x3xbf16, #tpu.memory_space<vmem>>, vector<16x16x3xbf16>
    %29 = vector.shape_cast %28 : vector<16x16x3xbf16> to vector<256x3xbf16>
    %c1_38 = arith.constant 1 : index
    %c1_39 = arith.constant 1 : index
    %c0_40 = arith.constant 0 : index
    %30 = vector.load %arg7[%c1_38, %c1_39, %c0_40] : memref<18x18x3xbf16, #tpu.memory_space<vmem>>, vector<16x16x3xbf16>
    %31 = vector.shape_cast %30 : vector<16x16x3xbf16> to vector<256x3xbf16>
    %c1_41 = arith.constant 1 : index
    %c2_42 = arith.constant 2 : index
    %c0_43 = arith.constant 0 : index
    %32 = vector.load %arg7[%c1_41, %c2_42, %c0_43] : memref<18x18x3xbf16, #tpu.memory_space<vmem>>, vector<16x16x3xbf16>
    %33 = vector.shape_cast %32 : vector<16x16x3xbf16> to vector<256x3xbf16>
    %c2_44 = arith.constant 2 : index
    %c0_45 = arith.constant 0 : index
    %c0_46 = arith.constant 0 : index
    %34 = vector.load %arg7[%c2_44, %c0_45, %c0_46] : memref<18x18x3xbf16, #tpu.memory_space<vmem>>, vector<16x16x3xbf16>
    %35 = vector.shape_cast %34 : vector<16x16x3xbf16> to vector<256x3xbf16>
    %c2_47 = arith.constant 2 : index
    %c1_48 = arith.constant 1 : index
    %c0_49 = arith.constant 0 : index
    %36 = vector.load %arg7[%c2_47, %c1_48, %c0_49] : memref<18x18x3xbf16, #tpu.memory_space<vmem>>, vector<16x16x3xbf16>
    %37 = vector.shape_cast %36 : vector<16x16x3xbf16> to vector<256x3xbf16>
    %c2_50 = arith.constant 2 : index
    %c2_51 = arith.constant 2 : index
    %c0_52 = arith.constant 0 : index
    %38 = vector.load %arg7[%c2_50, %c2_51, %c0_52] : memref<18x18x3xbf16, #tpu.memory_space<vmem>>, vector<16x16x3xbf16>
    %39 = vector.shape_cast %38 : vector<16x16x3xbf16> to vector<256x3xbf16>
    %40 = tpu.concatenate %23, %25, %27, %29, %31, %33, %35, %37, %39 in 1 : vector<256x3xbf16>, vector<256x3xbf16>, vector<256x3xbf16>, vector<256x3xbf16>, vector<256x3xbf16>, vector<256x3xbf16>, vector<256x3xbf16>, vector<256x3xbf16>, vector<256x3xbf16> -> vector<256x27xbf16>
    %cst_53 = arith.constant dense<0.000000e+00> : vector<256x8xf32>
    %41 = tpu.matmul %40, %8, %cst_53 {dimension_numbers = #tpu.dot_dimension_numbers<[1], [0], [0], [1], [0, 0, 1, 1], [], []>} : vector<256x27xbf16>, vector<27x8xbf16>, vector<256x8xf32> -> vector<256x8xf32>
    %42 = vector.broadcast %9 : vector<1x8xf32> to vector<256x8xf32>
    %43 = arith.addf %41, %42 : vector<256x8xf32>
    %cst_54 = arith.constant 0.000000e+00 : f32
    %44 = vector.broadcast %cst_54 : f32 to vector<256x8xf32>
    %45 = arith.maximumf %43, %44 : vector<256x8xf32>
    %46 = vector.shape_cast %45 : vector<256x8xf32> to vector<16x16x8xf32>
    %c0_55 = arith.constant 0 : index
    %c0_56 = arith.constant 0 : index
    %c0_57 = arith.constant 0 : index
    %c0_58 = arith.constant 0 : index
    %47 = vector.load %arg6[%c0_55, %c0_56, %c0_57, %c0_58] : memref<1x16x16x8xf32, #tpu.memory_space<vmem>>, vector<1x16x16x8xf32>
    %48 = vector.shape_cast %47 : vector<1x16x16x8xf32> to vector<16x16x8xf32>
    %49 = vector.shape_cast %46 : vector<16x16x8xf32> to vector<1x16x16x8xf32>
    tpu.vector_store %arg6[%c0_55, %c0_56, %c0_57, %c0_58], %49 {strides = array<i32>} : memref<1x16x16x8xf32, #tpu.memory_space<vmem>>, vector<1x16x16x8xf32>,
    return
  }
  func.func @transform_0(%arg0: i32) -> (i32, i32, i32, i32) {
    %c0_i32 = arith.constant 0 : i32
    %c0_i32_0 = arith.constant 0 : i32
    %c0_i32_1 = arith.constant 0 : i32
    %c0_i32_2 = arith.constant 0 : i32
    return %arg0, %c0_i32, %c0_i32_0, %c0_i32_1 : i32, i32, i32, i32
  }
  func.func @transform_1(%arg0: i32) -> (i32, i32) {
    %c0_i32 = arith.constant 0 : i32
    %c0_i32_0 = arith.constant 0 : i32
    %c0_i32_1 = arith.constant 0 : i32
    return %c0_i32, %c0_i32_0 : i32, i32
  }
  func.func @transform_2(%arg0: i32) -> (i32, i32) {
    %c0_i32 = arith.constant 0 : i32
    %c0_i32_0 = arith.constant 0 : i32
    %c0_i32_1 = arith.constant 0 : i32
    return %c0_i32, %c0_i32_0 : i32, i32
  }
  func.func @transform_3(%arg0: i32) -> (i32, i32) {
    %c0_i32 = arith.constant 0 : i32
    %c0_i32_0 = arith.constant 0 : i32
    %c0_i32_1 = arith.constant 0 : i32
    return %c0_i32, %c0_i32_0 : i32, i32
  }
  func.func @transform_4(%arg0: i32) -> (i32, i32) {
    %c0_i32 = arith.constant 0 : i32
    %c0_i32_0 = arith.constant 0 : i32
    %c0_i32_1 = arith.constant 0 : i32
    return %c0_i32, %c0_i32_0 : i32, i32
  }
  func.func @transform_5(%arg0: i32) -> (i32, i32, i32, i32) {
    %c0_i32 = arith.constant 0 : i32
    %c0_i32_0 = arith.constant 0 : i32
    %c0_i32_1 = arith.constant 0 : i32
    %c0_i32_2 = arith.constant 0 : i32
    return %arg0, %c0_i32, %c0_i32_0, %c0_i32_1 : i32, i32, i32, i32
  }
}

</mosaic_0001>

<bundles_post_ra>
// kernel: tpu_custom_call.1
= control target key start
LH: loop header
LB: loop body
LE: loop exit
PB: predicated region body
PF: predicated region fallthrough
CT: control target
= control target key end

     0   :  { %s4579_s18 = smov 0   ;;  %s6214_s0 = inlined_call_operand.vmem [shape: f32[2,16,16,4], index: 0, kind: input, shape index: {}]   ;;  %s6215_s1 = inlined_call_operand.vmem [shape: bf16[4,3], index: 1, kind: input, shape index: {}]   ;;  %s6216_s2 = inlined_call_operand.vmem [shape: f32[1,3], index: 2, kind: input, shape index: {}]   ;;  %s6217_s3 = inlined_call_operand.vmem [shape: bf16[27,8], index: 3, kind: input, shape index: {}]   ;;  %s6218_s4 = inlined_call_operand.vmem [shape: f32[1,8], index: 4, kind: input, shape index: {}]   ;;  %s6219_s5 = inlined_call_operand.vmem [shape: f32[2,16,16,8], index: 5, kind: output, shape index: {}]  }
   0x1 LB: > { %s4159_s19 = sadd.s32 4294967295, %s4537_s18   ;;  %p4163_p0 = scmp.ge.s32.totalorder %s4537_s18, 1  ;;  %s4537_s18 = sphi %s4579_s18, %s15_s18  }
   0x2   : > { %p187_p1 = scmp.lt.s32.totalorder %s4537_s18, 3 }
   0x4   : > { %p188_p2 = pnand %p4163_p0, %p187_p1 }
   0x5   : > { %p215_p3 = scmp.lt.s32.totalorder (!%p188_p2), %s4159_s19, 1  ;;  %s4540_s26 = smov (!%p188_p2), 6  }
   0x6   : > { %191 = sbr.rel (%p188_p2) target bundleno = 857 (0x359), region = 40  ;;  %s4541_s29 = smov (!%p188_p2), 3  }
   0x7   : > { %s4542_s30 = smov (!%p188_p2), 9   ;;  %s4543_s6 = smov (!%p188_p2), 15  }
   0x8   : > { %s4544_s7 = smov (!%p188_p2), 18   ;;  %s4545_s8 = smov (!%p188_p2), 12  }
   0x9   : > { %s4546_s9 = smov (!%p188_p2), 24   ;;  %s4547_s10 = smov (!%p188_p2), 21  }
   0xb   : > { %v348_v0 = vld [vmem:[%s6215_s1] sm:$0x3]  ;;  %vm455_vm0 = vcmask 1041408   ;;  %s6233_s19 = smov (!%p215_p3, %s4159_s19), 1  ;;  %vm406_vm1 = vcmask 31744   ;;  %vm229_vm2 = vcmask 16384  }
   0xc   : > { %v457_v1 = vsel %vm455_vm0, %v348_v0, 0  ;;  %s4450_s22 = sshll.u32 %s6233_s19, 8  ;;  %vm236_vm3 = vsmask.f32 256  ;;  %v241_v20 = vld [vmem:[#allocation2 + $0xc] sm:$0x1] }
   0xd   : > { %466 = vmatpush.bf16.msra.mxu0 %v457_v1  ;;  %4502 = vmatpush.bf16.msra.mxu3 %v457_v1  ;;  %s4598_s25 = scalar_lea.vmem %s6214_s0, %s4450_s22  ;;  %vm4620_vm4 = vmand %vm229_vm2, %vm236_vm3  ;;  %vm226_vm5 = vcmask 19456   ;;  %v4539_v32 = vmov 0   ;;  %vm292_vm6 = vsmask.f32 7938  ;;  %v297_v39 = vld [vmem:[#allocation2 + $0x14] sm:$0x1]  ;;  %s5882_s12 = scalar_lea.vmem %s6219_s5, %s4450_s22 }
   0xe   : > { %v355_v2 = vld [vmem:[%s4598_s25] sm:$0xff]  ;;  %v356_v3 = vld [vmem:[%s4598_s25 + $0x8] sm:$0xff]  ;;  %v373_v4 = vld [vmem:[%s4598_s25 + $0x90] sm:$0xff]  ;;  %v242_v22 = vsel %vm4620_vm4, 0, %v241_v20  ;;  %227 = vst.msk [vmem:[#allocation2] sm:$0xf] %vm226_vm5, %v4539_v32 }
   0xf   : > { %v387_v5 = vpack.c.bf16 %v356_v3, %v355_v2  ;;  %v374_v6 = vld [vmem:[%s4598_s25 + $0x98] sm:$0xff]  ;;  %v357_v8 = vld [vmem:[%s4598_s25 + $0x10] sm:$0xff]  ;;  %v375_v10 = vld [vmem:[%s4598_s25 + $0xa0] sm:$0xff]  ;;  %243 = vst [vmem:[#allocation2 + $0xc] sm:$0x1] %v242_v22  ;;  %vm1548_vm8 = vcmask 1042432  }
  0x10   : > { %v396_v7 = vpack.c.bf16 %v374_v6, %v373_v4  ;;  %v358_v9 = vld [vmem:[%s4598_s25 + $0x18] sm:$0xff]  ;;  %v376_v11 = vld [vmem:[%s4598_s25 + $0xa8] sm:$0xff]  ;;  %v359_v14 = vld [vmem:[%s4598_s25 + $0x20] sm:$0xff]  ;;  %228 = vst.msk [vmem:[#allocation2 + $0x4] sm:$0xf] %vm226_vm5, %v4539_v32  ;;  %vm1549_vm9 = vcmask 1046532  }
  0x11   : > { %4168 = vmatmul.msk.bf16.vlgmr.msra.gmra.mxu0 %vm406_vm1, %v387_v5  ;;  %v388_v12 = vpack.c.bf16 %v358_v9, %v357_v8  ;;  %v397_v13 = vpack.c.bf16 %v376_v11, %v375_v10  ;;  %v360_v15 = vld [vmem:[%s4598_s25 + $0x28] sm:$0xff]  ;;  %v377_v16 = vld [vmem:[%s4598_s25 + $0xb0] sm:$0xff]  ;;  %v378_v17 = vld [vmem:[%s4598_s25 + $0xb8] sm:$0xff]  ;;  %230 = vst.msk [vmem:[#allocation2 + $0x8] sm:$0x1] %vm229_vm2, %v4539_v32 }
  0x12   : > { %4177 = vmatmul.msk.bf16.vlgmr.msra.gmra.mxu3 %vm406_vm1, %v396_v7  ;;  %v389_v18 = vpack.c.bf16 %v360_v15, %v359_v14  ;;  %v398_v19 = vpack.c.bf16 %v378_v17, %v377_v16  ;;  %v361_v23 = vld [vmem:[%s4598_s25 + $0x30] sm:$0xff]  ;;  %v362_v24 = vld [vmem:[%s4598_s25 + $0x38] sm:$0xff]  ;;  %v379_v25 = vld [vmem:[%s4598_s25 + $0xc0] sm:$0xff]  ;;  %232 = vst.msk [vmem:[#allocation2 + $0xcc] sm:$0xf] %vm226_vm5, %v4539_v32 }
  0x13   : > { %v380_v26 = vld [vmem:[%s4598_s25 + $0xc8] sm:$0xff]  ;;  %v390_v27 = vpack.c.bf16 %v362_v24, %v361_v23  ;;  %v363_v29 = vld [vmem:[%s4598_s25 + $0x40] sm:$0xff]  ;;  %233 = vst.msk [vmem:[#allocation2 + $0xd0] sm:$0xf] %vm226_vm5, %v4539_v32  ;;  %vm4643_vm7 = vmand %vm229_vm2, %vm292_vm6  ;;  %vm1097_vm11 = vsmask.f32 3328 }
  0x14   : > { %v399_v28 = vpack.c.bf16 %v380_v26, %v379_v25  ;;  %v364_v30 = vld [vmem:[%s4598_s25 + $0x48] sm:$0xff]  ;;  %234 = vst.msk [vmem:[#allocation2 + $0xd4] sm:$0x1] %vm229_vm2, %v4539_v32  ;;  %v365_v38 = vld [vmem:[%s4598_s25 + $0x50] sm:$0xff]  ;;  %v366_v40 = vld [vmem:[%s4598_s25 + $0x58] sm:$0xff]  ;;  %v298_v41 = vsel %vm4643_vm7, 0, %v297_v39 }
  0x15   : > { %v391_v31 = vpack.c.bf16 %v364_v30, %v363_v29  ;;  %v238_v34 = vld [vmem:[#allocation2] sm:$0x1]  ;;  %v392_v42 = vpack.c.bf16 %v366_v40, %v365_v38  ;;  %v268_v43 = vld [vmem:[#allocation2 + $0x78] sm:$0x1]  ;;  %299 = vst [vmem:[#allocation2 + $0x14] sm:$0x1] %v298_v41  ;;  %vm4660_vm10 = vmor %vm1548_vm8, %vm1549_vm9 }
  0x16   : > { %v239_v35 = vsel %vm4620_vm4, 0, %v238_v34  ;;  %v269_v45 = vsel %vm4620_vm4, 0, %v268_v43  ;;  %v1484_v47 = vld [vmem:[#allocation2] sm:$0xe]  ;;  %v381_v49 = vld [vmem:[%s4598_s25 + $0xd0] sm:$0xff]  ;;  %v382_v50 = vld [vmem:[%s4598_s25 + $0xd8] sm:$0xff] }
  0x17   : > { %240 = vst [vmem:[#allocation2] sm:$0x1] %v239_v35  ;;  %v1050_v44 = vld [vmem:[#allocation2 + $0x4] sm:$0xf]  ;;  %v4184_v51 = vrot.slane %v1484_v47, 9  ;;  %v400_v53 = vpack.c.bf16 %v382_v50, %v381_v49  ;;  %v368_v17 = vld [vmem:[%s4598_s25 + $0x68] sm:$0xff]  ;;  %vm4701_vm14 = vmand %vm226_vm5, %vm292_vm6 }
  0x18   : > { %v294_v36 = vld [vmem:[#allocation2 + $0x8] sm:$0x1]  ;;  %v1553_v46 = vrot.slane %v1050_v44, 5  ;;  %270 = vst [vmem:[#allocation2 + $0x78] sm:$0x1] %v269_v45  ;;  %v1110_v58 = vshll.u32 %v1050_v44, 16 }
  0x19   : > { %v295_v37 = vsel %vm4643_vm7, 0, %v294_v36  ;;  %v1114_v61 = vshrl.u32 %v1050_v44, 16  ;;  %v324_v62 = vld [vmem:[#allocation2 + $0x80] sm:$0x1]  ;;  %vm1098_vm12 = vsmask.f32 7440 }
  0x1a   : > { %296 = vst [vmem:[#allocation2 + $0x8] sm:$0x1] %v295_v37  ;;  %v1555_v52 = vrot.slane %v1553_v46, 4  ;;  %v1554_v59 = vsel %vm4660_vm10, %v4184_v51, %v1553_v46  ;;  %v325_v2 = vsel %vm4643_vm7, 0, %v324_v62  ;;  %v1112_v4 = vrot.slane %v1110_v58, 5  ;;  %vm4671_vm13 = vmor %vm1097_vm11, %vm1098_vm12  ;;  %v367_v16 = vld [vmem:[%s4598_s25 + $0x60] sm:$0xff] }
  0x1b   : > { %v3024_v63 = vunpack.c.l.b16 %v1554_v59  ;;  %v1116_v5 = vrot.slane %v1114_v61, 4  ;;  %326 = vst [vmem:[#allocation2 + $0x80] sm:$0x1] %v325_v2  ;;  %v393_v20 = vpack.c.bf16 %v368_v17, %v367_v16  ;;  %v4685_v23 = vld [vmem:[%s6216_s2] ss:$0 sm:$0xff]  ;;  %v384_v32 = vld [vmem:[%s4598_s25 + $0xe8] sm:$0xff] }
  0x1c   : > { %v244_v24 = vld [vmem:[#allocation2 + $0x18] sm:$0x1]  ;;  %v937_v45 = vld [vmem:[#allocation2 + $0xc] sm:$0xf]  ;;  %v271_v49 = vld [vmem:[#allocation2 + $0x84] sm:$0x1] }
  0x1d   : > { %v1117_v9 = vor.u32 %v1116_v5, %v1112_v4  ;;  %v245_v26 = vsel %vm4620_vm4, 0, %v244_v24  ;;  %v369_v50 = vld [vmem:[%s4598_s25 + $0x70] sm:$0xff]  ;;  %v370_v51 = vld [vmem:[%s4598_s25 + $0x78] sm:$0xff]  ;;  %vm612_vm15 = vsmask.f32 4368  ;;  %vm3665_vm2 = vcmask 48128  }
  0x1e   : > { %v1049_v48 = vld [vmem:[#allocation2] sm:$0xf]  ;;  %246 = vst [vmem:[#allocation2 + $0x18] sm:$0x1] %v245_v26  ;;  %vm4715_vm0 = vmor %vm236_vm3, %vm612_vm15  ;;  %vm3698_vm3 = vcmask 72704   ;;  %vm3731_vm6 = vcmask 97280  }
  0x1f   : > { %v1101_v56 = vshrl.u32 %v1049_v48, 16  ;;  %v1104_v57 = vshll.u32 %v1049_v48, 16  ;;  %v1118_v14 = vrot.slane %v1117_v9, 4  ;;  %vm3764_vm8 = vcmask 121856  }
  0x20   : > { %vm3797_vm9 = vcmask 146432   ;;  %vm3943_vm11 = vcmask 1044480   ;;  %vm3944_vm12 = vcmask 1045504   ;;  %vm3830_vm15 = vcmask 171008  }
  0x21   : > { %4169 = vmatmul.msk.bf16.gmra.mxu0 %vm406_vm1, %v388_v12  ;;  %v1081_v54 = vld [vmem:[#allocation2 + $0x8] sm:$0x1]  ;;  %v1103_v0 = vrot.slane %v1101_v56, 4  ;;  %v1106_v1 = vrot.slane %v1104_v57, 5 }
  0x22   : > { %4178 = vmatmul.msk.bf16.gmra.mxu3 %vm406_vm1, %v397_v13  ;;  %v1556_v60 = vrot.slane %v1081_v54, 5  ;;  %v1120_v8 = vshll.u32 %v1081_v54, 16  ;;  %v394_v54 = vpack.c.bf16 %v370_v51, %v369_v50 }
  0x23   : > { %v1107_v7 = vor.u32 %v1106_v1, %v1103_v0  ;;  %v1000_v1 = vld [vmem:[#allocation2 + $0x78] sm:$0xf] }
  0x24   : > { %v1557_v3 = vsel %vm4660_vm10, %v1555_v52, %v1556_v60  ;;  %v1122_v13 = vrot.slane %v1120_v8, 5 }
  0x25   : > { %v3025_v6 = vunpack.c.l.b16 %v1557_v3  ;;  %v1108_v12 = vrot.slane %v1107_v7, 4  ;;  %v941_v7 = vld [vmem:[#allocation2 + $0x14] sm:$0x1] }
  0x27   : > { %v3056_v10 = vpack.c.b16 %v3025_v6, %v3024_v63  ;;  %v1113_v15 = vsel %vm4671_vm13, %v1108_v12, %v1112_v4 }
  0x29   : > { %3072 = vrot.lane.b32.xlu1 %v3056_v10, %s4540_s26 }
  0x31   : > { %4170 = vmatmul.msk.bf16.gmra.mxu0 %vm406_vm1, %v389_v18  ;;  %v1123_v18 = vsel %vm4671_vm13, %v1118_v14, %v1122_v13 }
  0x32   : > { %4179 = vmatmul.msk.bf16.gmra.mxu3 %vm406_vm1, %v398_v19  ;;  %v2944_v19 = vunpack.c.l.b16 %v1113_v15  ;;  %v2945_v22 = vunpack.c.l.b16 %v1123_v18 }
  0x34   : > { %v2976_v25 = vpack.c.b16 %v2945_v22, %v2944_v19 }
  0x36   : > { %2992 = vrot.lane.b32.xlu0 %v2976_v25, %s4541_s29 }
  0x41   : > { %4171 = vmatmul.msk.bf16.gmra.mxu0 %vm406_vm1, %v390_v27  ;;  %v300_v27 = vld [vmem:[#allocation2 + $0x20] sm:$0x1] }
  0x42   : > { %4180 = vmatmul.msk.bf16.gmra.mxu3 %vm406_vm1, %v399_v28  ;;  %v301_v29 = vsel %vm4643_vm7, 0, %v300_v27 }
  0x43   : > { %302 = vst [vmem:[#allocation2 + $0x20] sm:$0x1] %v301_v29 }
  0x51   : > { %4172 = vmatmul.msk.bf16.gmra.mxu0 %vm406_vm1, %v391_v31  ;;  %v383_v31 = vld [vmem:[%s4598_s25 + $0xe0] sm:$0xff] }
  0x52   : > { %4181 = vmatmul.msk.bf16.gmra.mxu3 %vm406_vm1, %v400_v53  ;;  %v401_v34 = vpack.c.bf16 %v384_v32, %v383_v31  ;;  %v272_v53 = vsel %vm4620_vm4, 0, %v271_v49 }
  0x53   : > { %273 = vst [vmem:[#allocation2 + $0x84] sm:$0x1] %v272_v53 }
  0x61   : > { %4173 = vmatmul.msk.bf16.gmra.mxu0 %vm406_vm1, %v392_v42 }
  0x62   : > { %4182 = vmatmul.msk.bf16.gmra.mxu3 %vm406_vm1, %v401_v34 }
  0x71   : > { %4174 = vmatmul.msk.bf16.gmra.mxu0 %vm406_vm1, %v393_v20 }
  0x81   : > { %4175 = vmatmul.msk.bf16.gmra.mxu0 %vm406_vm1, %v394_v54 }
  0x8e   : > { %v468_v28 = vpop.f32.mrf.mxu0 }
  0x8f   : > { %v469_v30 = vadd.f32 %v4685_v23, %v468_v28 }
  0x91   : > { %v548_v35 = vmax.f32 %v469_v30, 0.0 }
  0x93   : > { %v580_v36 = vpack.c.bf16 %v548_v35, %v548_v35 }
  0x95   : > { %v615_v37 = vshrl.u32 %v580_v36, 16  ;;  %v513_v38 = vpop.f32.mrf.mxu3  ;;  %v618_v42 = vshll.u32 %v580_v36, 16 }
  0x96   : > { %v514_v39 = vadd.f32 %v4685_v23, %v513_v38  ;;  %v470_v40 = vpop.f32.mrf.mxu0 }
  0x97   : > { %v617_v41 = vrot.slane %v615_v37, 7  ;;  %v471_v43 = vadd.f32 %v4685_v23, %v470_v40 }
  0x98   : > { %v566_v46 = vmax.f32 %v514_v39, 0.0  ;;  %v1004_v39 = vld [vmem:[#allocation2 + $0x80] sm:$0x1] }
  0x99   : > { %v620_v47 = vor.u32 %v618_v42, %v617_v41  ;;  %v549_v48 = vmax.f32 %v471_v43, 0.0  ;;  %v621_v9 = vrot.slane %v617_v41, 4 }
  0x9a   : > { %v598_v52 = vpack.c.bf16 %v566_v46, %v566_v46 }
  0x9b   : > { %v938_v56 = vsel %vm4701_vm14, %v620_v47, %v937_v45  ;;  %v581_v57 = vpack.c.bf16 %v549_v48, %v549_v48  ;;  %v944_v47 = vld [vmem:[#allocation2 + $0x18] sm:$0xf] }
  0x9c   : > { %939 = vst [vmem:[#allocation2 + $0xc] sm:$0xf] %v938_v56  ;;  %v768_v58 = vshrl.u32 %v598_v52, 16  ;;  %v771_v59 = vshll.u32 %v598_v52, 16 }
  0x9d   : > { %v623_v60 = vshrl.u32 %v581_v57, 16  ;;  %v515_v61 = vpop.f32.mrf.mxu3  ;;  %v626_v3 = vshll.u32 %v581_v57, 16 }
  0x9e   : > { %v770_v62 = vrot.slane %v768_v58, 7  ;;  %v516_v63 = vadd.f32 %v4685_v23, %v515_v61  ;;  %v473_v0 = vpop.f32.mrf.mxu0 }
  0x9f   : > { %v625_v2 = vrot.slane %v623_v60, 7  ;;  %v474_v4 = vadd.f32 %v4685_v23, %v473_v0 }
  0xa0   : > { %v773_v5 = vor.u32 %v771_v59, %v770_v62  ;;  %v567_v8 = vmax.f32 %v516_v63, 0.0  ;;  %v774_v14 = vrot.slane %v770_v62, 4 }
  0xa1   : > { %v628_v10 = vor.u32 %v626_v3, %v625_v2  ;;  %v630_v12 = vrot.slane %v625_v2, 4  ;;  %v550_v13 = vmax.f32 %v474_v4, 0.0 }
  0xa2   : > { %v1001_v15 = vsel %vm4701_vm14, %v773_v5, %v1000_v1  ;;  %v599_v16 = vpack.c.bf16 %v567_v8, %v567_v8 }
  0xa3   : > { %1002 = vst [vmem:[#allocation2 + $0x78] sm:$0xf] %v1001_v15  ;;  %v629_v17 = vsel %vm4715_vm0, %v621_v9, %v628_v10  ;;  %v942_v18 = vsel %vm4620_vm4, %v630_v12, %v941_v7  ;;  %v582_v19 = vpack.c.bf16 %v550_v13, %v550_v13  ;;  %v2095_v20 = vld [vmem:[#allocation2 + $0xc] sm:$0xe] }
  0xa4   : > { %v4725_v22 = vld [vmem:[#allocation2 + $0xc] sm:$0xe]  ;;  %940 = vst.msk [vmem:[#allocation2 + $0x10] sm:$0xf] %vm226_vm5, %v629_v17  ;;  %v776_v24 = vshrl.u32 %v599_v16, 16  ;;  %v779_v25 = vshll.u32 %v599_v16, 16 }
  0xa5   : > { %v4200_v26 = vrot.slane %v2095_v20, 9  ;;  %v4185_v27 = vrot.slane %v4725_v22, 9  ;;  %943 = vst [vmem:[#allocation2 + $0x14] sm:$0x1] %v942_v18  ;;  %v632_v28 = vshrl.u32 %v582_v19, 16  ;;  %v635_v29 = vshll.u32 %v582_v19, 16  ;;  %v518_v30 = vpop.f32.mrf.mxu3 }
  0xa6   : > { %v1663_v31 = vld [vmem:[#allocation2 + $0xc] sm:$0xf]  ;;  %v778_v32 = vrot.slane %v776_v24, 7  ;;  %v475_v34 = vpop.f32.mrf.mxu0  ;;  %v519_v35 = vadd.f32 %v4685_v23, %v518_v30  ;;  %v1007_v20 = vld [vmem:[#allocation2 + $0x84] sm:$0xf] }
  0xa7   : > { %v1712_v36 = vshrl.u32 %v1663_v31, 16  ;;  %v1715_v37 = vshll.u32 %v1663_v31, 16  ;;  %v1051_v38 = vld [vmem:[#allocation2 + $0xc] sm:$0xf]  ;;  %v634_v40 = vrot.slane %v632_v28, 7  ;;  %v476_v41 = vadd.f32 %v4685_v23, %v475_v34 }
  0xa8   : > { %v1125_v42 = vshrl.u32 %v1051_v38, 16  ;;  %v1128_v43 = vshll.u32 %v1051_v38, 16  ;;  %v781_v45 = vor.u32 %v779_v25, %v778_v32  ;;  %v783_v46 = vrot.slane %v778_v32, 4  ;;  %v948_v24 = vld [vmem:[#allocation2 + $0x20] sm:$0x1] }
  0xa9   : > { %v568_v48 = vmax.f32 %v519_v35, 0.0  ;;  %v1714_v49 = vrot.slane %v1712_v36, 4  ;;  %v637_v50 = vor.u32 %v635_v29, %v634_v40  ;;  %v638_v51 = vrot.slane %v634_v40, 4 }
  0xaa   : > { %v551_v52 = vmax.f32 %v476_v41, 0.0  ;;  %v1717_v53 = vrot.slane %v1715_v37, 5  ;;  %v782_v54 = vsel %vm4715_vm0, %v774_v14, %v781_v45  ;;  %v1005_v56 = vsel %vm4620_vm4, %v783_v46, %v1004_v39  ;;  %v327_v39 = vld [vmem:[#allocation2 + $0x8c] sm:$0x1]  ;;  %v1494_v46 = vld [vmem:[#allocation2 + $0x78] sm:$0xe] }
  0xab   : > { %v600_v57 = vpack.c.bf16 %v568_v48, %v568_v48  ;;  %v4735_v58 = vrot.slane %v1125_v42, 4  ;;  %1003 = vst.msk [vmem:[#allocation2 + $0x7c] sm:$0xf] %vm226_vm5, %v782_v54  ;;  %v945_v59 = vsel %vm4701_vm14, %v637_v50, %v944_v47  ;;  %v4470_v61 = vld [vmem:[#allocation2 + $0xc] sm:$0xff]  ;;  %v1130_v63 = vrot.slane %v1128_v43, 5 }
  0xac   : > { %v583_v60 = vpack.c.bf16 %v551_v52, %v551_v52  ;;  %v4740_v62 = vld [vmem:[#allocation2 + $0x10] sm:$0xf]  ;;  %1006 = vst [vmem:[#allocation2 + $0x80] sm:$0x1] %v1005_v56  ;;  %v1695_v0 = vld [vmem:[#allocation2 + $0x14] sm:$0x1]  ;;  %v1718_v3 = vor.u32 %v1717_v53, %v1714_v49  ;;  %3168 = vrot.lane.b32.xlu1 %v4470_v61, %s4542_s30 }
  0xad   : > { %v2161_v1 = vrot.slane %v4740_v62, 5  ;;  %v785_v2 = vshrl.u32 %v600_v57, 16  ;;  %946 = vst [vmem:[#allocation2 + $0x18] sm:$0xf] %v945_v59  ;;  %v2164_v7 = vrot.slane %v1695_v0, 5  ;;  %v788_v8 = vshll.u32 %v600_v57, 16  ;;  %v520_v50 = vpop.f32.mrf.mxu3 }
  0xae   : > { %v640_v4 = vshrl.u32 %v583_v60, 16  ;;  %v643_v5 = vshll.u32 %v583_v60, 16  ;;  %v1052_v12 = vld [vmem:[#allocation2 + $0x10] sm:$0xf]  ;;  %v1082_v13 = vld [vmem:[#allocation2 + $0x14] sm:$0x1]  ;;  %v1131_v15 = vor.u32 %v1130_v63, %v4735_v58  ;;  %v521_v63 = vadd.f32 %v4685_v23, %v520_v50 }
  0xaf   : > { %v2162_v9 = vsel %vm4660_vm10, %v4200_v26, %v2161_v1  ;;  %v2163_v10 = vrot.slane %v2161_v1, 4  ;;  %v4746_v14 = vrot.slane %v785_v2, 7  ;;  %v1138_v18 = vshrl.u32 %v1052_v12, 16 }
  0xb0   : > { %v642_v16 = vrot.slane %v640_v4, 7  ;;  %v3280_v17 = vunpack.c.l.b16 %v2162_v9  ;;  %v1144_v19 = vshll.u32 %v1082_v13, 16  ;;  %v1560_v28 = vrot.slane %v1052_v12, 5 }
  0xb1   : > { %v2165_v25 = vsel %vm4660_vm10, %v2163_v10, %v2164_v7  ;;  %v1563_v29 = vrot.slane %v1082_v13, 5  ;;  %v790_v26 = vor.u32 %v788_v8, %v4746_v14  ;;  %v791_v34 = vrot.slane %v4746_v14, 4 }
  0xb2   : > { %v645_v30 = vor.u32 %v643_v5, %v642_v16  ;;  %v647_v31 = vrot.slane %v642_v16, 4  ;;  %v3281_v32 = vunpack.c.l.b16 %v2165_v25  ;;  %v1561_v35 = vsel %vm4660_vm10, %v4185_v27, %v1560_v28  ;;  %v4494_v45 = vld [vmem:[#allocation2 + $0x78] sm:$0xff] }
  0xb3   : > { %v1562_v36 = vrot.slane %v1560_v28, 4  ;;  %v1008_v37 = vsel %vm4701_vm14, %v790_v26, %v1007_v20  ;;  %v1719_v38 = vrot.slane %v1718_v3, 4  ;;  %v3026_v43 = vunpack.c.l.b16 %v1561_v35  ;;  %v4763_v22 = vld [vmem:[#allocation2 + $0x7c] sm:$0xf]  ;;  %v4777_v3 = vld [vmem:[#allocation2 + $0x80] sm:$0x1] }
  0xb4   : > { %v646_v40 = vsel %vm4715_vm0, %v638_v51, %v645_v30  ;;  %v949_v41 = vsel %vm4620_vm4, %v647_v31, %v948_v24  ;;  %v3312_v42 = vpack.c.b16 %v3281_v32, %v3280_v17  ;;  %1009 = vst [vmem:[#allocation2 + $0x84] sm:$0xf] %v1008_v37  ;;  %v1721_v47 = vshll.u32 %v4740_v62, 16  ;;  %3440 = vrot.lane.b32.xlu1 %v4494_v45, %s4544_s7  ;;  %v4783_v13 = vld [vmem:[#allocation2 + $0x80] sm:$0x1]  ;;  %v4479_v20 = vld [vmem:[#allocation2 + $0x78] sm:$0xff] }
  0xb5   : > { %947 = vst.msk [vmem:[#allocation2 + $0x1c] sm:$0xf] %vm226_vm5, %v646_v40  ;;  %v1564_v27 = vsel %vm4660_vm10, %v1562_v36, %v1563_v29  ;;  %v1725_v48 = vshrl.u32 %v4740_v62, 16  ;;  %v1731_v49 = vshll.u32 %v1695_v0, 16  ;;  %v1132_v52 = vrot.slane %v1131_v15, 4 }
  0xb6   : > { %950 = vst [vmem:[#allocation2 + $0x20] sm:$0x1] %v949_v41  ;;  %3328 = vrot.lane.b32.xlu0 %v3312_v42, %s4543_s6  ;;  %v3027_v51 = vunpack.c.l.b16 %v1564_v27  ;;  %v1134_v53 = vshll.u32 %v1052_v12, 16  ;;  %v1140_v54 = vrot.slane %v1138_v18, 4  ;;  %v1723_v56 = vrot.slane %v1721_v47, 5 }
  0xb7   : > { %v1727_v57 = vrot.slane %v1725_v48, 4  ;;  %v1733_v58 = vrot.slane %v1731_v49, 5  ;;  %v1146_v59 = vrot.slane %v1144_v19, 5  ;;  %v328_v62 = vsel %vm4643_vm7, 0, %v327_v39  ;;  %v2712_v0 = vld [vmem:[#allocation2 + $0x78] sm:$0xe] }
  0xb8   : > { %v3057_v60 = vpack.c.b16 %v3027_v51, %v3026_v43  ;;  %v1136_v61 = vrot.slane %v1134_v53, 5  ;;  %v1724_v1 = vsel %vm4671_vm13, %v1719_v38, %v1723_v56  ;;  %329 = vst [vmem:[#allocation2 + $0x8c] sm:$0x1] %v328_v62  ;;  %v4194_v4 = vrot.slane %v1494_v46, 9  ;;  %v2289_v12 = vld [vmem:[#allocation2 + $0x7c] sm:$0xf] }
  0xb9   : > { %v1728_v2 = vor.u32 %v1727_v57, %v1723_v56  ;;  %v1623_v5 = vrot.slane %v4763_v22, 5  ;;  %v3200_v7 = vunpack.c.l.b16 %v1724_v1  ;;  %v569_v10 = vmax.f32 %v521_v63, 0.0  ;;  %v371_v38 = vld [vmem:[%s4598_s25 + $0x80] sm:$0xff]  ;;  %v372_v39 = vld [vmem:[%s4598_s25 + $0x88] sm:$0xff]  ;;  %v2288_v40 = vld [vmem:[#allocation2 + $0x78] sm:$0xf] }
  0xba   : > { %3074 = vrot.lane.b32.xlu2 %v3057_v60, %s4540_s26  ;;  %v1137_v8 = vsel %vm4671_vm13, %v1132_v52, %v1136_v61  ;;  %v1141_v9 = vor.u32 %v1140_v54, %v1136_v61  ;;  %v1626_v25 = vrot.slane %v4777_v3, 5  ;;  %v4224_v26 = vrot.slane %v2712_v0, 9  ;;  %v2104_v54 = vld [vmem:[#allocation2 + $0x78] sm:$0xe]  ;;  %v4803_v60 = vld [vmem:[#allocation2 + $0x7c] sm:$0xf] }
  0xbb   : > { %v1729_v15 = vrot.slane %v1728_v2, 4  ;;  %v2946_v16 = vunpack.c.l.b16 %v1137_v8  ;;  %v1624_v17 = vsel %vm4660_vm10, %v4194_v4, %v1623_v5  ;;  %v1625_v18 = vrot.slane %v1623_v5, 4  ;;  %v4805_v61 = vld [vmem:[#allocation2 + $0x80] sm:$0x1]  ;;  %v247_v2 = vld [vmem:[#allocation2 + $0x24] sm:$0x1] }
  0xbc   : > { %v1142_v19 = vrot.slane %v1141_v9, 4  ;;  %v601_v24 = vpack.c.bf16 %v569_v10, %v569_v10  ;;  %v3044_v28 = vunpack.c.l.b16 %v1624_v17  ;;  %v2826_v30 = vrot.slane %v2289_v12, 5  ;;  %3186 = vrot.lane.b32.xlu1 %v4479_v20, %s4542_s30  ;;  %v4486_v8 = vld [vmem:[#allocation2 + $0x18] sm:$0xff]  ;;  %v478_v20 = vpop.f32.mrf.mxu0 }
  0xbd   : > { %v1734_v29 = vsel %vm4671_vm13, %v1729_v15, %v1733_v58  ;;  %v2829_v31 = vrot.slane %v4783_v13, 5  ;;  %v1627_v42 = vsel %vm4660_vm10, %v1625_v18, %v1626_v25  ;;  %v395_v52 = vpack.c.bf16 %v372_v39, %v371_v38  ;;  %v1681_v10 = vld [vmem:[#allocation2 + $0x78] sm:$0xf] }
  0xbe   : > { %v3201_v32 = vunpack.c.l.b16 %v1734_v29  ;;  %v1147_v35 = vsel %vm4671_vm13, %v1142_v19, %v1146_v59  ;;  %v793_v36 = vshrl.u32 %v601_v24, 16  ;;  %v796_v37 = vshll.u32 %v601_v24, 16 }
  0xbf   : > { %v2947_v41 = vunpack.c.l.b16 %v1147_v35  ;;  %v2827_v43 = vsel %vm4660_vm10, %v4224_v26, %v2826_v30  ;;  %v2828_v45 = vrot.slane %v2826_v30, 4  ;;  %v3045_v47 = vunpack.c.l.b16 %v1627_v42  ;;  %v1011_v50 = vld [vmem:[#allocation2 + $0x8c] sm:$0x1]  ;;  %4176 = vmatmul.msk.bf16.gmra.mxu0 %vm406_vm1, %v395_v52  ;;  %v4835_v52 = vld [vmem:[#allocation2 + $0x20] sm:$0x1] }
  0xc0   : > { %v3232_v46 = vpack.c.b16 %v3201_v32, %v3200_v7  ;;  %v795_v27 = vrot.slane %v793_v36, 7  ;;  %v3552_v48 = vunpack.c.l.b16 %v2827_v43  ;;  %v2513_v53 = vshrl.u32 %v2288_v40, 16 }
  0xc1   : > { %v2977_v49 = vpack.c.b16 %v2947_v41, %v2946_v16  ;;  %v2830_v51 = vsel %vm4660_vm10, %v2828_v45, %v2829_v31  ;;  %v3066_v58 = vpack.c.b16 %v3045_v47, %v3044_v28  ;;  %v2516_v63 = vshll.u32 %v2288_v40, 16 }
  0xc2   : > { %3248 = vrot.lane.b32.xlu2 %v3232_v46, %s4545_s8  ;;  %v798_v56 = vor.u32 %v796_v37, %v795_v27  ;;  %v800_v57 = vrot.slane %v795_v27, 4  ;;  %v3553_v59 = vunpack.c.l.b16 %v2830_v51  ;;  %v2515_v62 = vrot.slane %v2513_v53, 4  ;;  %v1486_v27 = vld [vmem:[#allocation2 + $0x18] sm:$0xe] }
  0xc3   : > { %2994 = vrot.lane.b32.xlu0 %v2977_v49, %s4541_s29  ;;  %v2522_v0 = vshll.u32 %v2289_v12, 16  ;;  %v2526_v1 = vshrl.u32 %v2289_v12, 16  ;;  %v2532_v9 = vshll.u32 %v4783_v13, 16  ;;  %v2518_v15 = vrot.slane %v2516_v63, 5  ;;  %v4471_v49 = vld [vmem:[#allocation2 + $0x18] sm:$0xff] }
  0xc4   : > { %v799_v4 = vsel %vm4715_vm0, %v791_v34, %v798_v56  ;;  %v1012_v5 = vsel %vm4620_vm4, %v800_v57, %v1011_v50  ;;  %v3576_v7 = vpack.c.b16 %v3553_v59, %v3552_v48  ;;  %v4209_v12 = vrot.slane %v2104_v54, 9  ;;  %3424 = vrot.lane.b32.xlu1 %v4486_v8, %s4544_s7 }
  0xc5   : > { %1010 = vst.msk [vmem:[#allocation2 + $0x88] sm:$0xf] %vm226_vm5, %v799_v4  ;;  %v2524_v16 = vrot.slane %v2522_v0, 5  ;;  %v2528_v17 = vrot.slane %v2526_v1, 4  ;;  %v2534_v14 = vrot.slane %v2532_v9, 5  ;;  %v2224_v34 = vrot.slane %v4803_v60, 5 }
  0xc6   : > { %1013 = vst [vmem:[#allocation2 + $0x8c] sm:$0x1] %v1012_v5  ;;  %v2227_v18 = vrot.slane %v4805_v61, 5  ;;  %v248_v19 = vsel %vm4620_vm4, 0, %v247_v2  ;;  %v2519_v13 = vor.u32 %v2518_v15, %v2515_v62  ;;  %v479_v25 = vadd.f32 %v4685_v23, %v478_v20  ;;  %v4839_v0 = vld [vmem:[#allocation2 + $0x1c] sm:$0xf] }
  0xc7   : > { %v2529_v24 = vor.u32 %v2528_v17, %v2524_v16  ;;  %249 = vst [vmem:[#allocation2 + $0x24] sm:$0x1] %v248_v19  ;;  %v1928_v28 = vshrl.u32 %v1681_v10, 16  ;;  %v2225_v29 = vsel %vm4660_vm10, %v4209_v12, %v2224_v34  ;;  %v2226_v26 = vrot.slane %v2224_v34, 4 }
  0xc8   : > { %v1931_v30 = vshll.u32 %v1681_v10, 16  ;;  %v1937_v31 = vshll.u32 %v4803_v60, 16  ;;  %v2520_v32 = vrot.slane %v2519_v13, 4  ;;  %v3298_v36 = vunpack.c.l.b16 %v2225_v29  ;;  %v480_v29 = vpop.f32.mrf.mxu0 }
  0xc9   : > { %v2530_v35 = vrot.slane %v2529_v24, 4  ;;  %v552_v37 = vmax.f32 %v479_v25, 0.0  ;;  %v2228_v38 = vsel %vm4660_vm10, %v2226_v26, %v2227_v18  ;;  %v1930_v39 = vrot.slane %v1928_v28, 4  ;;  %v2272_v26 = vld [vmem:[#allocation2 + $0x18] sm:$0xf] }
  0xca   : > { %3092 = vrot.lane.b32.xlu2 %v3066_v58, %s4540_s26  ;;  %v1933_v40 = vrot.slane %v1931_v30, 5  ;;  %v1939_v41 = vrot.slane %v1937_v31, 5  ;;  %v2525_v42 = vsel %vm4671_vm13, %v2520_v32, %v2524_v16  ;;  %v3299_v45 = vunpack.c.l.b16 %v2228_v38  ;;  %v1069_v58 = vld [vmem:[#allocation2 + $0x78] sm:$0xf] }
  0xcb   : > { %3600 = vrot.lane.b32.xlu0 %v3576_v7, %s4546_s9  ;;  %v2535_v43 = vsel %vm4671_vm13, %v2530_v35, %v2534_v14  ;;  %v584_v46 = vpack.c.bf16 %v552_v37, %v552_v37  ;;  %v3472_v47 = vunpack.c.l.b16 %v2525_v42  ;;  %v1941_v51 = vshrl.u32 %v4803_v60, 16  ;;  %v303_v14 = vld [vmem:[#allocation2 + $0x2c] sm:$0x1] }
  0xcc   : > { %v3473_v48 = vunpack.c.l.b16 %v2535_v43  ;;  %v1934_v50 = vor.u32 %v1933_v40, %v1930_v39  ;;  %v3321_v53 = vpack.c.b16 %v3299_v45, %v3298_v36  ;;  %v1947_v57 = vshll.u32 %v4805_v61, 16  ;;  %3170 = vrot.lane.b32.xlu1 %v4471_v49, %s4542_s30  ;;  %v2304_v43 = vld [vmem:[#allocation2 + $0x20] sm:$0x1] }
  0xcd   : > { %v649_v54 = vshrl.u32 %v584_v46, 16  ;;  %v652_v56 = vshll.u32 %v584_v46, 16  ;;  %v1943_v63 = vrot.slane %v1941_v51, 4  ;;  %v4186_v1 = vrot.slane %v1486_v27, 9 }
  0xce   : > { %v3496_v59 = vpack.c.b16 %v3473_v48, %v3472_v47  ;;  %v1935_v62 = vrot.slane %v1934_v50, 4  ;;  %v1949_v4 = vrot.slane %v1947_v57, 5  ;;  %v1567_v60 = vrot.slane %v4839_v0, 5  ;;  %v951_v7 = vld [vmem:[#allocation2 + $0x24] sm:$0xf] }
  0xcf   : > { %v4841_v2 = vrot.slane %v649_v54, 7  ;;  %v1570_v5 = vrot.slane %v4835_v52, 5  ;;  %v1944_v8 = vor.u32 %v1943_v63, %v1939_v41  ;;  %v1341_v9 = vshrl.u32 %v1069_v58, 16 }
  0xd0   : > { %v1940_v61 = vsel %vm4671_vm13, %v1935_v62, %v1939_v41  ;;  %v1344_v10 = vshll.u32 %v1069_v58, 16  ;;  %v1568_v12 = vsel %vm4660_vm10, %v4186_v1, %v1567_v60  ;;  %v1569_v18 = vrot.slane %v1567_v60, 4 }
  0xd1   : > { %v654_v15 = vor.u32 %v652_v56, %v4841_v2  ;;  %v655_v16 = vrot.slane %v4841_v2, 4  ;;  %v3218_v17 = vunpack.c.l.b16 %v1940_v61  ;;  %v1945_v34 = vrot.slane %v1944_v8, 4  ;;  %v274_v61 = vld [vmem:[#allocation2 + $0x90] sm:$0x1] }
  0xd2   : > { %3520 = vrot.lane.b32.xlu2 %v3496_v59, %s4547_s10  ;;  %v3028_v19 = vunpack.c.l.b16 %v1568_v12  ;;  %v1343_v20 = vrot.slane %v1341_v9, 4  ;;  %v1346_v24 = vrot.slane %v1344_v10, 5  ;;  %v1350_v25 = vshll.u32 %v4763_v22, 16 }
  0xd3   : > { %3346 = vrot.lane.b32.xlu0 %v3321_v53, %s4543_s6  ;;  %v952_v13 = vsel %vm4701_vm14, %v654_v15, %v951_v7  ;;  %v1354_v28 = vshrl.u32 %v4763_v22, 16  ;;  %v1950_v30 = vsel %vm4671_vm13, %v1945_v34, %v1949_v4  ;;  %v1571_v31 = vsel %vm4660_vm10, %v1569_v18, %v1570_v5  ;;  %v2273_v22 = vld [vmem:[#allocation2 + $0x1c] sm:$0xf]  ;;  %v2704_v53 = vld [vmem:[#allocation2 + $0x18] sm:$0xe] }
  0xd4   : > { %953 = vst [vmem:[#allocation2 + $0x24] sm:$0xf] %v952_v13  ;;  %v1360_v32 = vshll.u32 %v4777_v3, 16  ;;  %v304_v35 = vsel %vm4643_vm7, 0, %v303_v14  ;;  %v3219_v36 = vunpack.c.l.b16 %v1950_v30  ;;  %v3029_v37 = vunpack.c.l.b16 %v1571_v31 }
  0xd5   : > { %v1347_v38 = vor.u32 %v1346_v24, %v1343_v20  ;;  %v1352_v39 = vrot.slane %v1350_v25, 5  ;;  %305 = vst [vmem:[#allocation2 + $0x2c] sm:$0x1] %v304_v35  ;;  %v1356_v40 = vrot.slane %v1354_v28, 4  ;;  %v481_v42 = vadd.f32 %v4685_v23, %v480_v29  ;;  %v1665_v25 = vld [vmem:[#allocation2 + $0x18] sm:$0xf] }
  0xd6   : > { %v1362_v41 = vrot.slane %v1360_v32, 5  ;;  %v2321_v45 = vshrl.u32 %v2272_v26, 16  ;;  %v3241_v46 = vpack.c.b16 %v3219_v36, %v3218_v17  ;;  %v3058_v27 = vpack.c.b16 %v3029_v37, %v3028_v19  ;;  %v523_v17 = vpop.f32.mrf.mxu3 }
  0xd7   : > { %v1348_v47 = vrot.slane %v1347_v38, 4  ;;  %v2324_v48 = vshll.u32 %v2272_v26, 16  ;;  %v1357_v3 = vor.u32 %v1356_v40, %v1352_v39  ;;  %v553_v49 = vmax.f32 %v481_v42, 0.0  ;;  %v1666_v38 = vld [vmem:[#allocation2 + $0x1c] sm:$0xf] }
  0xd8   : > { %v2323_v50 = vrot.slane %v2321_v45, 4  ;;  %v2330_v51 = vshll.u32 %v2273_v22, 16  ;;  %v2334_v57 = vshrl.u32 %v2273_v22, 16  ;;  %v2340_v58 = vshll.u32 %v2304_v43, 16 }
  0xd9   : > { %v1353_v54 = vsel %vm4671_vm13, %v1348_v47, %v1352_v39  ;;  %v2326_v56 = vrot.slane %v2324_v48, 5  ;;  %v1358_v59 = vrot.slane %v1357_v3, 4  ;;  %v585_v63 = vpack.c.bf16 %v553_v49, %v553_v49  ;;  %v2096_v47 = vld [vmem:[#allocation2 + $0x18] sm:$0xe] }
  0xda   : > { %3266 = vrot.lane.b32.xlu2 %v3241_v46, %s4545_s8  ;;  %v2964_v62 = vunpack.c.l.b16 %v1353_v54  ;;  %v2332_v1 = vrot.slane %v2330_v51, 5  ;;  %v2336_v60 = vrot.slane %v2334_v57, 4  ;;  %v2342_v5 = vrot.slane %v2340_v58, 5 }
  0xdb   : > { %3076 = vrot.lane.b32.xlu0 %v3058_v27, %s4540_s26  ;;  %v2327_v4 = vor.u32 %v2326_v56, %v2323_v50  ;;  %v4216_v7 = vrot.slane %v2704_v53, 9  ;;  %v1363_v8 = vsel %vm4671_vm13, %v1358_v59, %v1362_v41  ;;  %v657_v9 = vshrl.u32 %v585_v63, 16  ;;  %v1696_v41 = vld [vmem:[#allocation2 + $0x20] sm:$0x1]  ;;  %v330_v59 = vld [vmem:[#allocation2 + $0x98] sm:$0x1] }
  0xdc   : > { %v660_v10 = vshll.u32 %v585_v63, 16  ;;  %v2770_v15 = vrot.slane %v2273_v22, 5  ;;  %v2965_v12 = vunpack.c.l.b16 %v1363_v8  ;;  %v2337_v34 = vor.u32 %v2336_v60, %v2332_v1  ;;  %v955_v29 = vld [vmem:[#allocation2 + $0x2c] sm:$0x1] }
  0xdd   : > { %v2328_v14 = vrot.slane %v2327_v4, 4  ;;  %v2773_v18 = vrot.slane %v2304_v43, 5  ;;  %v659_v19 = vrot.slane %v657_v9, 7  ;;  %v275_v24 = vsel %vm4620_vm4, 0, %v274_v61 }
  0xde   : > { %v2771_v20 = vsel %vm4660_vm10, %v4216_v7, %v2770_v15  ;;  %v2772_v13 = vrot.slane %v2770_v15, 4  ;;  %v2986_v28 = vpack.c.b16 %v2965_v12, %v2964_v62  ;;  %v2338_v30 = vrot.slane %v2337_v34, 4  ;;  %276 = vst [vmem:[#allocation2 + $0x90] sm:$0x1] %v275_v24  ;;  %v525_v60 = vpop.f32.mrf.mxu3  ;;  %v4495_v7 = vld [vmem:[#allocation2 + $0x84] sm:$0xff] }
  0xdf   : > { %v2333_v26 = vsel %vm4671_vm13, %v2328_v14, %v2332_v1  ;;  %v3536_v31 = vunpack.c.l.b16 %v2771_v20  ;;  %v662_v32 = vor.u32 %v660_v10, %v659_v19  ;;  %v664_v35 = vrot.slane %v659_v19, 4 }
  0xe0   : > { %v3456_v36 = vunpack.c.l.b16 %v2333_v26  ;;  %v2774_v37 = vsel %vm4660_vm10, %v2772_v13, %v2773_v18  ;;  %3012 = vrot.lane.b32.xlu1 %v2986_v28, %s4541_s29  ;;  %v2343_v39 = vsel %vm4671_vm13, %v2338_v30, %v2342_v5  ;;  %v524_v40 = vadd.f32 %v4685_v23, %v523_v17  ;;  %v1071_v5 = vld [vmem:[#allocation2 + $0x84] sm:$0xf] }
  0xe1   : > { %v3537_v22 = vunpack.c.l.b16 %v2774_v37  ;;  %v1736_v42 = vshrl.u32 %v1665_v25, 16  ;;  %v663_v43 = vsel %vm4715_vm0, %v655_v16, %v662_v32  ;;  %v956_v45 = vsel %vm4620_vm4, %v664_v35, %v955_v29  ;;  %v1072_v29 = vld [vmem:[#allocation2 + $0x88] sm:$0xf]  ;;  %v1495_v37 = vld [vmem:[#allocation2 + $0x84] sm:$0xe] }
  0xe2   : > { %v3457_v46 = vunpack.c.l.b16 %v2343_v39  ;;  %v1739_v27 = vshll.u32 %v1665_v25, 16  ;;  %954 = vst.msk [vmem:[#allocation2 + $0x28] sm:$0xf] %vm226_vm5, %v663_v43  ;;  %v570_v3 = vmax.f32 %v524_v40, 0.0  ;;  %v1745_v50 = vshll.u32 %v1666_v38, 16 }
  0xe3   : > { %v3568_v48 = vpack.c.b16 %v3537_v22, %v3536_v31  ;;  %v1738_v49 = vrot.slane %v1736_v42, 4  ;;  %957 = vst [vmem:[#allocation2 + $0x2c] sm:$0x1] %v956_v45  ;;  %v1749_v54 = vshrl.u32 %v1666_v38, 16  ;;  %v1755_v2 = vshll.u32 %v1696_v41, 16 }
  0xe4   : > { %v3488_v51 = vpack.c.b16 %v3457_v46, %v3456_v36  ;;  %v1741_v53 = vrot.slane %v1739_v27, 5  ;;  %v602_v16 = vpack.c.bf16 %v570_v3, %v570_v3  ;;  %v1747_v56 = vrot.slane %v1745_v50, 5  ;;  %v1092_v36 = vld [vmem:[#allocation2 + $0x8c] sm:$0x1]  ;;  %v1053_v45 = vld [vmem:[#allocation2 + $0x18] sm:$0xf] }
  0xe5   : > { %3584 = vrot.lane.b32.xlu0 %v3568_v48, %s4546_s9  ;;  %v4201_v57 = vrot.slane %v2096_v47, 9  ;;  %v2168_v58 = vrot.slane %v1666_v38, 5  ;;  %v1751_v63 = vrot.slane %v1749_v54, 4  ;;  %v1757_v1 = vrot.slane %v1755_v2, 5  ;;  %v1014_v13 = vld [vmem:[#allocation2 + $0x90] sm:$0xf] }
  0xe6   : > { %3504 = vrot.lane.b32.xlu2 %v3488_v51, %s4547_s10  ;;  %v1742_v62 = vor.u32 %v1741_v53, %v1738_v49  ;;  %v2171_v4 = vrot.slane %v1696_v41, 5  ;;  %v802_v61 = vshrl.u32 %v602_v16, 16  ;;  %v805_v8 = vshll.u32 %v602_v16, 16  ;;  %v4480_v49 = vld [vmem:[#allocation2 + $0x84] sm:$0xff] }
  0xe7   : > { %v2169_v9 = vsel %vm4660_vm10, %v4201_v57, %v2168_v58  ;;  %v2170_v10 = vrot.slane %v2168_v58, 4  ;;  %v1752_v17 = vor.u32 %v1751_v63, %v1747_v56  ;;  %v331_v14 = vsel %vm4643_vm7, 0, %v330_v59 }
  0xe8   : > { %v1743_v15 = vrot.slane %v1742_v62, 4  ;;  %v3282_v12 = vunpack.c.l.b16 %v2169_v9  ;;  %3442 = vrot.lane.b32.xlu1 %v4495_v7, %s4544_s7  ;;  %v4897_v34 = vrot.slane %v802_v61, 7  ;;  %332 = vst [vmem:[#allocation2 + $0x98] sm:$0x1] %v331_v14  ;;  %v526_v19 = vadd.f32 %v4685_v23, %v525_v60  ;;  %v2290_v14 = vld [vmem:[#allocation2 + $0x84] sm:$0xf] }
  0xe9   : > { %v2172_v18 = vsel %vm4660_vm10, %v2170_v10, %v2171_v4  ;;  %v1365_v20 = vshrl.u32 %v1071_v5, 16  ;;  %v1753_v25 = vrot.slane %v1752_v17, 4  ;;  %v1368_v26 = vshll.u32 %v1071_v5, 16 }
  0xea   : > { %v1748_v24 = vsel %vm4671_vm13, %v1743_v15, %v1747_v56  ;;  %v3283_v28 = vunpack.c.l.b16 %v2172_v18  ;;  %v807_v30 = vor.u32 %v805_v8, %v4897_v34  ;;  %v808_v31 = vrot.slane %v4897_v34, 4 }
  0xeb   : > { %v3202_v32 = vunpack.c.l.b16 %v1748_v24  ;;  %v571_v35 = vmax.f32 %v526_v19, 0.0  ;;  %v1758_v23 = vsel %vm4671_vm13, %v1753_v25, %v1757_v1  ;;  %v1367_v39 = vrot.slane %v1365_v20, 4 }
  0xec   : > { %v3313_v38 = vpack.c.b16 %v3283_v28, %v3282_v12  ;;  %v1370_v22 = vrot.slane %v1368_v26, 5  ;;  %v1015_v40 = vsel %vm4701_vm14, %v807_v30, %v1014_v13  ;;  %v3203_v41 = vunpack.c.l.b16 %v1758_v23 }
  0xed   : > { %v603_v42 = vpack.c.bf16 %v571_v35, %v571_v35  ;;  %v1374_v43 = vshll.u32 %v1072_v29, 16  ;;  %1016 = vst [vmem:[#allocation2 + $0x90] sm:$0xf] %v1015_v40  ;;  %v1378_v27 = vshrl.u32 %v1072_v29, 16  ;;  %v1384_v47 = vshll.u32 %v1092_v36, 16 }
  0xee   : > { %3330 = vrot.lane.b32.xlu0 %v3313_v38, %s4543_s6  ;;  %v1371_v46 = vor.u32 %v1370_v22, %v1367_v39  ;;  %v4195_v48 = vrot.slane %v1495_v37, 9  ;;  %v3233_v3 = vpack.c.b16 %v3203_v41, %v3202_v32  ;;  %v1630_v56 = vrot.slane %v1072_v29, 5  ;;  %v2291_v29 = vld [vmem:[#allocation2 + $0x88] sm:$0xf]  ;;  %v2313_v32 = vld [vmem:[#allocation2 + $0x8c] sm:$0x1] }
  0xef   : > { %v810_v50 = vshrl.u32 %v603_v42, 16  ;;  %v813_v51 = vshll.u32 %v603_v42, 16  ;;  %v1376_v53 = vrot.slane %v1374_v43, 5  ;;  %v1380_v2 = vrot.slane %v1378_v27, 4  ;;  %v1018_v63 = vld [vmem:[#allocation2 + $0x98] sm:$0x1]  ;;  %v483_v27 = vpop.f32.mrf.mxu0 }
  0xf0   : > { %v1372_v54 = vrot.slane %v1371_v46, 4  ;;  %v1386_v16 = vrot.slane %v1384_v47, 5  ;;  %3250 = vrot.lane.b32.xlu2 %v3233_v3, %s4545_s8  ;;  %3188 = vrot.lane.b32.xlu1 %v4480_v49, %s4542_s30  ;;  %v1633_v58 = vrot.slane %v1092_v36, 5  ;;  %v1149_v59 = vshrl.u32 %v1053_v45, 16  ;;  %v2713_v39 = vld [vmem:[#allocation2 + $0x84] sm:$0xe] }
  0xf1   : > { %v812_v57 = vrot.slane %v810_v50, 7  ;;  %v1152_v62 = vshll.u32 %v1053_v45, 16  ;;  %v1381_v4 = vor.u32 %v1380_v2, %v1376_v53  ;;  %v1631_v60 = vsel %vm4660_vm10, %v4195_v48, %v1630_v56  ;;  %v250_v46 = vld [vmem:[#allocation2 + $0x30] sm:$0x1] }
  0xf2   : > { %v1377_v1 = vsel %vm4671_vm13, %v1372_v54, %v1376_v53  ;;  %v1632_v5 = vrot.slane %v1630_v56, 4  ;;  %v3046_v9 = vunpack.c.l.b16 %v1631_v60  ;;  %v1151_v17 = vrot.slane %v1149_v59, 4  ;;  %v1683_v59 = vld [vmem:[#allocation2 + $0x84] sm:$0xf] }
  0xf3   : > { %v815_v7 = vor.u32 %v813_v51, %v812_v57  ;;  %v817_v61 = vrot.slane %v812_v57, 4  ;;  %v2966_v8 = vunpack.c.l.b16 %v1377_v1  ;;  %v1382_v10 = vrot.slane %v1381_v4, 4  ;;  %v4938_v57 = vld [vmem:[%s6216_s2] ss:$0 sm:$0xff] }
  0xf4   : > { %v1634_v15 = vsel %vm4660_vm10, %v1632_v5, %v1633_v58  ;;  %v1154_v12 = vrot.slane %v1152_v62, 5  ;;  %v1158_v20 = vshll.u32 %v4839_v0, 16  ;;  %v1162_v25 = vshrl.u32 %v4839_v0, 16 }
  0xf5   : > { %v816_v34 = vsel %vm4715_vm0, %v808_v31, %v815_v7  ;;  %v1019_v18 = vsel %vm4620_vm4, %v817_v61, %v1018_v63  ;;  %v3047_v19 = vunpack.c.l.b16 %v1634_v15  ;;  %v1387_v13 = vsel %vm4671_vm13, %v1382_v10, %v1386_v16  ;;  %v1684_v10 = vld [vmem:[#allocation2 + $0x88] sm:$0xf]  ;;  %v1705_v15 = vld [vmem:[#allocation2 + $0x8c] sm:$0x1] }
  0xf6   : > { %1017 = vst.msk [vmem:[#allocation2 + $0x94] sm:$0xf] %vm226_vm5, %v816_v34  ;;  %v1155_v24 = vor.u32 %v1154_v12, %v1151_v17  ;;  %v1168_v28 = vshll.u32 %v4835_v52, 16  ;;  %v2967_v26 = vunpack.c.l.b16 %v1387_v13  ;;  %v1160_v31 = vrot.slane %v1158_v20, 5 }
  0xf7   : > { %1020 = vst [vmem:[#allocation2 + $0x98] sm:$0x1] %v1019_v18  ;;  %v3067_v30 = vpack.c.b16 %v3047_v19, %v3046_v9  ;;  %v2537_v35 = vshrl.u32 %v2290_v14, 16  ;;  %v1164_v37 = vrot.slane %v1162_v25, 4  ;;  %v2540_v38 = vshll.u32 %v2290_v14, 16 }
  0xf8   : > { %v1156_v36 = vrot.slane %v1155_v24, 4  ;;  %v1170_v23 = vrot.slane %v1168_v28, 5  ;;  %v2987_v22 = vpack.c.b16 %v2967_v26, %v2966_v8  ;;  %v2546_v41 = vshll.u32 %v2291_v29, 16  ;;  %v2105_v28 = vld [vmem:[#allocation2 + $0x84] sm:$0xe] }
  0xf9   : > { %3094 = vrot.lane.b32.xlu0 %v3067_v30, %s4540_s26  ;;  %v2539_v40 = vrot.slane %v2537_v35, 4  ;;  %v2550_v0 = vshrl.u32 %v2291_v29, 16  ;;  %v1165_v42 = vor.u32 %v1164_v37, %v1160_v31  ;;  %v2542_v43 = vrot.slane %v2540_v38, 5  ;;  %v485_v38 = vpop.f32.mrf.mxu0 }
  0xfa   : > { %v1161_v52 = vsel %vm4671_vm13, %v1156_v36, %v1160_v31  ;;  %v2556_v45 = vshll.u32 %v2313_v32, 16  ;;  %3014 = vrot.lane.b32.xlu2 %v2987_v22, %s4541_s29  ;;  %v2548_v48 = vrot.slane %v2546_v41, 5  ;;  %v4225_v49 = vrot.slane %v2713_v39, 9  ;;  %v277_v39 = vld [vmem:[#allocation2 + $0x9c] sm:$0x1] }
  0xfb   : > { %v2948_v47 = vunpack.c.l.b16 %v1161_v52  ;;  %v2552_v3 = vrot.slane %v2550_v0, 4  ;;  %v1166_v50 = vrot.slane %v1165_v42, 4  ;;  %v2543_v51 = vor.u32 %v2542_v43, %v2539_v40 }
  0xfc   : > { %v2558_v53 = vrot.slane %v2556_v45, 5  ;;  %v2833_v54 = vrot.slane %v2291_v29, 5  ;;  %v2836_v16 = vrot.slane %v2313_v32, 5  ;;  %v251_v56 = vsel %vm4620_vm4, 0, %v250_v46 }
  0xfd   : > { %v2553_v2 = vor.u32 %v2552_v3, %v2548_v48  ;;  %v484_v58 = vadd.f32 %v4938_v57, %v483_v27  ;;  %v1171_v62 = vsel %vm4671_vm13, %v1166_v50, %v1170_v23  ;;  %v2544_v63 = vrot.slane %v2543_v51, 4  ;;  %252 = vst [vmem:[#allocation2 + $0x30] sm:$0x1] %v251_v56  ;;  %v306_v23 = vld [vmem:[#allocation2 + $0x38] sm:$0x1] }
  0xfe   : > { %v2834_v1 = vsel %vm4660_vm10, %v4225_v49, %v2833_v54  ;;  %v2835_v4 = vrot.slane %v2833_v54, 4  ;;  %v2949_v60 = vunpack.c.l.b16 %v1171_v62  ;;  %v1952_v17 = vshrl.u32 %v1683_v59, 16  ;;  %v2274_v49 = vld [vmem:[#allocation2 + $0x24] sm:$0xf] }
  0xff   : > { %v2554_v5 = vrot.slane %v2553_v2, 4  ;;  %v3554_v7 = vunpack.c.l.b16 %v2834_v1  ;;  %v554_v61 = vmax.f32 %v484_v58, 0.0  ;;  %v2549_v8 = vsel %vm4671_vm13, %v2544_v63, %v2548_v48  ;;  %v2275_v2 = vld [vmem:[#allocation2 + $0x28] sm:$0xf]  ;;  %v528_v63 = vpop.f32.mrf.mxu3 }
 0x100   : > { %v2837_v9 = vsel %vm4660_vm10, %v2835_v4, %v2836_v16  ;;  %v1955_v12 = vshll.u32 %v1683_v59, 16  ;;  %v2978_v14 = vpack.c.b16 %v2949_v60, %v2948_v47  ;;  %v3474_v18 = vunpack.c.l.b16 %v2549_v8  ;;  %v4487_v16 = vld [vmem:[#allocation2 + $0x24] sm:$0xff] }
 0x101   : > { %v2559_v34 = vsel %vm4671_vm13, %v2554_v5, %v2558_v53  ;;  %v3555_v19 = vunpack.c.l.b16 %v2837_v9  ;;  %v586_v13 = vpack.c.bf16 %v554_v61, %v554_v61  ;;  %v1954_v24 = vrot.slane %v1952_v17, 4 }
 0x102   : > { %v3475_v20 = vunpack.c.l.b16 %v2559_v34  ;;  %v1957_v25 = vrot.slane %v1955_v12, 5  ;;  %2996 = vrot.lane.b32.xlu1 %v2978_v14, %s4541_s29  ;;  %v1961_v26 = vshll.u32 %v1684_v10, 16  ;;  %v1965_v30 = vshrl.u32 %v1684_v10, 16  ;;  %v2305_v14 = vld [vmem:[#allocation2 + $0x2c] sm:$0x1] }
 0x103   : > { %v3577_v29 = vpack.c.b16 %v3555_v19, %v3554_v7  ;;  %v1971_v31 = vshll.u32 %v1705_v15, 16  ;;  %v666_v35 = vshrl.u32 %v586_v13, 16  ;;  %v669_v36 = vshll.u32 %v586_v13, 16  ;;  %v2705_v13 = vld [vmem:[#allocation2 + $0x24] sm:$0xe] }
 0x104   : > { %v3497_v32 = vpack.c.b16 %v3475_v20, %v3474_v18  ;;  %v1958_v37 = vor.u32 %v1957_v25, %v1954_v24  ;;  %v1963_v22 = vrot.slane %v1961_v26, 5  ;;  %v1967_v40 = vrot.slane %v1965_v30, 4  ;;  %v958_v46 = vld [vmem:[#allocation2 + $0x30] sm:$0xf] }
 0x105   : > { %3602 = vrot.lane.b32.xlu0 %v3577_v29, %s4546_s9  ;;  %v1973_v41 = vrot.slane %v1971_v31, 5  ;;  %v4210_v0 = vrot.slane %v2105_v28, 9  ;;  %v4954_v52 = vrot.slane %v666_v35, 7  ;;  %v2231_v43 = vrot.slane %v1684_v10, 5 }
 0x106   : > { %3522 = vrot.lane.b32.xlu2 %v3497_v32, %s4547_s10  ;;  %v1959_v42 = vrot.slane %v1958_v37, 4  ;;  %v2234_v45 = vrot.slane %v1705_v15, 5  ;;  %v1968_v27 = vor.u32 %v1967_v40, %v1963_v22  ;;  %v307_v47 = vsel %vm4643_vm7, 0, %v306_v23 }
 0x107   : > { %v486_v48 = vadd.f32 %v4938_v57, %v485_v38  ;;  %v278_v3 = vsel %vm4620_vm4, 0, %v277_v39  ;;  %v671_v50 = vor.u32 %v669_v36, %v4954_v52  ;;  %v672_v51 = vrot.slane %v4954_v52, 4  ;;  %308 = vst [vmem:[#allocation2 + $0x38] sm:$0x1] %v307_v47  ;;  %v4472_v38 = vld [vmem:[#allocation2 + $0x24] sm:$0xff] }
 0x108   : > { %v1964_v53 = vsel %vm4671_vm13, %v1959_v42, %v1963_v22  ;;  %v2232_v54 = vsel %vm4660_vm10, %v4210_v0, %v2231_v43  ;;  %v1969_v56 = vrot.slane %v1968_v27, 4  ;;  %v2233_v59 = vrot.slane %v2231_v43, 4  ;;  %279 = vst [vmem:[#allocation2 + $0x9c] sm:$0x1] %v278_v3 }
 0x109   : > { %v3220_v58 = vunpack.c.l.b16 %v1964_v53  ;;  %v3300_v62 = vunpack.c.l.b16 %v2232_v54  ;;  %v959_v1 = vsel %vm4701_vm14, %v671_v50, %v958_v46  ;;  %v555_v4 = vmax.f32 %v486_v48, 0.0 }
 0x10a   : > { %v529_v60 = vadd.f32 %v4938_v57, %v528_v63  ;;  %v2345_v5 = vshrl.u32 %v2274_v49, 16  ;;  %3426 = vrot.lane.b32.xlu1 %v4487_v16, %s4544_s7  ;;  %960 = vst [vmem:[#allocation2 + $0x30] sm:$0xf] %v959_v1  ;;  %v1974_v7 = vsel %vm4671_vm13, %v1969_v56, %v1973_v41  ;;  %v2235_v61 = vsel %vm4660_vm10, %v2233_v59, %v2234_v45  ;;  %v333_v56 = vld [vmem:[#allocation2 + $0xa4] sm:$0x1]  ;;  %v488_v1 = vpop.f32.mrf.mxu0 }
 0x10b   : > { %v2348_v8 = vshll.u32 %v2274_v49, 16  ;;  %v2354_v9 = vshll.u32 %v2275_v2, 16  ;;  %v3221_v10 = vunpack.c.l.b16 %v1974_v7  ;;  %v3301_v15 = vunpack.c.l.b16 %v2235_v61  ;;  %v253_v49 = vld [vmem:[#allocation2 + $0x3c] sm:$0x1]  ;;  %v1667_v59 = vld [vmem:[#allocation2 + $0x24] sm:$0xf] }
 0x10c   : > { %v587_v17 = vpack.c.bf16 %v555_v4, %v555_v4  ;;  %v572_v12 = vmax.f32 %v529_v60, 0.0  ;;  %v2347_v34 = vrot.slane %v2345_v5, 4  ;;  %v2358_v20 = vshrl.u32 %v2275_v2, 16  ;;  %v1668_v4 = vld [vmem:[#allocation2 + $0x28] sm:$0xf] }
 0x10d   : > { %v2350_v18 = vrot.slane %v2348_v8, 5  ;;  %v2356_v19 = vrot.slane %v2354_v9, 5  ;;  %v3242_v24 = vpack.c.b16 %v3221_v10, %v3220_v58  ;;  %v3322_v25 = vpack.c.b16 %v3301_v15, %v3300_v62  ;;  %v530_v58 = vpop.f32.mrf.mxu3  ;;  %v1697_v8 = vld [vmem:[#allocation2 + $0x2c] sm:$0x1] }
 0x10e   : > { %v674_v28 = vshrl.u32 %v587_v17, 16  ;;  %v677_v29 = vshll.u32 %v587_v17, 16  ;;  %v604_v26 = vpack.c.bf16 %v572_v12, %v572_v12  ;;  %v2360_v31 = vrot.slane %v2358_v20, 4  ;;  %v962_v39 = vld [vmem:[#allocation2 + $0x38] sm:$0x1] }
 0x10f   : > { %v2351_v30 = vor.u32 %v2350_v18, %v2347_v34  ;;  %v2364_v32 = vshll.u32 %v2305_v14, 16  ;;  %3268 = vrot.lane.b32.xlu2 %v3242_v24, %s4545_s8  ;;  %3348 = vrot.lane.b32.xlu0 %v3322_v25, %s4543_s6  ;;  %v4217_v36 = vrot.slane %v2705_v13, 9  ;;  %v2777_v37 = vrot.slane %v2275_v2, 5  ;;  %v1021_v54 = vld [vmem:[#allocation2 + $0x9c] sm:$0xf]  ;;  %v4496_v18 = vld [vmem:[#allocation2 + $0x90] sm:$0xff] }
 0x110   : > { %v676_v35 = vrot.slane %v674_v28, 7  ;;  %v2780_v23 = vrot.slane %v2305_v14, 5  ;;  %v819_v22 = vshrl.u32 %v604_v26, 16  ;;  %v822_v40 = vshll.u32 %v604_v26, 16  ;;  %v2097_v12 = vld [vmem:[#allocation2 + $0x24] sm:$0xe] }
 0x111   : > { %v2352_v41 = vrot.slane %v2351_v30, 4  ;;  %v2361_v0 = vor.u32 %v2360_v31, %v2356_v19  ;;  %v2366_v45 = vrot.slane %v2364_v32, 5  ;;  %v2778_v46 = vsel %vm4660_vm10, %v4217_v36, %v2777_v37 }
 0x112   : > { %v679_v42 = vor.u32 %v677_v29, %v676_v35  ;;  %v681_v43 = vrot.slane %v676_v35, 4  ;;  %3172 = vrot.lane.b32.xlu1 %v4472_v38, %s4542_s30  ;;  %v4980_v27 = vrot.slane %v819_v22, 7  ;;  %v2779_v3 = vrot.slane %v2777_v37, 4 }
 0x113   : > { %v2357_v47 = vsel %vm4671_vm13, %v2352_v41, %v2356_v19  ;;  %v2362_v48 = vrot.slane %v2361_v0, 4  ;;  %v3538_v16 = vunpack.c.l.b16 %v2778_v46  ;;  %v254_v7 = vsel %vm4620_vm4, 0, %v253_v49 }
 0x114   : > { %v680_v50 = vsel %vm4715_vm0, %v672_v51, %v679_v42  ;;  %v963_v53 = vsel %vm4620_vm4, %v681_v43, %v962_v39  ;;  %v3458_v2 = vunpack.c.l.b16 %v2357_v47  ;;  %v824_v62 = vor.u32 %v822_v40, %v4980_v27  ;;  %255 = vst [vmem:[#allocation2 + $0x3c] sm:$0x1] %v254_v7  ;;  %v309_v40 = vld [vmem:[#allocation2 + $0x44] sm:$0x1] }
 0x115   : > { %961 = vst.msk [vmem:[#allocation2 + $0x34] sm:$0xf] %vm226_vm5, %v680_v50  ;;  %v825_v63 = vrot.slane %v4980_v27, 4  ;;  %v2367_v52 = vsel %vm4671_vm13, %v2362_v48, %v2366_v45  ;;  %v2781_v51 = vsel %vm4660_vm10, %v2779_v3, %v2780_v23  ;;  %v489_v61 = vadd.f32 %v4938_v57, %v488_v1  ;;  %v2292_v3 = vld [vmem:[#allocation2 + $0x90] sm:$0xf]  ;;  %v386_v1 = vld [vmem:[%s4598_s25 + $0xf8] sm:$0xff] }
 0x116   : > { %964 = vst [vmem:[#allocation2 + $0x38] sm:$0x1] %v963_v53  ;;  %v3459_v60 = vunpack.c.l.b16 %v2367_v52  ;;  %v3539_v5 = vunpack.c.l.b16 %v2781_v51  ;;  %v1022_v9 = vsel %vm4701_vm14, %v824_v62, %v1021_v54  ;;  %v334_v10 = vsel %vm4643_vm7, 0, %v333_v56  ;;  %v385_v56 = vld [vmem:[%s4598_s25 + $0xf0] sm:$0xff] }
 0x117   : > { %v531_v15 = vadd.f32 %v4938_v57, %v530_v58  ;;  %v1760_v17 = vshrl.u32 %v1667_v59, 16  ;;  %1023 = vst [vmem:[#allocation2 + $0x9c] sm:$0xf] %v1022_v9  ;;  %v556_v19 = vmax.f32 %v489_v61, 0.0  ;;  %v1763_v20 = vshll.u32 %v1667_v59, 16  ;;  %v4481_v61 = vld [vmem:[#allocation2 + $0x90] sm:$0xff] }
 0x118   : > { %v3489_v14 = vpack.c.b16 %v3459_v60, %v3458_v2  ;;  %v3569_v34 = vpack.c.b16 %v3539_v5, %v3538_v16  ;;  %335 = vst [vmem:[#allocation2 + $0xa4] sm:$0x1] %v334_v10  ;;  %v1769_v25 = vshll.u32 %v1668_v4, 16  ;;  %v1773_v28 = vshrl.u32 %v1668_v4, 16  ;;  %v490_v16 = vpop.f32.mrf.mxu0 }
 0x119   : > { %v573_v13 = vmax.f32 %v531_v15, 0.0  ;;  %v1762_v24 = vrot.slane %v1760_v17, 4  ;;  %v588_v29 = vpack.c.bf16 %v556_v19, %v556_v19  ;;  %v1765_v26 = vrot.slane %v1763_v20, 5  ;;  %v2293_v17 = vld [vmem:[#allocation2 + $0x94] sm:$0xf] }
 0x11a   : > { %3506 = vrot.lane.b32.xlu2 %v3489_v14, %s4547_s10  ;;  %3586 = vrot.lane.b32.xlu0 %v3569_v34, %s4546_s9  ;;  %v1779_v30 = vshll.u32 %v1697_v8, 16  ;;  %v4202_v31 = vrot.slane %v2097_v12, 9  ;;  %v1771_v35 = vrot.slane %v1769_v25, 5  ;;  %v1775_v36 = vrot.slane %v1773_v28, 4  ;;  %v2314_v12 = vld [vmem:[#allocation2 + $0x98] sm:$0x1] }
 0x11b   : > { %3444 = vrot.lane.b32.xlu1 %v4496_v18, %s4544_s7  ;;  %v605_v32 = vpack.c.bf16 %v573_v13, %v573_v13  ;;  %v2175_v37 = vrot.slane %v1668_v4, 5  ;;  %v683_v23 = vshrl.u32 %v588_v29, 16  ;;  %v686_v38 = vshll.u32 %v588_v29, 16  ;;  %v965_v49 = vld [vmem:[#allocation2 + $0x3c] sm:$0xf] }
 0x11c   : > { %v1766_v39 = vor.u32 %v1765_v26, %v1762_v24  ;;  %v1781_v22 = vrot.slane %v1779_v30, 5  ;;  %v1776_v42 = vor.u32 %v1775_v36, %v1771_v35  ;;  %v2178_v48 = vrot.slane %v1697_v8, 5  ;;  %v2714_v20 = vld [vmem:[#allocation2 + $0x90] sm:$0xe]  ;;  %v1487_v36 = vld [vmem:[#allocation2 + $0x24] sm:$0xe] }
 0x11d   : > { %v827_v41 = vshrl.u32 %v605_v32, 16  ;;  %v830_v0 = vshll.u32 %v605_v32, 16  ;;  %v2176_v43 = vsel %vm4660_vm10, %v4202_v31, %v2175_v37  ;;  %v5010_v45 = vrot.slane %v683_v23, 7 }
 0x11e   : > { %v1767_v46 = vrot.slane %v1766_v39, 4  ;;  %v2177_v47 = vrot.slane %v2175_v37, 4  ;;  %v1777_v53 = vrot.slane %v1776_v42, 4  ;;  %v3284_v54 = vunpack.c.l.b16 %v2176_v43  ;;  %v256_v43 = vld [vmem:[#allocation2 + $0x48] sm:$0x1] }
 0x11f   : > { %v829_v50 = vrot.slane %v827_v41, 7  ;;  %v310_v2 = vsel %vm4643_vm7, 0, %v309_v40  ;;  %v688_v58 = vor.u32 %v686_v38, %v5010_v45  ;;  %v689_v59 = vrot.slane %v5010_v45, 4  ;;  %v1025_v62 = vld [vmem:[#allocation2 + $0xa4] sm:$0x1] }
 0x120   : > { %v1772_v52 = vsel %vm4671_vm13, %v1767_v46, %v1771_v35  ;;  %v2179_v51 = vsel %vm4660_vm10, %v2177_v47, %v2178_v48  ;;  %311 = vst [vmem:[#allocation2 + $0x44] sm:$0x1] %v310_v2  ;;  %v1782_v5 = vsel %vm4671_vm13, %v1777_v53, %v1781_v22  ;;  %v491_v15 = vadd.f32 %v4938_v57, %v490_v16  ;;  %v5038_v22 = vld [vmem:[#allocation2 + $0x2c] sm:$0x1]  ;;  %v493_v16 = vpop.f32.mrf.mxu0 }
 0x121   : > { %v832_v4 = vor.u32 %v830_v0, %v829_v50  ;;  %v834_v60 = vrot.slane %v829_v50, 4  ;;  %v3204_v7 = vunpack.c.l.b16 %v1772_v52  ;;  %v966_v8 = vsel %vm4701_vm14, %v688_v58, %v965_v49 }
 0x122   : > { %v3205_v9 = vunpack.c.l.b16 %v1782_v5  ;;  %v3285_v10 = vunpack.c.l.b16 %v2179_v51  ;;  %967 = vst [vmem:[#allocation2 + $0x3c] sm:$0xf] %v966_v8  ;;  %v402_v18 = vpack.c.bf16 %v386_v1, %v385_v56  ;;  %v2561_v19 = vshrl.u32 %v2292_v3, 16 }
 0x123   : > { %v833_v14 = vsel %vm4715_vm0, %v825_v63, %v832_v4  ;;  %v1026_v34 = vsel %vm4620_vm4, %v834_v60, %v1025_v62  ;;  %3190 = vrot.lane.b32.xlu1 %v4481_v61, %s4542_s30  ;;  %v557_v25 = vmax.f32 %v491_v15, 0.0  ;;  %v2564_v28 = vshll.u32 %v2292_v3, 16  ;;  %v5042_v3 = vld [vmem:[#allocation2 + $0x28] sm:$0xf]  ;;  %v1686_v15 = vld [vmem:[#allocation2 + $0x94] sm:$0xf] }
 0x124   : > { %1024 = vst.msk [vmem:[#allocation2 + $0xa0] sm:$0xf] %vm226_vm5, %v833_v14  ;;  %v3234_v13 = vpack.c.b16 %v3205_v9, %v3204_v7  ;;  %v3314_v24 = vpack.c.b16 %v3285_v10, %v3284_v54  ;;  %4183 = vmatmul.msk.bf16.gmra.mxu3 %vm406_vm1, %v402_v18  ;;  %v2563_v27 = vrot.slane %v2561_v19, 4  ;;  %v2570_v29 = vshll.u32 %v2293_v17, 16  ;;  %v1685_v7 = vld [vmem:[#allocation2 + $0x90] sm:$0xf] }
 0x125   : > { %1027 = vst [vmem:[#allocation2 + $0xa4] sm:$0x1] %v1026_v34  ;;  %v2574_v63 = vshrl.u32 %v2293_v17, 16  ;;  %v2580_v26 = vshll.u32 %v2314_v12, 16  ;;  %v589_v30 = vpack.c.bf16 %v557_v25, %v557_v25  ;;  %v2566_v31 = vrot.slane %v2564_v28, 5 }
 0x126   : > { %3252 = vrot.lane.b32.xlu2 %v3234_v13, %s4545_s8  ;;  %3332 = vrot.lane.b32.xlu0 %v3314_v24, %s4543_s6  ;;  %v4226_v32 = vrot.slane %v2714_v20, 9  ;;  %v2840_v35 = vrot.slane %v2293_v17, 5  ;;  %v2572_v37 = vrot.slane %v2570_v29, 5  ;;  %v2843_v39 = vrot.slane %v2314_v12, 5  ;;  %v1706_v18 = vld [vmem:[#allocation2 + $0x98] sm:$0x1] }
 0x127   : > { %v2576_v23 = vrot.slane %v2574_v63, 4  ;;  %v2582_v38 = vrot.slane %v2580_v26, 5  ;;  %v691_v40 = vshrl.u32 %v589_v30, 16  ;;  %v694_v41 = vshll.u32 %v589_v30, 16  ;;  %v969_v56 = vld [vmem:[#allocation2 + $0x44] sm:$0x1] }
 0x128   : > { %v2567_v0 = vor.u32 %v2566_v31, %v2563_v27  ;;  %v2841_v42 = vsel %vm4660_vm10, %v4226_v32, %v2840_v35  ;;  %v2842_v47 = vrot.slane %v2840_v35, 4  ;;  %v4187_v49 = vrot.slane %v1487_v36, 9  ;;  %v2106_v25 = vld [vmem:[#allocation2 + $0x90] sm:$0xe] }
 0x129   : > { %v2577_v46 = vor.u32 %v2576_v23, %v2572_v37  ;;  %v3556_v48 = vunpack.c.l.b16 %v2841_v42  ;;  %v693_v50 = vrot.slane %v691_v40, 7  ;;  %v1574_v54 = vrot.slane %v5042_v3, 5  ;;  %v4454_v40 = vld [vmem:[#allocation2] sm:$0xff] }
 0x12a   : > { %v2568_v53 = vrot.slane %v2567_v0, 4  ;;  %v1577_v2 = vrot.slane %v5038_v22, 5  ;;  %v2844_v62 = vsel %vm4660_vm10, %v2842_v47, %v2843_v39  ;;  %v257_v52 = vsel %vm4620_vm4, 0, %v256_v43 }
 0x12b   : > { %v2578_v58 = vrot.slane %v2577_v46, 4  ;;  %v494_v51 = vadd.f32 %v4938_v57, %v493_v16  ;;  %v696_v1 = vor.u32 %v694_v41, %v693_v50  ;;  %v698_v4 = vrot.slane %v693_v50, 4  ;;  %258 = vst [vmem:[#allocation2 + $0x48] sm:$0x1] %v257_v52  ;;  %v5068_v41 = vpop.permute.xlu2 %3074  ;;  %v2993_v46 = vpop.permute.xlu0 %2992 }
 0x12c   : > { %v2573_v60 = vsel %vm4671_vm13, %v2568_v53, %v2572_v37  ;;  %v3557_v5 = vunpack.c.l.b16 %v2844_v62  ;;  %v1575_v9 = vsel %vm4660_vm10, %v4187_v49, %v1574_v54  ;;  %v1576_v10 = vrot.slane %v1574_v54, 4  ;;  %v1055_v37 = vld [vmem:[#allocation2 + $0x24] sm:$0xf] }
 0x12d   : > { %v2583_v61 = vsel %vm4671_vm13, %v2578_v58, %v2582_v38  ;;  %v3476_v8 = vunpack.c.l.b16 %v2573_v60  ;;  %v697_v17 = vsel %vm4715_vm0, %v689_v59, %v696_v1  ;;  %v970_v12 = vsel %vm4620_vm4, %v698_v4, %v969_v56  ;;  %v3073_v58 = vpop.permute.xlu1 %3072 }
 0x12e   : > { %v3477_v14 = vunpack.c.l.b16 %v2583_v61  ;;  %v3578_v34 = vpack.c.b16 %v3557_v5, %v3556_v48  ;;  %968 = vst.msk [vmem:[#allocation2 + $0x40] sm:$0xf] %vm226_vm5, %v697_v17  ;;  %v1578_v19 = vsel %vm4660_vm10, %v1576_v10, %v1577_v2  ;;  %v3030_v20 = vunpack.c.l.b16 %v1575_v9  ;;  %v312_v61 = vld [vmem:[#allocation2 + $0x50] sm:$0x1] }
 0x12f   : > { %v558_v13 = vmax.f32 %v494_v51, 0.0  ;;  %v1976_v24 = vshrl.u32 %v1685_v7, 16  ;;  %971 = vst [vmem:[#allocation2 + $0x44] sm:$0x1] %v970_v12  ;;  %v3031_v59 = vunpack.c.l.b16 %v1578_v19  ;;  %v1979_v28 = vshll.u32 %v1685_v7, 16 }
 0x130   : > { %v3498_v45 = vpack.c.b16 %v3477_v14, %v3476_v8  ;;  %3604 = vrot.lane.b32.xlu0 %v3578_v34, %s4546_s9  ;;  %v1985_v27 = vshll.u32 %v1686_v15, 16  ;;  %v1989_v26 = vshrl.u32 %v1686_v15, 16  ;;  %v1995_v30 = vshll.u32 %v1706_v18, 16  ;;  %v495_v8 = vpop.f32.mrf.mxu0 }
 0x131   : > { %v590_v29 = vpack.c.bf16 %v558_v13, %v558_v13  ;;  %v1978_v63 = vrot.slane %v1976_v24, 4  ;;  %v3059_v31 = vpack.c.b16 %v3031_v59, %v3030_v20  ;;  %v1981_v32 = vrot.slane %v1979_v28, 5 }
 0x132   : > { %3524 = vrot.lane.b32.xlu2 %v3498_v45, %s4547_s10  ;;  %v1987_v35 = vrot.slane %v1985_v27, 5  ;;  %v4211_v36 = vrot.slane %v2106_v25, 9  ;;  %v1991_v39 = vrot.slane %v1989_v26, 4  ;;  %v2238_v42 = vrot.slane %v1686_v15, 5  ;;  %v972_v53 = vld [vmem:[#allocation2 + $0x48] sm:$0xf] }
 0x133   : > { %v700_v23 = vshrl.u32 %v590_v29, 16  ;;  %v703_v38 = vshll.u32 %v590_v29, 16  ;;  %3078 = vrot.lane.b32.xlu1 %v3059_v31, %s4540_s26  ;;  %v1982_v0 = vor.u32 %v1981_v32, %v1978_v63  ;;  %v2241_v43 = vrot.slane %v1706_v18, 5  ;;  %v280_v25 = vld [vmem:[#allocation2 + $0xa8] sm:$0x1] }
 0x134   : > { %vm3616_vm1 = vcmask 23552   ;;  %v1992_v48 = vor.u32 %v1991_v39, %v1987_v35  ;;  %v1997_v49 = vrot.slane %v1995_v30, 5  ;;  %v1173_v50 = vshrl.u32 %v1055_v37, 16  ;;  %v1073_v45 = vld [vmem:[#allocation2 + $0x90] sm:$0xf]  ;;  %v5093_v30 = vpop.permute.xlu2 %3248 }
 0x135   : > { %v5071_v47 = vrot.slane %v700_v23, 7  ;;  %v1983_v54 = vrot.slane %v1982_v0, 4  ;;  %v2239_v2 = vsel %vm4660_vm10, %v4211_v36, %v2238_v42  ;;  %v2240_v16 = vrot.slane %v2238_v42, 4  ;;  %v533_v36 = vpop.f32.mrf.mxu3  ;;  %v1093_v0 = vld [vmem:[#allocation2 + $0x98] sm:$0x1] }
 0x136   : > { %v1176_v56 = vshll.u32 %v1055_v37, 16  ;;  %v1993_v52 = vrot.slane %v1992_v48, 4  ;;  %v3302_v51 = vunpack.c.l.b16 %v2239_v2  ;;  %v3619_v1 = vsel %vm3616_vm1, %v4454_v40, %v2993_v46 }
 0x137   : > { %v705_v62 = vor.u32 %v703_v38, %v5071_v47  ;;  %v1988_v4 = vsel %vm4671_vm13, %v1983_v54, %v1987_v35  ;;  %v2242_v60 = vsel %vm4660_vm10, %v2240_v16, %v2241_v43  ;;  %v1175_v5 = vrot.slane %v1173_v50, 4  ;;  %v1496_v54 = vld [vmem:[#allocation2 + $0x90] sm:$0xe]  ;;  %v4482_v16 = vld [vmem:[#allocation2 + $0x9c] sm:$0xff] }
 0x138   : > { %v1178_v7 = vrot.slane %v1176_v56, 5  ;;  %v1998_v10 = vsel %vm4671_vm13, %v1993_v52, %v1997_v49  ;;  %v3222_v15 = vunpack.c.l.b16 %v1988_v4  ;;  %v3303_v17 = vunpack.c.l.b16 %v2242_v60  ;;  %v3169_v49 = vpop.permute.xlu1 %3168 }
 0x139   : > { %v973_v9 = vsel %vm4701_vm14, %v705_v62, %v972_v53  ;;  %v3223_v12 = vunpack.c.l.b16 %v1998_v10  ;;  %v1182_v34 = vshll.u32 %v5042_v3, 16  ;;  %v1186_v18 = vshrl.u32 %v5042_v3, 16 }
 0x13a   : > { %974 = vst [vmem:[#allocation2 + $0x48] sm:$0xf] %v973_v9  ;;  %v1179_v14 = vor.u32 %v1178_v7, %v1175_v5  ;;  %v3323_v19 = vpack.c.b16 %v3303_v17, %v3302_v51  ;;  %v1192_v20 = vshll.u32 %v5038_v22, 16  ;;  %v313_v13 = vsel %vm4643_vm7, 0, %v312_v61  ;;  %v1074_v22 = vld [vmem:[#allocation2 + $0x94] sm:$0xf] }
 0x13b   : > { %v496_v24 = vadd.f32 %v4938_v57, %v495_v8  ;;  %v3243_v59 = vpack.c.b16 %v3223_v12, %v3222_v15  ;;  %v1184_v27 = vrot.slane %v1182_v34, 5  ;;  %v1188_v29 = vrot.slane %v1186_v18, 4  ;;  %314 = vst [vmem:[#allocation2 + $0x50] sm:$0x1] %v313_v13 }
 0x13c   : > { %v1180_v28 = vrot.slane %v1179_v14, 4  ;;  %v706_v63 = vrot.slane %v5071_v47, 4  ;;  %3350 = vrot.lane.b32.xlu0 %v3323_v19, %s4543_s6  ;;  %v1194_v3 = vrot.slane %v1192_v20, 5  ;;  %v281_v35 = vsel %vm4620_vm4, 0, %v280_v25 }
 0x13d   : > { %v559_v26 = vmax.f32 %v496_v24, 0.0  ;;  %3270 = vrot.lane.b32.xlu2 %v3243_v59, %s4545_s8  ;;  %v1189_v32 = vor.u32 %v1188_v29, %v1184_v27  ;;  %v3667_v38 = vsel %vm3665_vm2, %v3619_v1, %v3073_v58  ;;  %282 = vst [vmem:[#allocation2 + $0xa8] sm:$0x1] %v281_v35  ;;  %v534_v39 = vadd.f32 %v4938_v57, %v533_v36  ;;  %v5114_v59 = vpop.permute.xlu2 %3092  ;;  %v336_v35 = vld [vmem:[#allocation2 + $0xb0] sm:$0x1] }
 0x13e   : > { %v1185_v31 = vsel %vm4671_vm13, %v1180_v28, %v1184_v27  ;;  %v1389_v42 = vshrl.u32 %v1073_v45, 16  ;;  %v1392_v43 = vshll.u32 %v1073_v45, 16  ;;  %v1398_v46 = vshll.u32 %v1074_v22, 16  ;;  %v498_v45 = vpop.f32.mrf.mxu0 }
 0x13f   : > { %v2950_v37 = vunpack.c.l.b16 %v1185_v31  ;;  %v591_v23 = vpack.c.bf16 %v559_v26, %v559_v26  ;;  %v1190_v40 = vrot.slane %v1189_v32, 4  ;;  %v574_v50 = vmax.f32 %v534_v39, 0.0  ;;  %v259_v32 = vld [vmem:[#allocation2 + $0x54] sm:$0x1]  ;;  %v3329_v39 = vpop.permute.xlu0 %3328 }
 0x140   : > { %v1402_v53 = vshrl.u32 %v1074_v22, 16  ;;  %v1391_v56 = vrot.slane %v1389_v42, 4  ;;  %v1394_v58 = vrot.slane %v1392_v43, 5  ;;  %v1400_v62 = vrot.slane %v1398_v46, 5  ;;  %v5128_v46 = vpop.permute.xlu1 %3440 }
 0x141   : > { %v708_v47 = vshrl.u32 %v591_v23, 16  ;;  %v711_v48 = vshll.u32 %v591_v23, 16  ;;  %v1195_v2 = vsel %vm4671_vm13, %v1190_v40, %v1194_v3  ;;  %v606_v1 = vpack.c.bf16 %v574_v50, %v574_v50  ;;  %v535_v40 = vpop.f32.mrf.mxu3 }
 0x142   : > { %v2951_v52 = vunpack.c.l.b16 %v1195_v2  ;;  %v1404_v4 = vrot.slane %v1402_v53, 4  ;;  %v976_v60 = vld [vmem:[#allocation2 + $0x50] sm:$0x1]  ;;  %v1395_v5 = vor.u32 %v1394_v58, %v1391_v56  ;;  %v1408_v7 = vshll.u32 %v1093_v0, 16  ;;  %v5143_v56 = vld [vmem:[#allocation2 + $0x38] sm:$0x1] }
 0x143   : > { %v710_v51 = vrot.slane %v708_v47, 7  ;;  %v4196_v61 = vrot.slane %v1496_v54, 9  ;;  %v1637_v8 = vrot.slane %v1074_v22, 5  ;;  %v836_v17 = vshrl.u32 %v606_v1, 16  ;;  %v5130_v47 = vld [vmem:[#allocation2 + $0x34] sm:$0xf] }
 0x144   : > { %v2979_v9 = vpack.c.b16 %v2951_v52, %v2950_v37  ;;  %v839_v12 = vshll.u32 %v606_v1, 16  ;;  %v1396_v14 = vrot.slane %v1395_v5, 4  ;;  %v1405_v34 = vor.u32 %v1404_v4, %v1400_v62  ;;  %v1028_v24 = vld [vmem:[#allocation2 + $0xa8] sm:$0xf]  ;;  %v315_v1 = vld [vmem:[#allocation2 + $0x5c] sm:$0x1] }
 0x145   : > { %v713_v10 = vor.u32 %v711_v48, %v710_v51  ;;  %v715_v15 = vrot.slane %v710_v51, 4  ;;  %3192 = vrot.lane.b32.xlu2 %v4482_v16, %s4542_s30  ;;  %v1410_v18 = vrot.slane %v1408_v7, 5  ;;  %v5110_v13 = vrot.slane %v836_v17, 7  ;;  %v5132_v48 = vld [vmem:[#allocation2 + $0x38] sm:$0x1] }
 0x146   : > { %2998 = vrot.lane.b32.xlu1 %v2979_v9, %s4541_s29  ;;  %v1638_v25 = vsel %vm4660_vm10, %v4196_v61, %v1637_v8  ;;  %v1401_v28 = vsel %vm4671_vm13, %v1396_v14, %v1400_v62  ;;  %v1406_v27 = vrot.slane %v1405_v34, 4  ;;  %v1639_v29 = vrot.slane %v1637_v8, 4  ;;  %v5141_v16 = vld [vmem:[#allocation2 + $0x34] sm:$0xf] }
 0x147   : > { %v714_v19 = vsel %vm4715_vm0, %v706_v63, %v713_v10  ;;  %v977_v20 = vsel %vm4620_vm4, %v715_v15, %v976_v60  ;;  %v1640_v63 = vrot.slane %v1093_v0, 5  ;;  %v3700_v3 = vsel %vm3698_vm3, %v3667_v38, %v3169_v49  ;;  %v1488_v0 = vld [vmem:[#allocation2 + $0x30] sm:$0xe] }
 0x148   : > { %975 = vst.msk [vmem:[#allocation2 + $0x4c] sm:$0xf] %vm226_vm5, %v714_v19  ;;  %v841_v26 = vor.u32 %v839_v12, %v5110_v13  ;;  %v2968_v22 = vunpack.c.l.b16 %v1401_v28  ;;  %v3048_v31 = vunpack.c.l.b16 %v1638_v25  ;;  %v842_v36 = vrot.slane %v5110_v13, 4  ;;  %v2706_v49 = vld [vmem:[#allocation2 + $0x30] sm:$0xe]  ;;  %v5161_v25 = vpop.permute.xlu2 %3520 }
 0x149   : > { %978 = vst [vmem:[#allocation2 + $0x50] sm:$0x1] %v977_v20  ;;  %v1411_v37 = vsel %vm4671_vm13, %v1406_v27, %v1410_v18  ;;  %v1641_v23 = vsel %vm4660_vm10, %v1639_v29, %v1640_v63  ;;  %v3733_v50 = vsel %vm3731_vm6, %v3700_v3, %v5093_v30  ;;  %v260_v53 = vsel %vm4620_vm4, 0, %v259_v32  ;;  %v500_v20 = vpop.f32.mrf.mxu0  ;;  %v1057_v63 = vld [vmem:[#allocation2 + $0x30] sm:$0xf] }
 0x14a   : > { %v1029_v38 = vsel %vm4701_vm14, %v841_v26, %v1028_v24  ;;  %v2969_v42 = vunpack.c.l.b16 %v1411_v37  ;;  %v3049_v43 = vunpack.c.l.b16 %v1641_v23  ;;  %v499_v54 = vadd.f32 %v4938_v57, %v498_v45  ;;  %261 = vst [vmem:[#allocation2 + $0x54] sm:$0x1] %v260_v53  ;;  %v283_v24 = vld [vmem:[#allocation2 + $0xb4] sm:$0x1]  ;;  %v5169_v23 = vpop.permute.xlu0 %2994 }
 0x14b   : > { %1030 = vst [vmem:[#allocation2 + $0xa8] sm:$0xf] %v1029_v38  ;;  %v337_v2 = vsel %vm4643_vm7, 0, %v336_v35  ;;  %v536_v52 = vadd.f32 %v4938_v57, %v535_v40  ;;  %v4188_v51 = vrot.slane %v1488_v0, 9  ;;  %v1581_v4 = vrot.slane %v5130_v47, 5  ;;  %v4488_v37 = vld [vmem:[#allocation2 + $0x30] sm:$0xff]  ;;  %v538_v0 = vpop.f32.mrf.mxu3 }
 0x14c   : > { %v2988_v58 = vpack.c.b16 %v2969_v42, %v2968_v22  ;;  %v3068_v62 = vpack.c.b16 %v3049_v43, %v3048_v31  ;;  %v560_v30 = vmax.f32 %v499_v54, 0.0  ;;  %338 = vst [vmem:[#allocation2 + $0xb0] sm:$0x1] %v337_v2  ;;  %v1584_v60 = vrot.slane %v5132_v48, 5 }
 0x14d   : > { %v4218_v5 = vrot.slane %v2706_v49, 9  ;;  %v5151_v7 = vsel %vm3764_vm8, %v3733_v50, %v3329_v39  ;;  %v575_v61 = vmax.f32 %v536_v52, 0.0  ;;  %v2784_v8 = vrot.slane %v5141_v16, 5  ;;  %v5174_v49 = vpop.permute.xlu1 %3186 }
 0x14e   : > { %3016 = vrot.lane.b32.xlu0 %v2988_v58, %s4541_s29  ;;  %3096 = vrot.lane.b32.xlu1 %v3068_v62, %s4540_s26  ;;  %v2787_v9 = vrot.slane %v5143_v56, 5  ;;  %v592_v10 = vpack.c.bf16 %v560_v30, %v560_v30  ;;  %v1582_v15 = vsel %vm4660_vm10, %v4188_v51, %v1581_v4  ;;  %v1583_v17 = vrot.slane %v1581_v4, 4 }
 0x14f   : > { %v316_v12 = vsel %vm4643_vm7, 0, %v315_v1  ;;  %v607_v14 = vpack.c.bf16 %v575_v61, %v575_v61  ;;  %v3032_v34 = vunpack.c.l.b16 %v1582_v15  ;;  %v2785_v18 = vsel %vm4660_vm10, %v4218_v5, %v2784_v8 }
 0x150   : > { %v2786_v19 = vrot.slane %v2784_v8, 4  ;;  %317 = vst [vmem:[#allocation2 + $0x5c] sm:$0x1] %v316_v12  ;;  %v717_v45 = vshrl.u32 %v592_v10, 16  ;;  %v720_v28 = vshll.u32 %v592_v10, 16  ;;  %v1585_v27 = vsel %vm4660_vm10, %v1583_v17, %v1584_v60 }
 0x151   : > { %v3540_v29 = vunpack.c.l.b16 %v2785_v18  ;;  %v844_v3 = vshrl.u32 %v607_v14, 16  ;;  %v847_v26 = vshll.u32 %v607_v14, 16  ;;  %v3033_v22 = vunpack.c.l.b16 %v1585_v27  ;;  %v979_v38 = vld [vmem:[#allocation2 + $0x54] sm:$0xf]  ;;  %v5185_v8 = vld [vmem:[#allocation2 + $0x38] sm:$0x1] }
 0x152   : > { %v2788_v31 = vsel %vm4660_vm10, %v2786_v19, %v2787_v9  ;;  %v5167_v32 = vrot.slane %v717_v45, 7  ;;  %v501_v39 = vadd.f32 %v4938_v57, %v500_v20  ;;  %v284_v40 = vsel %vm4620_vm4, 0, %v283_v24  ;;  %v5194_v12 = vld [vmem:[#allocation2 + $0x34] sm:$0xf]  ;;  %v2098_v14 = vld [vmem:[#allocation2 + $0x30] sm:$0xe] }
 0x153   : > { %v3541_v35 = vunpack.c.l.b16 %v2788_v31  ;;  %v846_v42 = vrot.slane %v844_v3, 7  ;;  %v3060_v43 = vpack.c.b16 %v3033_v22, %v3032_v34  ;;  %285 = vst [vmem:[#allocation2 + $0xb4] sm:$0x1] %v284_v40  ;;  %v539_v50 = vadd.f32 %v4938_v57, %v538_v0  ;;  %v1032_v58 = vld [vmem:[#allocation2 + $0xb0] sm:$0x1] }
 0x154   : > { %v1197_v53 = vshrl.u32 %v1057_v63, 16  ;;  %v722_v54 = vor.u32 %v720_v28, %v5167_v32  ;;  %v723_v2 = vrot.slane %v5167_v32, 4  ;;  %v561_v52 = vmax.f32 %v501_v39, 0.0  ;;  %v5198_v28 = vpop.permute.xlu2 %3266  ;;  %v4455_v27 = vld [vmem:[#allocation2 + $0xc] sm:$0xff] }
 0x155   : > { %v3570_v62 = vpack.c.b16 %v3541_v35, %v3540_v29  ;;  %v849_v51 = vor.u32 %v847_v26, %v846_v42  ;;  %v851_v1 = vrot.slane %v846_v42, 4  ;;  %3080 = vrot.lane.b32.xlu2 %v3060_v43, %s4540_s26  ;;  %v576_v30 = vmax.f32 %v539_v50, 0.0  ;;  %v5206_v42 = vpop.permute.xlu0 %3600 }
 0x156   : > { %3428 = vrot.lane.b32.xlu1 %v4488_v37, %s4544_s7  ;;  %v1199_v4 = vrot.slane %v1197_v53, 4  ;;  %v980_v60 = vsel %vm4701_vm14, %v722_v54, %v979_v38  ;;  %v593_v57 = vpack.c.bf16 %v561_v52, %v561_v52  ;;  %v1200_v5 = vshll.u32 %v1057_v63, 16  ;;  %v4473_v37 = vld [vmem:[#allocation2 + $0x30] sm:$0xff] }
 0x157   : > { %3588 = vrot.lane.b32.xlu0 %v3570_v62, %s4546_s9  ;;  %v1206_v61 = vshll.u32 %v5130_v47, 16  ;;  %981 = vst [vmem:[#allocation2 + $0x54] sm:$0xf] %v980_v60  ;;  %v850_v9 = vsel %vm4715_vm0, %v842_v36, %v849_v51  ;;  %v1033_v10 = vsel %vm4620_vm4, %v851_v1, %v1032_v58  ;;  %v608_v15 = vpack.c.bf16 %v576_v30, %v576_v30  ;;  %v983_v26 = vld [vmem:[#allocation2 + $0x5c] sm:$0x1]  ;;  %v5214_v62 = vpop.permute.xlu1 %3424 }
 0x158   : > { %v1210_v17 = vshrl.u32 %v5130_v47, 16  ;;  %1031 = vst.msk [vmem:[#allocation2 + $0xac] sm:$0xf] %vm226_vm5, %v850_v9  ;;  %v725_v34 = vshrl.u32 %v593_v57, 16  ;;  %v728_v18 = vshll.u32 %v593_v57, 16  ;;  %v1202_v19 = vrot.slane %v1200_v5, 5  ;;  %v503_v9 = vpop.f32.mrf.mxu0 }
 0x159   : > { %v1208_v20 = vrot.slane %v1206_v61, 5  ;;  %1034 = vst [vmem:[#allocation2 + $0xb0] sm:$0x1] %v1033_v10  ;;  %v853_v13 = vshrl.u32 %v608_v15, 16  ;;  %v856_v24 = vshll.u32 %v608_v15, 16  ;;  %v1216_v36 = vshll.u32 %v5132_v48, 16 }
 0x15a   : > { %v1212_v45 = vrot.slane %v1210_v17, 4  ;;  %v727_v29 = vrot.slane %v725_v34, 7  ;;  %v1203_v47 = vor.u32 %v1202_v19, %v1199_v4  ;;  %v4203_v63 = vrot.slane %v2098_v14, 9  ;;  %v1035_v0 = vld [vmem:[#allocation2 + $0xb4] sm:$0xf]  ;;  %v540_v4 = vpop.f32.mrf.mxu3 }
 0x15b   : > { %v2182_v3 = vrot.slane %v5194_v12, 5  ;;  %v5201_v22 = vrot.slane %v853_v13, 7  ;;  %v1218_v32 = vrot.slane %v1216_v36, 5  ;;  %v2185_v35 = vrot.slane %v5185_v8, 5  ;;  %v262_v58 = vld [vmem:[#allocation2 + $0x60] sm:$0x1] }
 0x15c   : > { %v1213_v31 = vor.u32 %v1212_v45, %v1208_v20  ;;  %v730_v39 = vor.u32 %v728_v18, %v727_v29  ;;  %v732_v40 = vrot.slane %v727_v29, 4  ;;  %v1204_v48 = vrot.slane %v1203_v47, 4  ;;  %v339_v30 = vld [vmem:[#allocation2 + $0xbc] sm:$0x1]  ;;  %v2276_v60 = vld [vmem:[#allocation2 + $0x30] sm:$0xf] }
 0x15d   : > { %v2183_v38 = vsel %vm4660_vm10, %v4203_v63, %v2182_v3  ;;  %v5210_v43 = vsel %vm3616_vm1, %v4455_v27, %v5169_v23  ;;  %v858_v50 = vor.u32 %v856_v24, %v5201_v22  ;;  %v2184_v54 = vrot.slane %v2182_v3, 4  ;;  %v5234_v14 = vld [vmem:[%s6216_s2] ss:$0 sm:$0xff]  ;;  %v2715_v18 = vld [vmem:[#allocation2 + $0x9c] sm:$0xe] }
 0x15e   : > { %v1214_v53 = vrot.slane %v1213_v31, 4  ;;  %3174 = vrot.lane.b32.xlu1 %v4473_v37, %s4542_s30  ;;  %v731_v52 = vsel %vm4715_vm0, %v723_v2, %v730_v39  ;;  %v984_v51 = vsel %vm4620_vm4, %v732_v40, %v983_v26  ;;  %v1209_v1 = vsel %vm4671_vm13, %v1204_v48, %v1208_v20  ;;  %v4497_v29 = vld [vmem:[#allocation2 + $0x9c] sm:$0xff]  ;;  %v5244_v31 = vpop.permute.xlu2 %3504 }
 0x15f   : > { %v3286_v23 = vunpack.c.l.b16 %v2183_v38  ;;  %982 = vst.msk [vmem:[#allocation2 + $0x58] sm:$0xf] %vm226_vm5, %v731_v52  ;;  %v1036_v57 = vsel %vm4701_vm14, %v858_v50, %v1035_v0  ;;  %v2952_v61 = vunpack.c.l.b16 %v1209_v1  ;;  %v2186_v2 = vsel %vm4660_vm10, %v2184_v54, %v2185_v35  ;;  %v5248_v39 = vld [vmem:[#allocation2 + $0xa0] sm:$0xf]  ;;  %v5250_v50 = vld [vmem:[#allocation2 + $0xa4] sm:$0x1]  ;;  %v5254_v1 = vpop.permute.xlu0 %3346 }
 0x160   : > { %v1219_v5 = vsel %vm4671_vm13, %v1214_v53, %v1218_v32  ;;  %985 = vst [vmem:[#allocation2 + $0x5c] sm:$0x1] %v984_v51  ;;  %v3287_v15 = vunpack.c.l.b16 %v2186_v2  ;;  %v263_v17 = vsel %vm4620_vm4, 0, %v262_v58  ;;  %v504_v34 = vadd.f32 %v5234_v14, %v503_v9 }
 0x161   : > { %v2953_v10 = vunpack.c.l.b16 %v1219_v5  ;;  %v859_v19 = vrot.slane %v5201_v22, 4  ;;  %1037 = vst [vmem:[#allocation2 + $0xb4] sm:$0xf] %v1036_v57  ;;  %v340_v20 = vsel %vm4643_vm7, 0, %v339_v30  ;;  %v541_v13 = vadd.f32 %v5234_v14, %v540_v4 }
 0x162   : > { %v2369_v24 = vshrl.u32 %v2276_v60, 16  ;;  %v3315_v36 = vpack.c.b16 %v3287_v15, %v3286_v23  ;;  %264 = vst [vmem:[#allocation2 + $0x60] sm:$0x1] %v263_v17  ;;  %v562_v27 = vmax.f32 %v504_v34, 0.0  ;;  %v2372_v3 = vshll.u32 %v2276_v60, 16  ;;  %v5258_v60 = vpop.permute.xlu1 %3170 }
 0x163   : > { %v2980_v45 = vpack.c.b16 %v2953_v10, %v2952_v61  ;;  %341 = vst [vmem:[#allocation2 + $0xbc] sm:$0x1] %v340_v20  ;;  %v577_v47 = vmax.f32 %v541_v13, 0.0  ;;  %v2378_v26 = vshll.u32 %v5141_v16, 16  ;;  %v2382_v35 = vshrl.u32 %v5141_v16, 16 }
 0x164   : > { %v2371_v63 = vrot.slane %v2369_v24, 4  ;;  %3334 = vrot.lane.b32.xlu0 %v3315_v36, %s4543_s6  ;;  %v594_v32 = vpack.c.bf16 %v562_v27, %v562_v27  ;;  %v2388_v37 = vshll.u32 %v5143_v56, 16  ;;  %v4227_v40 = vrot.slane %v2715_v18, 9  ;;  %v318_v16 = vld [vmem:[#allocation2 + $0x68] sm:$0x1]  ;;  %v505_v18 = vpop.f32.mrf.mxu0 }
 0x165   : > { %3000 = vrot.lane.b32.xlu2 %v2980_v45, %s4541_s29  ;;  %v609_v0 = vpack.c.bf16 %v577_v47, %v577_v47  ;;  %v2374_v48 = vrot.slane %v2372_v3, 5  ;;  %v2380_v38 = vrot.slane %v2378_v26, 5  ;;  %v2847_v53 = vrot.slane %v5248_v39, 5  ;;  %v1669_v3 = vld [vmem:[#allocation2 + $0x30] sm:$0xf] }
 0x166   : > { %3446 = vrot.lane.b32.xlu1 %v4497_v29, %s4544_s7  ;;  %v734_v54 = vshrl.u32 %v594_v32, 16  ;;  %v737_v58 = vshll.u32 %v594_v32, 16  ;;  %v2384_v52 = vrot.slane %v2382_v35, 4  ;;  %v2390_v51 = vrot.slane %v2388_v37, 5 }
 0x167   : > { %v861_v56 = vshrl.u32 %v609_v0, 16  ;;  %v864_v23 = vshll.u32 %v609_v0, 16  ;;  %v2375_v30 = vor.u32 %v2374_v48, %v2371_v63  ;;  %v2848_v4 = vsel %vm4660_vm10, %v4227_v40, %v2847_v53  ;;  %v1687_v48 = vld [vmem:[#allocation2 + $0x9c] sm:$0xf] }
 0x168   : > { %v5260_v57 = vrot.slane %v734_v54, 7  ;;  %v2385_v5 = vor.u32 %v2384_v52, %v2380_v38  ;;  %v2849_v61 = vrot.slane %v2847_v53, 4  ;;  %v2850_v2 = vrot.slane %v5250_v50, 5  ;;  %v5288_v53 = vpop.permute.xlu2 %3250 }
 0x169   : > { %v986_v9 = vld [vmem:[#allocation2 + $0x60] sm:$0xf]  ;;  %v863_v10 = vrot.slane %v861_v56, 7  ;;  %v2376_v15 = vrot.slane %v2375_v30, 4  ;;  %v3558_v17 = vunpack.c.l.b16 %v2848_v4  ;;  %v319_v34 = vsel %vm4643_vm7, 0, %v318_v16 }
 0x16a   : > { %v739_v20 = vor.u32 %v737_v58, %v5260_v57  ;;  %v5269_v13 = vsel %vm3797_vm9, %v5151_v7, %v5214_v62  ;;  %v1039_v24 = vld [vmem:[#allocation2 + $0xbc] sm:$0x1]  ;;  %v2386_v45 = vrot.slane %v2385_v5, 4  ;;  %v2851_v36 = vsel %vm4660_vm10, %v2849_v61, %v2850_v2  ;;  %320 = vst [vmem:[#allocation2 + $0x68] sm:$0x1] %v319_v34  ;;  %v5297_v5 = vpop.permute.xlu0 %3076 }
 0x16b   : > { %v866_v27 = vor.u32 %v864_v23, %v863_v10  ;;  %v868_v29 = vrot.slane %v863_v10, 4  ;;  %v2381_v47 = vsel %vm4671_vm13, %v2376_v15, %v2380_v38  ;;  %v3559_v63 = vunpack.c.l.b16 %v2851_v36 }
 0x16c   : > { %v987_v26 = vsel %vm4701_vm14, %v739_v20, %v986_v9  ;;  %v2391_v7 = vsel %vm4671_vm13, %v2386_v45, %v2390_v51  ;;  %v3460_v62 = vunpack.c.l.b16 %v2381_v47  ;;  %v506_v32 = vadd.f32 %v5234_v14, %v505_v18  ;;  %v5300_v9 = vld [vmem:[#allocation2 + $0xa4] sm:$0x1]  ;;  %v2107_v18 = vld [vmem:[#allocation2 + $0x9c] sm:$0xe] }
 0x16d   : > { %988 = vst [vmem:[#allocation2 + $0x60] sm:$0xf] %v987_v26  ;;  %v867_v35 = vsel %vm4715_vm0, %v859_v19, %v866_v27  ;;  %v1040_v37 = vsel %vm4620_vm4, %v868_v29, %v1039_v24  ;;  %v3461_v40 = vunpack.c.l.b16 %v2391_v7  ;;  %v3579_v0 = vpack.c.b16 %v3559_v63, %v3558_v17 }
 0x16e   : > { %v740_v38 = vrot.slane %v5260_v57, 4  ;;  %1038 = vst.msk [vmem:[#allocation2 + $0xb8] sm:$0xf] %vm226_vm5, %v867_v35  ;;  %v563_v54 = vmax.f32 %v506_v32, 0.0  ;;  %v1784_v58 = vshrl.u32 %v1669_v3, 16  ;;  %v1787_v52 = vshll.u32 %v1669_v3, 16 }
 0x16f   : > { %1041 = vst [vmem:[#allocation2 + $0xbc] sm:$0x1] %v1040_v37  ;;  %v3490_v22 = vpack.c.b16 %v3461_v40, %v3460_v62  ;;  %3606 = vrot.lane.b32.xlu0 %v3579_v0, %s4546_s9  ;;  %v3669_v19 = vsel %vm3665_vm2, %v5210_v43, %v5068_v41  ;;  %v1793_v51 = vshll.u32 %v5194_v12, 16  ;;  %v1797_v16 = vshrl.u32 %v5194_v12, 16  ;;  %v1688_v57 = vld [vmem:[#allocation2 + $0xa0] sm:$0xf]  ;;  %v3013_v43 = vpop.permute.xlu1 %3012 }
 0x170   : > { %v595_v56 = vpack.c.bf16 %v563_v54, %v563_v54  ;;  %v1786_v23 = vrot.slane %v1784_v58, 4  ;;  %v1789_v30 = vrot.slane %v1787_v52, 5  ;;  %v1803_v4 = vshll.u32 %v5185_v8, 16  ;;  %v265_v52 = vld [vmem:[#allocation2 + $0x6c] sm:$0x1] }
 0x171   : > { %3508 = vrot.lane.b32.xlu2 %v3490_v22, %s4547_s10  ;;  %v1795_v61 = vrot.slane %v1793_v51, 5  ;;  %v1799_v2 = vrot.slane %v1797_v16, 4  ;;  %v2000_v10 = vshrl.u32 %v1687_v48, 16  ;;  %v2003_v41 = vshll.u32 %v1687_v48, 16  ;;  %v990_v63 = vld [vmem:[#allocation2 + $0x68] sm:$0x1]  ;;  %v508_v22 = vpop.f32.mrf.mxu0 }
 0x172   : > { %v742_v15 = vshrl.u32 %v595_v56, 16  ;;  %v745_v17 = vshll.u32 %v595_v56, 16  ;;  %v1790_v12 = vor.u32 %v1789_v30, %v1786_v23  ;;  %v1805_v34 = vrot.slane %v1803_v4, 5  ;;  %v5311_v30 = vpop.permute.xlu2 %3014  ;;  %v4464_v4 = vld [vmem:[#allocation2 + $0x78] sm:$0xff] }
 0x173   : > { %v1800_v20 = vor.u32 %v1799_v2, %v1795_v61  ;;  %v2002_v24 = vrot.slane %v2000_v10, 4  ;;  %v2005_v8 = vrot.slane %v2003_v41, 5  ;;  %v2009_v45 = vshll.u32 %v1688_v57, 16 }
 0x174   : > { %v744_v36 = vrot.slane %v742_v15, 7  ;;  %v1791_v27 = vrot.slane %v1790_v12, 4  ;;  %v2013_v29 = vshrl.u32 %v1688_v57, 16  ;;  %v2019_v47 = vshll.u32 %v5300_v9, 16  ;;  %v4453_v15 = vld [vmem:[%s6217_s3 + $0x8] sm:$0x30] }
 0x175   : > { %v1801_v3 = vrot.slane %v1800_v20, 4  ;;  %v2006_v26 = vor.u32 %v2005_v8, %v2002_v24  ;;  %v2011_v7 = vrot.slane %v2009_v45, 5  ;;  %v4212_v62 = vrot.slane %v2107_v18, 9  ;;  %v5329_v20 = vpop.permute.xlu0 %3584  ;;  %v2294_v24 = vld [vmem:[#allocation2 + $0x9c] sm:$0xf] }
 0x176   : > { %v747_v32 = vor.u32 %v745_v17, %v744_v36  ;;  %v749_v35 = vrot.slane %v744_v36, 4  ;;  %v1796_v37 = vsel %vm4671_vm13, %v1791_v27, %v1795_v61  ;;  %v2015_v40 = vrot.slane %v2013_v29, 4  ;;  %v4430_v61 = vld [vmem:[%s6217_s3 + $0x8] sm:$0xf] }
 0x177   : > { %v1806_v0 = vsel %vm4671_vm13, %v1801_v3, %v1805_v34  ;;  %v3206_v48 = vunpack.c.l.b16 %v1796_v37  ;;  %v2007_v54 = vrot.slane %v2006_v26, 4  ;;  %v2021_v58 = vrot.slane %v2019_v47, 5  ;;  %v5337_v8 = vpop.permute.xlu1 %3442 }
 0x178   : > { %v748_v51 = vsel %vm4715_vm0, %v740_v38, %v747_v32  ;;  %v991_v16 = vsel %vm4620_vm4, %v749_v35, %v990_v63  ;;  %v3207_v56 = vunpack.c.l.b16 %v1806_v0  ;;  %v2016_v23 = vor.u32 %v2015_v40, %v2011_v7  ;;  %v5345_v40 = vld [vmem:[#allocation2 + $0x44] sm:$0x1]  ;;  %v1489_v0 = vld [vmem:[#allocation2 + $0x3c] sm:$0xe] }
 0x179   : > { %989 = vst.msk [vmem:[#allocation2 + $0x64] sm:$0xf] %vm226_vm5, %v748_v51  ;;  %v5319_v2 = vsel %vm3698_vm3, %v3669_v19, %v5258_v60  ;;  %v2012_v38 = vsel %vm4671_vm13, %v2007_v54, %v2011_v7  ;;  %v2245_v10 = vrot.slane %v1688_v57, 5  ;;  %v2248_v41 = vrot.slane %v5300_v9, 5 }
 0x17a   : > { %992 = vst [vmem:[#allocation2 + $0x68] sm:$0x1] %v991_v16  ;;  %v3235_v17 = vpack.c.b16 %v3207_v56, %v3206_v48  ;;  %v2017_v12 = vrot.slane %v2016_v23, 4  ;;  %v3224_v34 = vunpack.c.l.b16 %v2012_v38  ;;  %v266_v18 = vsel %vm4620_vm4, 0, %v265_v52 }
 0x17b   : > { %v2246_v60 = vsel %vm4660_vm10, %v4212_v62, %v2245_v10  ;;  %v2247_v19 = vrot.slane %v2245_v10, 4  ;;  %267 = vst [vmem:[#allocation2 + $0x6c] sm:$0x1] %v266_v18  ;;  %v509_v57 = vadd.f32 %v5234_v14, %v508_v22  ;;  %v5335_v9 = vsel %vm3616_vm1, %v4464_v4, %v3013_v43  ;;  %v321_v22 = vld [vmem:[#allocation2 + $0x74] sm:$0x1]  ;;  %v510_v4 = vpop.f32.mrf.mxu0 }
 0x17c   : > { %3254 = vrot.lane.b32.xlu2 %v3235_v17, %s4545_s8  ;;  %v2022_v45 = vsel %vm4671_vm13, %v2017_v12, %v2021_v58  ;;  %v3304_v36 = vunpack.c.l.b16 %v2246_v60  ;;  %v4431_v27 = vor.u32 %v4453_v15, %v4430_v61  ;;  %v2585_v43 = vshrl.u32 %v2294_v24, 16  ;;  %v4452_v17 = vld [vmem:[%s6217_s3] sm:$0xff]  ;;  %v5356_v12 = vpop.permute.xlu2 %3522 }
 0x17d   : > { %v3225_v29 = vunpack.c.l.b16 %v2022_v45  ;;  %v2249_v47 = vsel %vm4660_vm10, %v2247_v19, %v2248_v41  ;;  %v564_v63 = vmax.f32 %v509_v57, 0.0  ;;  %v2588_v26 = vshll.u32 %v2294_v24, 16  ;;  %v5351_v41 = vld [vmem:[#allocation2 + $0x40] sm:$0xf] }
 0x17e   : > { %v3305_v3 = vunpack.c.l.b16 %v2249_v47  ;;  %v4548_v32 = vmov 65535   ;;  %v2594_v37 = vshll.u32 %v5248_v39, 16  ;;  %v2587_v58 = vrot.slane %v2585_v43, 4 }
 0x17f   : > { %v3244_v7 = vpack.c.b16 %v3225_v29, %v3224_v34  ;;  %v596_v62 = vpack.c.bf16 %v564_v63, %v564_v63  ;;  %v3945_v35 = vsel %vm3943_vm11, 4294967295, %v4548_v32  ;;  %v2590_v52 = vrot.slane %v2588_v26, 5  ;;  %v2707_v32 = vld [vmem:[#allocation2 + $0x3c] sm:$0xe] }
 0x180   : > { %v3324_v48 = vpack.c.b16 %v3305_v3, %v3304_v36  ;;  %v3946_v54 = vsel %vm3944_vm12, %v3945_v35, 0  ;;  %v2596_v23 = vrot.slane %v2594_v37, 5  ;;  %v2598_v38 = vshrl.u32 %v5248_v39, 16  ;;  %v5365_v36 = vpop.permute.xlu0 %3330  ;;  %v5371_v3 = vpop.permute.xlu1 %3188 }
 0x181   : > { %3272 = vrot.lane.b32.xlu0 %v3244_v7, %s4545_s8  ;;  %v751_v51 = vshrl.u32 %v596_v62, 16  ;;  %v754_v16 = vshll.u32 %v596_v62, 16  ;;  %v3948_v56 = vand.u32 %v4431_v27, %v3946_v54  ;;  %v2591_v61 = vor.u32 %v2590_v52, %v2587_v58  ;;  %v4489_v58 = vld [vmem:[#allocation2 + $0x3c] sm:$0xff] }
 0x182   : > { %3352 = vrot.lane.b32.xlu1 %v3324_v48, %s4543_s6  ;;  %v2604_v10 = vshll.u32 %v5250_v50, 16  ;;  %v4189_v15 = vrot.slane %v1489_v0, 9  ;;  %v993_v18 = vld [vmem:[#allocation2 + $0x6c] sm:$0xf]  ;;  %v1588_v60 = vrot.slane %v5351_v41, 5  ;;  %v1591_v19 = vrot.slane %v5345_v40, 5 }
 0x183   : > { %v5358_v34 = vrot.slane %v751_v51, 7  ;;  %3956 = vmatpush.bf16.msra.mxu1 %v3948_v56  ;;  %v322_v39 = vsel %vm4643_vm7, 0, %v321_v22  ;;  %4503 = vmatpush.bf16.msra.mxu2 %v3948_v56  ;;  %v2592_v50 = vrot.slane %v2591_v61, 4  ;;  %v2600_v57 = vrot.slane %v2598_v38, 4  ;;  %v5379_v0 = vld [vmem:[#allocation2 + $0x40] sm:$0xf] }
 0x184   : > { %v2606_v24 = vrot.slane %v2604_v10, 5  ;;  %323 = vst [vmem:[#allocation2 + $0x74] sm:$0x1] %v322_v39  ;;  %v511_v45 = vadd.f32 %v5234_v14, %v510_v4  ;;  %v1589_v47 = vsel %vm4660_vm10, %v4189_v15, %v1588_v60  ;;  %v1590_v63 = vrot.slane %v1588_v60, 4  ;;  %v5384_v51 = vld [vmem:[#allocation2 + $0x44] sm:$0x1] }
 0x185   : > { %v756_v27 = vor.u32 %v754_v16, %v5358_v34  ;;  %v757_v29 = vrot.slane %v5358_v34, 4  ;;  %v2597_v43 = vsel %vm4671_vm13, %v2592_v50, %v2596_v23  ;;  %v2601_v26 = vor.u32 %v2600_v57, %v2596_v23  ;;  %v1075_v23 = vld [vmem:[#allocation2 + $0x9c] sm:$0xf]  ;;  %v5390_v15 = vld [vmem:[#allocation2 + $0xa0] sm:$0xf] }
 0x186   : > { %v3034_v7 = vunpack.c.l.b16 %v1589_v47  ;;  %v565_v62 = vmax.f32 %v511_v45, 0.0  ;;  %v3478_v35 = vunpack.c.l.b16 %v2597_v43  ;;  %v1592_v37 = vsel %vm4660_vm10, %v1590_v63, %v1591_v19  ;;  %v5399_v50 = vld [vmem:[#allocation2 + $0xa4] sm:$0x1] }
 0x187   : > { %v994_v14 = vsel %vm4701_vm14, %v756_v27, %v993_v18  ;;  %3957 = vmatpush.bf16.msra.mxu1 %v4452_v17  ;;  %4504 = vmatpush.bf16.msra.mxu2 %v4452_v17  ;;  %v2602_v48 = vrot.slane %v2601_v26, 4  ;;  %v3035_v54 = vunpack.c.l.b16 %v1592_v37  ;;  %v3832_v22 = vsel %vm3830_vm15, %v5269_v13, %v5244_v31  ;;  %v4465_v43 = vld [vmem:[#allocation2 + $0x84] sm:$0xff] }
 0x188   : > { %995 = vst [vmem:[#allocation2 + $0x6c] sm:$0xf] %v994_v14  ;;  %v597_v52 = vpack.c.bf16 %v565_v62, %v565_v62  ;;  %vm3863_vm11 = vcmask 195584   ;;  %vm3910_vm12 = vcmask 220160   ;;  %v4219_v16 = vrot.slane %v2707_v32, 9  ;;  %v5407_v14 = vpop.permute.xlu0 %3094 }
 0x189   : > { %v2791_v56 = vrot.slane %v5379_v0, 5  ;;  %v2607_v4 = vsel %vm4671_vm13, %v2602_v48, %v2606_v24  ;;  %v3061_v61 = vpack.c.b16 %v3035_v54, %v3034_v7  ;;  %v3865_v31 = vsel %vm3863_vm11, %v3832_v22, %v5329_v20  ;;  %v5401_v24 = vpop.permute.xlu2 %3268 }
 0x18a   : > { %3430 = vrot.lane.b32.xlu1 %v4489_v58, %s4544_s7  ;;  %v759_v38 = vshrl.u32 %v597_v52, 16  ;;  %v762_v10 = vshll.u32 %v597_v52, 16  ;;  %v3479_v17 = vunpack.c.l.b16 %v2607_v4  ;;  %4432 = vmatmul.msk.bf16.vlgmr.msra.gmra.mxu1 %vm3910_vm12, %v3865_v31  ;;  %v2794_v19 = vrot.slane %v5384_v51, 5  ;;  %v1059_v58 = vld [vmem:[#allocation2 + $0x3c] sm:$0xf]  ;;  %v5410_v52 = vpop.permute.xlu1 %2996 }
 0x18b   : > { %v2792_v13 = vsel %vm4660_vm10, %v4219_v16, %v2791_v56  ;;  %v2793_v18 = vrot.slane %v2791_v56, 4  ;;  %3082 = vrot.lane.b32.xlu0 %v3061_v61, %s4540_s26  ;;  %v1413_v57 = vshrl.u32 %v1075_v23, 16  ;;  %v997_v27 = vld [vmem:[#allocation2 + $0x74] sm:$0x1]  ;;  %v1416_v20 = vshll.u32 %v1075_v23, 16 }
 0x18c   : > { %v761_v60 = vrot.slane %v759_v38, 7  ;;  %v3542_v39 = vunpack.c.l.b16 %v2792_v13  ;;  %v3499_v45 = vpack.c.b16 %v3479_v17, %v3478_v35  ;;  %v1422_v47 = vshll.u32 %v5390_v15, 16 }
 0x18d   : > { %v1426_v63 = vshrl.u32 %v5390_v15, 16  ;;  %v2795_v62 = vsel %vm4660_vm10, %v2793_v18, %v2794_v19  ;;  %v1415_v32 = vrot.slane %v1413_v57, 4  ;;  %v1418_v48 = vrot.slane %v1416_v20, 5 }
 0x18e   : > { %v764_v26 = vor.u32 %v762_v10, %v761_v60  ;;  %v766_v7 = vrot.slane %v761_v60, 4  ;;  %3526 = vrot.lane.b32.xlu2 %v3499_v45, %s4547_s10  ;;  %v3543_v37 = vunpack.c.l.b16 %v2795_v62  ;;  %v1424_v35 = vrot.slane %v1422_v47, 5  ;;  %v2296_v10 = vld [vmem:[#allocation2 + $0xa8] sm:$0xf]  ;;  %v2297_v45 = vld [vmem:[#allocation2 + $0xac] sm:$0xf] }
 0x18f   : > { %v1428_v54 = vrot.slane %v1426_v63, 4  ;;  %v5414_v22 = vsel %vm3616_vm1, %v4465_v43, %v5311_v30  ;;  %v1432_v23 = vshll.u32 %v5399_v50, 16  ;;  %v1419_v61 = vor.u32 %v1418_v48, %v1415_v32  ;;  %v2716_v62 = vld [vmem:[#allocation2 + $0xa8] sm:$0xe] }
 0x190   : > { %v765_v16 = vsel %vm4715_vm0, %v757_v29, %v764_v26  ;;  %v998_v56 = vsel %vm4620_vm4, %v766_v7, %v997_v27  ;;  %v3571_v4 = vpack.c.b16 %v3543_v37, %v3542_v39  ;;  %v5427_v30 = vsel %vm3731_vm6, %v5319_v2, %v5288_v53  ;;  %v2316_v7 = vld [vmem:[#allocation2 + $0xb0] sm:$0x1] }
 0x191   : > { %996 = vst.msk [vmem:[#allocation2 + $0x70] sm:$0xf] %vm226_vm5, %v765_v16  ;;  %v1429_v38 = vor.u32 %v1428_v54, %v1424_v35  ;;  %v1434_v34 = vrot.slane %v1432_v23, 5  ;;  %v3687_v29 = vsel %vm3665_vm2, %v5335_v9, %v5114_v59  ;;  %v1221_v17 = vshrl.u32 %v1059_v58, 16  ;;  %v4498_v59 = vld [vmem:[#allocation2 + $0xa8] sm:$0xff]  ;;  %v5444_v32 = vpop.permute.xlu2 %3506 }
 0x192   : > { %999 = vst [vmem:[#allocation2 + $0x74] sm:$0x1] %v998_v56  ;;  %v1224_v31 = vshll.u32 %v1059_v58, 16  ;;  %v1420_v13 = vrot.slane %v1419_v61, 4  ;;  %v5434_v60 = vsel %vm3698_vm3, %v3687_v29, %v5371_v3  ;;  %v1230_v19 = vshll.u32 %v5351_v41, 16  ;;  %v5447_v56 = vpop.permute.xlu0 %3602 }
 0x193   : > { %v1430_v18 = vrot.slane %v1429_v38, 4  ;;  %3590 = vrot.lane.b32.xlu0 %v3571_v4, %s4546_s9  ;;  %v1223_v53 = vrot.slane %v1221_v17, 4  ;;  %v1234_v39 = vshrl.u32 %v5351_v41, 16  ;;  %v1240_v57 = vshll.u32 %v5345_v40, 16 }
 0x194   : > { %v1226_v2 = vrot.slane %v1224_v31, 5  ;;  %v1425_v9 = vsel %vm4671_vm13, %v1420_v13, %v1424_v35  ;;  %v1232_v3 = vrot.slane %v1230_v19, 5  ;;  %v2609_v20 = vshrl.u32 %v2296_v10, 16 }
 0x195   : > { %v1435_v27 = vsel %vm4671_vm13, %v1430_v18, %v1434_v34  ;;  %v2970_v47 = vunpack.c.l.b16 %v1425_v9  ;;  %v1236_v26 = vrot.slane %v1234_v39, 4  ;;  %v1242_v40 = vrot.slane %v1240_v57, 5  ;;  %v5449_v34 = vpop.permute.xlu1 %3426 }
 0x196   : > { %v2971_v63 = vunpack.c.l.b16 %v1435_v27  ;;  %v1227_v43 = vor.u32 %v1226_v2, %v1223_v53  ;;  %3448 = vrot.lane.b32.xlu2 %v4498_v59, %s4544_s7  ;;  %v2611_v41 = vrot.slane %v2609_v20, 4  ;;  %v2612_v37 = vshll.u32 %v2296_v10, 16  ;;  %v2278_v2 = vld [vmem:[#allocation2 + $0x3c] sm:$0xf] }
 0x197   : > { %v2618_v48 = vshll.u32 %v2297_v45, 16  ;;  %v1237_v58 = vor.u32 %v1236_v26, %v1232_v3  ;;  %v2622_v16 = vshrl.u32 %v2297_v45, 16  ;;  %v2628_v61 = vshll.u32 %v2316_v7, 16 }
 0x198   : > { %v2989_v35 = vpack.c.b16 %v2971_v63, %v2970_v47  ;;  %v1228_v54 = vrot.slane %v1227_v43, 4  ;;  %v2614_v23 = vrot.slane %v2612_v37, 5  ;;  %v4228_v38 = vrot.slane %v2716_v62, 9  ;;  %v1061_v37 = vld [vmem:[#allocation2 + $0x48] sm:$0xf] }
 0x199   : > { %v2620_v4 = vrot.slane %v2618_v48, 5  ;;  %v1238_v17 = vrot.slane %v1237_v58, 4  ;;  %v2624_v10 = vrot.slane %v2622_v16, 4  ;;  %v2854_v31 = vrot.slane %v2297_v45, 5 }
 0x19a   : > { %3018 = vrot.lane.b32.xlu1 %v2989_v35, %s4541_s29  ;;  %v1233_v29 = vsel %vm4671_vm13, %v1228_v54, %v1232_v3  ;;  %v2615_v18 = vor.u32 %v2614_v23, %v2611_v41  ;;  %v2630_v19 = vrot.slane %v2628_v61, 5  ;;  %v2857_v53 = vrot.slane %v2316_v7, 5  ;;  %v5475_v35 = vpop.permute.xlu2 %3252 }
 0x19b   : > { %v2954_v13 = vunpack.c.l.b16 %v1233_v29  ;;  %v1243_v39 = vsel %vm4671_vm13, %v1238_v17, %v1242_v40  ;;  %v2625_v57 = vor.u32 %v2624_v10, %v2620_v4  ;;  %v2855_v59 = vsel %vm4660_vm10, %v4228_v38, %v2854_v31  ;;  %v1087_v38 = vld [vmem:[#allocation2 + $0x50] sm:$0x1]  ;;  %v5480_v10 = vpop.permute.xlu0 %3348 }
 0x19c   : > { %v2856_v9 = vrot.slane %v2854_v31, 4  ;;  %v2955_v27 = vunpack.c.l.b16 %v1243_v39  ;;  %v2616_v20 = vrot.slane %v2615_v18, 4  ;;  %v3560_v47 = vunpack.c.l.b16 %v2855_v59 }
 0x19d   : > { %v5461_v45 = vsel %vm3665_vm2, %v5414_v22, %v5407_v14  ;;  %v5466_v3 = vsel %vm3764_vm8, %v5427_v30, %v5365_v36  ;;  %v2626_v63 = vrot.slane %v2625_v57, 4  ;;  %v2393_v26 = vshrl.u32 %v2278_v2, 16  ;;  %v1062_v30 = vld [vmem:[#allocation2 + $0x4c] sm:$0xf] }
 0x19e   : > { %v2858_v43 = vsel %vm4660_vm10, %v2856_v9, %v2857_v53  ;;  %v2981_v7 = vpack.c.b16 %v2955_v27, %v2954_v13  ;;  %v2621_v62 = vsel %vm4671_vm13, %v2616_v20, %v2620_v4  ;;  %v2396_v41 = vshll.u32 %v2278_v2, 16  ;;  %v1490_v53 = vld [vmem:[#allocation2 + $0x48] sm:$0xe]  ;;  %v5483_v2 = vpop.permute.xlu1 %3172 }
 0x19f   : > { %v3561_v40 = vunpack.c.l.b16 %v2858_v43  ;;  %v2631_v14 = vsel %vm4671_vm13, %v2626_v63, %v2630_v19  ;;  %v3480_v22 = vunpack.c.l.b16 %v2621_v62  ;;  %v2395_v48 = vrot.slane %v2393_v26, 4 }
 0x1a0   : > { %v2402_v36 = vshll.u32 %v5379_v0, 16  ;;  %3002 = vrot.lane.b32.xlu2 %v2981_v7, %s4541_s29  ;;  %v3481_v54 = vunpack.c.l.b16 %v2631_v14  ;;  %v2398_v16 = vrot.slane %v2396_v41, 5  ;;  %v2406_v23 = vshrl.u32 %v5379_v0, 16  ;;  %v4456_v7 = vld [vmem:[#allocation2 + $0x18] sm:$0xff]  ;;  %v1077_v14 = vld [vmem:[#allocation2 + $0xa8] sm:$0xf] }
 0x1a1   : > { %v3580_v58 = vpack.c.b16 %v3561_v40, %v3560_v47  ;;  %v2412_v61 = vshll.u32 %v5384_v51, 16  ;;  %v1245_v29 = vshrl.u32 %v1061_v37, 16  ;;  %v1248_v17 = vshll.u32 %v1061_v37, 16 }
 0x1a2   : > { %v2404_v4 = vrot.slane %v2402_v36, 5  ;;  %v3500_v31 = vpack.c.b16 %v3481_v54, %v3480_v22  ;;  %v2399_v13 = vor.u32 %v2398_v16, %v2395_v48  ;;  %v2408_v18 = vrot.slane %v2406_v23, 4 }
 0x1a3   : > { %3608 = vrot.lane.b32.xlu1 %v3580_v58, %s4546_s9  ;;  %v1254_v19 = vshll.u32 %v1062_v30, 16  ;;  %v2414_v39 = vrot.slane %v2412_v61, 5  ;;  %v1247_v57 = vrot.slane %v1245_v29, 4  ;;  %v1250_v0 = vrot.slane %v1248_v17, 5  ;;  %v5490_v58 = vld [vmem:[#allocation2 + $0xac] sm:$0xf] }
 0x1a4   : > { %v1258_v59 = vshrl.u32 %v1062_v30, 16  ;;  %3528 = vrot.lane.b32.xlu0 %v3500_v31, %s4547_s10  ;;  %v2400_v51 = vrot.slane %v2399_v13, 4  ;;  %v2409_v9 = vor.u32 %v2408_v18, %v2404_v4  ;;  %v1264_v20 = vshll.u32 %v1087_v38, 16  ;;  %v5500_v31 = vpop.permute.xlu2 %3524 }
 0x1a5   : > { %v1256_v27 = vrot.slane %v1254_v19, 5  ;;  %v1251_v47 = vor.u32 %v1250_v0, %v1247_v57  ;;  %v4190_v43 = vrot.slane %v1490_v53, 9  ;;  %v1595_v26 = vrot.slane %v1062_v30, 5  ;;  %v5504_v19 = vld [vmem:[#allocation2 + $0xb0] sm:$0x1]  ;;  %v5507_v57 = vpop.permute.xlu0 %3586 }
 0x1a6   : > { %v1260_v63 = vrot.slane %v1258_v59, 4  ;;  %v2405_v62 = vsel %vm4671_vm13, %v2400_v51, %v2404_v4  ;;  %v2410_v40 = vrot.slane %v2409_v9, 4  ;;  %v1266_v41 = vrot.slane %v1264_v20, 5  ;;  %v5511_v20 = vpop.permute.xlu1 %3444 }
 0x1a7   : > { %v1598_v37 = vrot.slane %v1087_v38, 5  ;;  %v3462_v22 = vunpack.c.l.b16 %v2405_v62  ;;  %v1252_v48 = vrot.slane %v1251_v47, 4  ;;  %v1596_v54 = vsel %vm4660_vm10, %v4190_v43, %v1595_v26 }
 0x1a8   : > { %v1261_v36 = vor.u32 %v1260_v63, %v1256_v27  ;;  %v5494_v16 = vsel %vm3616_vm1, %v4456_v7, %v5410_v52  ;;  %v2415_v30 = vsel %vm4671_vm13, %v2410_v40, %v2414_v39  ;;  %v1597_v23 = vrot.slane %v1595_v26, 4  ;;  %v1079_v39 = vld [vmem:[#allocation2 + $0xb4] sm:$0xf]  ;;  %v1096_v40 = vld [vmem:[#allocation2 + $0xbc] sm:$0x1] }
 0x1a9   : > { %v3036_v4 = vunpack.c.l.b16 %v1596_v54  ;;  %v3463_v61 = vunpack.c.l.b16 %v2415_v30  ;;  %v1257_v38 = vsel %vm4671_vm13, %v1252_v48, %v1256_v27  ;;  %v1437_v17 = vshrl.u32 %v1077_v14, 16  ;;  %v1080_v27 = vld [vmem:[#allocation2 + $0xb8] sm:$0xf]  ;;  %v1063_v54 = vld [vmem:[#allocation2 + $0x54] sm:$0xf] }
 0x1aa   : > { %v1262_v29 = vrot.slane %v1261_v36, 4  ;;  %v2956_v13 = vunpack.c.l.b16 %v1257_v38  ;;  %v1599_v18 = vsel %vm4660_vm10, %v1597_v23, %v1598_v37  ;;  %v1440_v52 = vshll.u32 %v1077_v14, 16 }
 0x1ab   : > { %v1446_v53 = vshll.u32 %v5490_v58, 16  ;;  %v3491_v0 = vpack.c.b16 %v3463_v61, %v3462_v22  ;;  %v3037_v51 = vunpack.c.l.b16 %v1599_v18  ;;  %v1439_v9 = vrot.slane %v1437_v17, 4 }
 0x1ac   : > { %v1267_v59 = vsel %vm4671_vm13, %v1262_v29, %v1266_v41  ;;  %v1442_v63 = vrot.slane %v1440_v52, 5  ;;  %v1450_v26 = vshrl.u32 %v5490_v58, 16  ;;  %v1456_v62 = vshll.u32 %v5504_v19, 16  ;;  %v1064_v29 = vld [vmem:[#allocation2 + $0x58] sm:$0xf] }
 0x1ad   : > { %v2957_v47 = vunpack.c.l.b16 %v1267_v59  ;;  %v1448_v43 = vrot.slane %v1446_v53, 5  ;;  %3510 = vrot.lane.b32.xlu2 %v3491_v0, %s4547_s10  ;;  %v3062_v7 = vpack.c.b16 %v3037_v51, %v3036_v4  ;;  %v1461_v37 = vshrl.u32 %v1079_v39, 16 }
 0x1ae   : > { %v1464_v14 = vshll.u32 %v1079_v39, 16  ;;  %v1443_v41 = vor.u32 %v1442_v63, %v1439_v9  ;;  %v1452_v48 = vrot.slane %v1450_v26, 4  ;;  %v1470_v36 = vshll.u32 %v1080_v27, 16 }
 0x1af   : > { %v2982_v22 = vpack.c.b16 %v2957_v47, %v2956_v13  ;;  %3084 = vrot.lane.b32.xlu1 %v3062_v7, %s4540_s26  ;;  %v1458_v30 = vrot.slane %v1456_v62, 5  ;;  %v1463_v23 = vrot.slane %v1461_v37, 4  ;;  %v1474_v38 = vshrl.u32 %v1080_v27, 16  ;;  %v1088_v47 = vld [vmem:[#allocation2 + $0x5c] sm:$0x1]  ;;  %v5520_v37 = vpop.permute.xlu2 %3270 }
 0x1b0   : > { %v1466_v61 = vrot.slane %v1464_v14, 5  ;;  %v1444_v4 = vrot.slane %v1443_v41, 4  ;;  %v1453_v17 = vor.u32 %v1452_v48, %v1448_v43  ;;  %v1472_v18 = vrot.slane %v1470_v36, 5  ;;  %v5524_v48 = vpop.permute.xlu0 %3332 }
 0x1b1   : > { %3004 = vrot.lane.b32.xlu0 %v2982_v22, %s4541_s29  ;;  %v1480_v52 = vshll.u32 %v1096_v40, 16  ;;  %v1476_v39 = vrot.slane %v1474_v38, 4  ;;  %v1269_v13 = vshrl.u32 %v1063_v54, 16  ;;  %v1272_v0 = vshll.u32 %v1063_v54, 16 }
 0x1b2   : > { %v1467_v53 = vor.u32 %v1466_v61, %v1463_v23  ;;  %v1449_v59 = vsel %vm4671_vm13, %v1444_v4, %v1448_v43  ;;  %v1454_v51 = vrot.slane %v1453_v17, 4  ;;  %v1278_v63 = vshll.u32 %v1064_v29, 16  ;;  %v5528_v61 = vpop.permute.xlu1 %3190 }
 0x1b3   : > { %v1482_v9 = vrot.slane %v1480_v52, 5  ;;  %v2972_v26 = vunpack.c.l.b16 %v1449_v59  ;;  %v1477_v7 = vor.u32 %v1476_v39, %v1472_v18  ;;  %v1271_v62 = vrot.slane %v1269_v13, 4  ;;  %v1491_v52 = vld [vmem:[#allocation2 + $0x54] sm:$0xe] }
 0x1b4   : > { %v1468_v27 = vrot.slane %v1467_v53, 4  ;;  %v1459_v40 = vsel %vm4671_vm13, %v1454_v51, %v1458_v30  ;;  %v1274_v14 = vrot.slane %v1272_v0, 5  ;;  %v1280_v22 = vrot.slane %v1278_v63, 5  ;;  %v1492_v0 = vld [vmem:[#allocation2 + $0x60] sm:$0xe] }
 0x1b5   : > { %v1282_v41 = vshrl.u32 %v1064_v29, 16  ;;  %v2973_v36 = vunpack.c.l.b16 %v1459_v40  ;;  %v1478_v54 = vrot.slane %v1477_v7, 4  ;;  %v1288_v23 = vshll.u32 %v1088_v47, 16 }
 0x1b6   : > { %v1473_v43 = vsel %vm4671_vm13, %v1468_v27, %v1472_v18  ;;  %v1275_v4 = vor.u32 %v1274_v14, %v1271_v62  ;;  %v3753_v30 = vsel %vm3731_vm6, %v5434_v60, %v5401_v24  ;;  %v3801_v53 = vsel %vm3797_vm9, %v5466_v3, %v5449_v34  ;;  %v1066_v62 = vld [vmem:[#allocation2 + $0x64] sm:$0xf] }
 0x1b7   : > { %v2974_v38 = vunpack.c.l.b16 %v1473_v43  ;;  %v1284_v17 = vrot.slane %v1282_v41, 4  ;;  %v2990_v39 = vpack.c.b16 %v2973_v36, %v2972_v26  ;;  %v1483_v18 = vsel %vm4671_vm13, %v1478_v54, %v1482_v9  ;;  %v5544_v26 = vld [vmem:[#allocation2 + $0x68] sm:$0x1]  ;;  %v1065_v54 = vld [vmem:[#allocation2 + $0x60] sm:$0xf] }
 0x1b8   : > { %v3786_v13 = vsel %vm3764_vm8, %v3753_v30, %v5480_v10  ;;  %v2975_v59 = vunpack.c.l.b16 %v1483_v18  ;;  %v1276_v51 = vrot.slane %v1275_v4, 4  ;;  %v1290_v27 = vrot.slane %v1288_v23, 5 }
 0x1b9   : > { %v1285_v63 = vor.u32 %v1284_v17, %v1280_v22  ;;  %3020 = vrot.lane.b32.xlu2 %v2990_v39, %s4541_s29  ;;  %v3671_v24 = vsel %vm3665_vm2, %v5494_v16, %v5297_v5  ;;  %v4191_v60 = vrot.slane %v1491_v52, 9  ;;  %v1602_v34 = vrot.slane %v1064_v29, 5  ;;  %v5562_v17 = vpop.permute.xlu2 %3192 }
 0x1ba   : > { %v1605_v3 = vrot.slane %v1088_v47, 5  ;;  %v2991_v9 = vpack.c.b16 %v2975_v59, %v2974_v38  ;;  %v1281_v10 = vsel %vm4671_vm13, %v1276_v51, %v1280_v22  ;;  %v4192_v40 = vrot.slane %v1492_v0, 9  ;;  %v2103_v0 = vld [vmem:[#allocation2 + $0x6c] sm:$0xe]  ;;  %v5566_v59 = vpop.permute.xlu0 %3604 }
 0x1bb   : > { %v1286_v7 = vrot.slane %v1285_v63, 4  ;;  %v2958_v14 = vunpack.c.l.b16 %v1281_v10  ;;  %v1603_v41 = vsel %vm4660_vm10, %v4191_v60, %v1602_v34  ;;  %v1604_v36 = vrot.slane %v1602_v34, 4  ;;  %v5574_v60 = vpop.permute.xlu1 %3078  ;;  %v1493_v10 = vld [vmem:[#allocation2 + $0x6c] sm:$0xe] }
 0x1bc   : > { %v1609_v43 = vrot.slane %v1066_v62, 5  ;;  %3022 = vrot.lane.b32.xlu0 %v2991_v9, %s4541_s29  ;;  %v3038_v16 = vunpack.c.l.b16 %v1603_v41  ;;  %v1612_v29 = vrot.slane %v5544_v26, 5  ;;  %v5556_v47 = vsel %vm3797_vm9, %v3786_v13, %v5511_v20  ;;  %v1680_v9 = vld [vmem:[#allocation2 + $0x70] sm:$0xf]  ;;  %v5579_v41 = vld [vmem:[#allocation2 + $0x74] sm:$0x1] }
 0x1bd   : > { %v1291_v5 = vsel %vm4671_vm13, %v1286_v7, %v1290_v27  ;;  %v1606_v23 = vsel %vm4660_vm10, %v1604_v36, %v1605_v3  ;;  %v3834_v39 = vsel %vm3830_vm15, %v3801_v53, %v5444_v32  ;;  %v1293_v18 = vshrl.u32 %v1065_v54, 16  ;;  %v5572_v27 = vld [vmem:[#allocation2 + $0x74] sm:$0x1] }
 0x1be   : > { %v2959_v22 = vunpack.c.l.b16 %v1291_v5  ;;  %v1610_v38 = vsel %vm4660_vm10, %v4192_v40, %v1609_v43  ;;  %v1611_v4 = vrot.slane %v1609_v43, 4  ;;  %v3039_v30 = vunpack.c.l.b16 %v1606_v23  ;;  %v5585_v23 = vld [vmem:[#allocation2 + $0x70] sm:$0xf] }
 0x1bf   : > { %v3040_v52 = vunpack.c.l.b16 %v1610_v38  ;;  %v3867_v51 = vsel %vm3863_vm11, %v3834_v39, %v5507_v57  ;;  %v1296_v63 = vshll.u32 %v1065_v54, 16  ;;  %v1295_v32 = vrot.slane %v1293_v18, 4 }
 0x1c0   : > { %v2983_v20 = vpack.c.b16 %v2959_v22, %v2958_v14  ;;  %v1613_v13 = vsel %vm4660_vm10, %v1611_v4, %v1612_v29  ;;  %v3063_v34 = vpack.c.b16 %v3039_v30, %v3038_v16  ;;  %4433 = vmatmul.msk.bf16.gmra.mxu1 %vm3910_vm12, %v3867_v51  ;;  %v1302_v53 = vshll.u32 %v1066_v62, 16 }
 0x1c1   : > { %v3041_v3 = vunpack.c.l.b16 %v1613_v13  ;;  %v1298_v7 = vrot.slane %v1296_v63, 5  ;;  %v1306_v40 = vshrl.u32 %v1066_v62, 16  ;;  %v1312_v14 = vshll.u32 %v5544_v26, 16  ;;  %v4478_v63 = vld [vmem:[#allocation2 + $0x6c] sm:$0xff] }
 0x1c2   : > { %3006 = vrot.lane.b32.xlu1 %v2983_v20, %s4541_s29  ;;  %v4208_v57 = vrot.slane %v2103_v0, 9  ;;  %3086 = vrot.lane.b32.xlu2 %v3063_v34, %s4540_s26  ;;  %v1304_v43 = vrot.slane %v1302_v53, 5  ;;  %v2217_v54 = vrot.slane %v1680_v9, 5  ;;  %v2220_v5 = vrot.slane %v5572_v27, 5 }
 0x1c3   : > { %v3064_v36 = vpack.c.b16 %v3041_v3, %v3040_v52  ;;  %v3704_v16 = vsel %vm3698_vm3, %v3671_v24, %v5483_v2  ;;  %v1299_v29 = vor.u32 %v1298_v7, %v1295_v32  ;;  %v1308_v22 = vrot.slane %v1306_v40, 4  ;;  %v1679_v2 = vld [vmem:[#allocation2 + $0x6c] sm:$0xf] }
 0x1c4   : > { %v4193_v62 = vrot.slane %v1493_v10, 9  ;;  %v2218_v26 = vsel %vm4660_vm10, %v4208_v57, %v2217_v54  ;;  %v2219_v38 = vrot.slane %v2217_v54, 4  ;;  %v1616_v4 = vrot.slane %v5585_v23, 5  ;;  %v5602_v10 = vpop.permute.xlu2 %3080  ;;  %v1067_v57 = vld [vmem:[#allocation2 + $0x6c] sm:$0xf] }
 0x1c5   : > { %3088 = vrot.lane.b32.xlu0 %v3064_v36, %s4540_s26  ;;  %v1619_v30 = vrot.slane %v5579_v41, 5  ;;  %v1300_v52 = vrot.slane %v1299_v29, 4  ;;  %v1309_v39 = vor.u32 %v1308_v22, %v1304_v43  ;;  %v1314_v18 = vrot.slane %v1312_v14, 5  ;;  %v5611_v36 = vpop.permute.xlu0 %3350  ;;  %v5616_v29 = vpop.permute.xlu1 %2998 }
 0x1c6   : > { %v3296_v0 = vunpack.c.l.b16 %v2218_v26  ;;  %v2221_v24 = vsel %vm4660_vm10, %v2219_v38, %v2220_v5  ;;  %v1617_v20 = vsel %vm4660_vm10, %v4193_v62, %v1616_v4  ;;  %v1618_v13 = vrot.slane %v1616_v4, 4 }
 0x1c7   : > { %v5598_v51 = vsel %vm3731_vm6, %v3704_v16, %v5475_v35  ;;  %v1305_v34 = vsel %vm4671_vm13, %v1300_v52, %v1304_v43  ;;  %v1310_v3 = vrot.slane %v1309_v39, 4  ;;  %v3297_v32 = vunpack.c.l.b16 %v2221_v24 }
 0x1c8   : > { %v3042_v53 = vunpack.c.l.b16 %v1617_v20  ;;  %v2960_v7 = vunpack.c.l.b16 %v1305_v34  ;;  %v1620_v40 = vsel %vm4660_vm10, %v1618_v13, %v1619_v30  ;;  %v5609_v14 = vsel %vm3698_vm3, %v5461_v45, %v5528_v61  ;;  %v1672_v34 = vld [vmem:[#allocation2 + $0x40] sm:$0xf] }
 0x1c9   : > { %v1904_v35 = vshrl.u32 %v1679_v2, 16  ;;  %v1315_v43 = vsel %vm4671_vm13, %v1310_v3, %v1314_v18  ;;  %v3320_v54 = vpack.c.b16 %v3297_v32, %v3296_v0  ;;  %v3043_v5 = vunpack.c.l.b16 %v1620_v40  ;;  %v2099_v0 = vld [vmem:[#allocation2 + $0x3c] sm:$0xe] }
 0x1ca   : > { %3184 = vrot.lane.b32.xlu1 %v4478_v63, %s4542_s30  ;;  %v1907_v16 = vshll.u32 %v1679_v2, 16  ;;  %v2961_v22 = vunpack.c.l.b16 %v1315_v43  ;;  %v1913_v26 = vshll.u32 %v1680_v9, 16  ;;  %v1917_v38 = vshrl.u32 %v1680_v9, 16 }
 0x1cb   : > { %v1906_v62 = vrot.slane %v1904_v35, 4  ;;  %v3065_v45 = vpack.c.b16 %v3043_v5, %v3042_v53  ;;  %v1923_v4 = vshll.u32 %v5572_v27, 16  ;;  %v1317_v30 = vshrl.u32 %v1067_v57, 16  ;;  %v1699_v53 = vld [vmem:[#allocation2 + $0x44] sm:$0x1] }
 0x1cc   : > { %v1909_v61 = vrot.slane %v1907_v16, 5  ;;  %v2984_v52 = vpack.c.b16 %v2961_v22, %v2960_v7  ;;  %v1915_v39 = vrot.slane %v1913_v26, 5  ;;  %v1919_v24 = vrot.slane %v1917_v38, 4  ;;  %v1671_v22 = vld [vmem:[#allocation2 + $0x3c] sm:$0xf]  ;;  %v5629_v38 = vpop.permute.xlu2 %3000 }
 0x1cd   : > { %3344 = vrot.lane.b32.xlu0 %v3320_v54, %s4543_s6  ;;  %v1320_v18 = vshll.u32 %v1067_v57, 16  ;;  %v1925_v2 = vrot.slane %v1923_v4, 5  ;;  %v1319_v13 = vrot.slane %v1317_v30, 4  ;;  %v1326_v63 = vshll.u32 %v5585_v23, 16 }
 0x1ce   : > { %v1910_v20 = vor.u32 %v1909_v61, %v1906_v62  ;;  %3008 = vrot.lane.b32.xlu2 %v2984_v52, %s4541_s29  ;;  %v1920_v9 = vor.u32 %v1919_v24, %v1915_v39  ;;  %v1330_v27 = vshrl.u32 %v5585_v23, 16  ;;  %v1336_v32 = vshll.u32 %v5579_v41, 16  ;;  %v5633_v24 = vpop.permute.xlu0 %3016 }
 0x1cf   : > { %v1322_v3 = vrot.slane %v1320_v18, 5  ;;  %v1328_v40 = vrot.slane %v1326_v63, 5  ;;  %v4204_v35 = vrot.slane %v2099_v0, 9  ;;  %v2189_v57 = vrot.slane %v1672_v34, 5 }
 0x1d0   : > { %v1911_v7 = vrot.slane %v1910_v20, 4  ;;  %v1921_v43 = vrot.slane %v1920_v9, 4  ;;  %v1332_v5 = vrot.slane %v1330_v27, 4  ;;  %v1338_v16 = vrot.slane %v1336_v32, 5  ;;  %v5637_v20 = vpop.permute.xlu1 %3096 }
 0x1d1   : > { %v1323_v54 = vor.u32 %v1322_v3, %v1319_v13  ;;  %v2190_v23 = vsel %vm4660_vm10, %v4204_v35, %v2189_v57  ;;  %v2191_v26 = vrot.slane %v2189_v57, 4  ;;  %v2192_v41 = vrot.slane %v1699_v53, 5  ;;  %v2308_v57 = vld [vmem:[#allocation2 + $0x50] sm:$0x1] }
 0x1d2   : > { %3090 = vrot.lane.b32.xlu1 %v3065_v45, %s4540_s26  ;;  %v1916_v62 = vsel %vm4671_vm13, %v1911_v7, %v1915_v39  ;;  %v1926_v61 = vsel %vm4671_vm13, %v1921_v43, %v1925_v2  ;;  %v1333_v52 = vor.u32 %v1332_v5, %v1328_v40  ;;  %v3288_v39 = vunpack.c.l.b16 %v2190_v23  ;;  %v2708_v2 = vld [vmem:[#allocation2 + $0x48] sm:$0xe] }
 0x1d3   : > { %v3216_v4 = vunpack.c.l.b16 %v1916_v62  ;;  %v1324_v30 = vrot.slane %v1323_v54, 4  ;;  %v3217_v18 = vunpack.c.l.b16 %v1926_v61  ;;  %v2193_v45 = vsel %vm4660_vm10, %v2191_v26, %v2192_v41  ;;  %v2281_v41 = vld [vmem:[#allocation2 + $0x4c] sm:$0xf] }
 0x1d4   : > { %v1808_v0 = vshrl.u32 %v1671_v22, 16  ;;  %v1334_v63 = vrot.slane %v1333_v52, 4  ;;  %v3289_v9 = vunpack.c.l.b16 %v2193_v45  ;;  %v1811_v3 = vshll.u32 %v1671_v22, 16 }
 0x1d5   : > { %v1329_v13 = vsel %vm4671_vm13, %v1324_v30, %v1328_v40  ;;  %v3240_v27 = vpack.c.b16 %v3217_v18, %v3216_v4  ;;  %v1817_v35 = vshll.u32 %v1672_v34, 16  ;;  %v1821_v62 = vshrl.u32 %v1672_v34, 16  ;;  %v2280_v18 = vld [vmem:[#allocation2 + $0x48] sm:$0xf] }
 0x1d6   : > { %v2962_v32 = vunpack.c.l.b16 %v1329_v13  ;;  %v1810_v7 = vrot.slane %v1808_v0, 4  ;;  %v1339_v43 = vsel %vm4671_vm13, %v1334_v63, %v1338_v16  ;;  %v3316_v54 = vpack.c.b16 %v3289_v9, %v3288_v39  ;;  %v4457_v39 = vld [vmem:[#allocation2 + $0x24] sm:$0xff] }
 0x1d7   : > { %v1813_v5 = vrot.slane %v1811_v3, 5  ;;  %3264 = vrot.lane.b32.xlu2 %v3240_v27, %s4545_s8  ;;  %v2963_v23 = vunpack.c.l.b16 %v1339_v43  ;;  %v1819_v26 = vrot.slane %v1817_v35, 5  ;;  %v1827_v40 = vshll.u32 %v1699_v53, 16  ;;  %v1689_v35 = vld [vmem:[#allocation2 + $0xa8] sm:$0xf]  ;;  %v5670_v43 = vpop.permute.xlu0 %3588 }
 0x1d8   : > { %v4220_v61 = vrot.slane %v2708_v2, 9  ;;  %v1823_v30 = vrot.slane %v1821_v62, 4  ;;  %v2798_v4 = vrot.slane %v2281_v41, 5  ;;  %v2801_v52 = vrot.slane %v2308_v57, 5 }
 0x1d9   : > { %v1814_v22 = vor.u32 %v1813_v5, %v1810_v7  ;;  %v5647_v45 = vsel %vm3764_vm8, %v5598_v51, %v5524_v48  ;;  %v2985_v16 = vpack.c.b16 %v2963_v23, %v2962_v32  ;;  %v1829_v34 = vrot.slane %v1827_v40, 5  ;;  %v5672_v23 = vpop.permute.xlu1 %3428 }
 0x1da   : > { %3336 = vrot.lane.b32.xlu1 %v3316_v54, %s4543_s6  ;;  %v3755_v53 = vsel %vm3731_vm6, %v5609_v14, %v5520_v37  ;;  %v1824_v13 = vor.u32 %v1823_v30, %v1819_v26  ;;  %v2799_v63 = vsel %vm4660_vm10, %v4220_v61, %v2798_v4  ;;  %v2800_v9 = vrot.slane %v2798_v4, 4  ;;  %v5664_v37 = vpop.permute.xlu2 %3508  ;;  %v5676_v30 = vld [vmem:[#allocation2 + $0xac] sm:$0xf] }
 0x1db   : > { %v1815_v0 = vrot.slane %v1814_v22, 4  ;;  %3010 = vrot.lane.b32.xlu0 %v2985_v16, %s4541_s29  ;;  %v3544_v3 = vunpack.c.l.b16 %v2799_v63  ;;  %v5658_v48 = vsel %vm3764_vm8, %v3755_v53, %v5611_v36  ;;  %v5662_v51 = vsel %vm3616_vm1, %v4457_v39, %v5616_v29  ;;  %v4474_v36 = vld [vmem:[#allocation2 + $0x3c] sm:$0xff]  ;;  %v5679_v16 = vld [vmem:[#allocation2 + $0xb0] sm:$0x1] }
 0x1dc   : > { %v2417_v2 = vshrl.u32 %v2280_v18, 16  ;;  %v1825_v27 = vrot.slane %v1824_v13, 4  ;;  %v2802_v32 = vsel %vm4660_vm10, %v2800_v9, %v2801_v52  ;;  %v2420_v7 = vshll.u32 %v2280_v18, 16  ;;  %v286_v9 = vld [vmem:[#allocation2 + $0xc0] sm:$0x1] }
 0x1dd   : > { %v1820_v14 = vsel %vm4671_vm13, %v1815_v0, %v1819_v26  ;;  %v3545_v5 = vunpack.c.l.b16 %v2802_v32  ;;  %v2426_v29 = vshll.u32 %v2281_v41, 16  ;;  %v2430_v26 = vshrl.u32 %v2281_v41, 16 }
 0x1de   : > { %v3208_v54 = vunpack.c.l.b16 %v1820_v14  ;;  %v2419_v62 = vrot.slane %v2417_v2, 4  ;;  %v1830_v40 = vsel %vm4671_vm13, %v1825_v27, %v1829_v34  ;;  %v2422_v61 = vrot.slane %v2420_v7, 5  ;;  %v4466_v14 = vld [vmem:[#allocation2 + $0x90] sm:$0xff]  ;;  %v543_v27 = vpop.f32.mrf.mxu3 }
 0x1df   : > { %v2436_v22 = vshll.u32 %v2308_v57, 16  ;;  %3176 = vrot.lane.b32.xlu2 %v4474_v36, %s4542_s30  ;;  %v3209_v4 = vunpack.c.l.b16 %v1830_v40  ;;  %v3572_v52 = vpack.c.b16 %v3545_v5, %v3544_v3  ;;  %v2428_v18 = vrot.slane %v2426_v29, 5  ;;  %v1497_v29 = vld [vmem:[#allocation2 + $0x9c] sm:$0xe] }
 0x1e0   : > { %v2024_v53 = vshrl.u32 %v1689_v35, 16  ;;  %v2423_v39 = vor.u32 %v2422_v61, %v2419_v62  ;;  %v2432_v0 = vrot.slane %v2430_v26, 4  ;;  %v2027_v63 = vshll.u32 %v1689_v35, 16 }
 0x1e1   : > { %v2438_v13 = vrot.slane %v2436_v22, 5  ;;  %v3236_v2 = vpack.c.b16 %v3209_v4, %v3208_v54  ;;  %v2033_v57 = vshll.u32 %v5676_v30, 16  ;;  %v2037_v34 = vshrl.u32 %v5676_v30, 16  ;;  %v4490_v4 = vld [vmem:[#allocation2 + $0x48] sm:$0xff] }
 0x1e2   : > { %3592 = vrot.lane.b32.xlu1 %v3572_v52, %s4546_s9  ;;  %v2026_v41 = vrot.slane %v2024_v53, 4  ;;  %v2424_v3 = vrot.slane %v2423_v39, 4  ;;  %v2433_v32 = vor.u32 %v2432_v0, %v2428_v18  ;;  %v2029_v7 = vrot.slane %v2027_v63, 5  ;;  %v4527_v39 = vld [vmem:[%s6216_s2] ss:$0 sm:$0xff] }
 0x1e3   : > { %v2043_v36 = vshll.u32 %v5679_v16, 16  ;;  %3256 = vrot.lane.b32.xlu0 %v3236_v2, %s4545_s8  ;;  %v2035_v5 = vrot.slane %v2033_v57, 5  ;;  %v2039_v35 = vrot.slane %v2037_v34, 4  ;;  %v3655_v54 = vsel %vm3616_vm1, %v4466_v14, %v5633_v24  ;;  %v2298_v63 = vld [vmem:[#allocation2 + $0xb4] sm:$0xf]  ;;  %v5704_v34 = vpop.permute.xlu0 %3334 }
 0x1e4   : > { %v287_v62 = vsel %vm4620_vm4, 0, %v286_v9  ;;  %v2429_v40 = vsel %vm4671_vm13, %v2424_v3, %v2428_v18  ;;  %v2434_v61 = vrot.slane %v2433_v32, 4  ;;  %v2030_v26 = vor.u32 %v2029_v7, %v2026_v41  ;;  %v5699_v9 = vpop.permute.xlu2 %3254  ;;  %v5708_v32 = vpop.permute.xlu1 %3174 }
 0x1e5   : > { %v2045_v22 = vrot.slane %v2043_v36, 5  ;;  %288 = vst [vmem:[#allocation2 + $0xc0] sm:$0x1] %v287_v62  ;;  %v3464_v52 = vunpack.c.l.b16 %v2429_v40  ;;  %v2040_v53 = vor.u32 %v2039_v35, %v2035_v5  ;;  %v544_v0 = vadd.f32 %v4527_v39, %v543_v27  ;;  %v5716_v40 = vld [vmem:[#allocation2 + $0xb8] sm:$0xf] }
 0x1e6   : > { %v5697_v24 = vsel %vm3665_vm2, %v3655_v54, %v5637_v20  ;;  %v2439_v18 = vsel %vm4671_vm13, %v2434_v61, %v2438_v13  ;;  %v2031_v2 = vrot.slane %v2030_v26, 4  ;;  %v4197_v41 = vrot.slane %v1497_v29, 9  ;;  %v5718_v61 = vld [vmem:[#allocation2 + $0xbc] sm:$0x1] }
 0x1e7   : > { %v1644_v57 = vrot.slane %v5390_v15, 5  ;;  %3432 = vrot.lane.b32.xlu2 %v4490_v4, %s4544_s7  ;;  %v3465_v14 = vunpack.c.l.b16 %v2439_v18  ;;  %v2041_v27 = vrot.slane %v2040_v53, 4  ;;  %v578_v3 = vmax.f32 %v544_v0, 0.0  ;;  %v342_v53 = vld [vmem:[#allocation2 + $0xc8] sm:$0x1] }
 0x1e8   : > { %v1647_v20 = vrot.slane %v5399_v50, 5  ;;  %v2036_v7 = vsel %vm4671_vm13, %v2031_v2, %v2035_v5  ;;  %v2633_v35 = vshrl.u32 %v2298_v63, 16  ;;  %v2636_v2 = vshll.u32 %v2298_v63, 16 }
 0x1e9   : > { %v1645_v13 = vsel %vm4660_vm10, %v4197_v41, %v1644_v57  ;;  %v1646_v36 = vrot.slane %v1644_v57, 4  ;;  %v3492_v15 = vpack.c.b16 %v3465_v14, %v3464_v52  ;;  %v2046_v54 = vsel %vm4671_vm13, %v2041_v27, %v2045_v22  ;;  %v545_v22 = vpop.f32.mrf.mxu3 }
 0x1ea   : > { %v3226_v62 = vunpack.c.l.b16 %v2036_v7  ;;  %v610_v29 = vpack.c.bf16 %v578_v3, %v578_v3  ;;  %v3227_v50 = vunpack.c.l.b16 %v2046_v54  ;;  %v3050_v5 = vunpack.c.l.b16 %v1645_v13  ;;  %v2108_v3 = vld [vmem:[#allocation2 + $0xa8] sm:$0xe] }
 0x1eb   : > { %v1648_v26 = vsel %vm4660_vm10, %v1646_v36, %v1647_v20  ;;  %v2635_v4 = vrot.slane %v2633_v35, 4  ;;  %3512 = vrot.lane.b32.xlu0 %v3492_v15, %s4547_s10  ;;  %v2642_v57 = vshll.u32 %v5716_v40, 16  ;;  %v2646_v14 = vshrl.u32 %v5716_v40, 16 }
 0x1ec   : > { %v870_v0 = vshrl.u32 %v610_v29, 16  ;;  %v873_v52 = vshll.u32 %v610_v29, 16  ;;  %v3051_v18 = vunpack.c.l.b16 %v1648_v26  ;;  %v3245_v41 = vpack.c.b16 %v3227_v50, %v3226_v62  ;;  %v1042_v20 = vld [vmem:[#allocation2 + $0xc0] sm:$0xf] }
 0x1ed   : > { %v2652_v27 = vshll.u32 %v5718_v61, 16  ;;  %v2638_v36 = vrot.slane %v2636_v2, 5  ;;  %v343_v35 = vsel %vm4643_vm7, 0, %v342_v53  ;;  %v2644_v63 = vrot.slane %v2642_v57, 5  ;;  %v5737_v53 = vpop.permute.xlu2 %3526  ;;  %v4483_v57 = vld [vmem:[#allocation2 + $0xa8] sm:$0xff] }
 0x1ee   : > { %v5726_v7 = vrot.slane %v870_v0, 7  ;;  %v3069_v13 = vpack.c.b16 %v3051_v18, %v3050_v5  ;;  %3274 = vrot.lane.b32.xlu1 %v3245_v41, %s4545_s8  ;;  %v2648_v15 = vrot.slane %v2646_v14, 4  ;;  %344 = vst [vmem:[#allocation2 + $0xc8] sm:$0x1] %v343_v35  ;;  %v546_v62 = vadd.f32 %v4527_v39, %v545_v22  ;;  %v1673_v0 = vld [vmem:[#allocation2 + $0x48] sm:$0xf]  ;;  %v5741_v22 = vpop.permute.xlu0 %3606 }
 0x1ef   : > { %v2654_v54 = vrot.slane %v2652_v27, 5  ;;  %v2639_v26 = vor.u32 %v2638_v36, %v2635_v4  ;;  %v3803_v5 = vsel %vm3797_vm9, %v5647_v45, %v5672_v23  ;;  %v4213_v39 = vrot.slane %v2108_v3, 9  ;;  %v5748_v23 = vpop.permute.xlu1 %3446 }
 0x1f0   : > { %v875_v29 = vor.u32 %v873_v52, %v5726_v7  ;;  %v876_v50 = vrot.slane %v5726_v7, 4  ;;  %3098 = vrot.lane.b32.xlu2 %v3069_v13, %s4540_s26  ;;  %v2649_v18 = vor.u32 %v2648_v15, %v2644_v63  ;;  %v579_v2 = vmax.f32 %v546_v62, 0.0 }
 0x1f1   : > { %v3836_v41 = vsel %vm3830_vm15, %v3803_v5, %v5664_v37  ;;  %v2640_v4 = vrot.slane %v2639_v26, 4  ;;  %v2252_v45 = vrot.slane %v5676_v30, 5  ;;  %v2255_v37 = vrot.slane %v5679_v16, 5  ;;  %v5757_v30 = vld [vmem:[#allocation2 + $0x4c] sm:$0xf] }
 0x1f2   : > { %v1043_v52 = vsel %vm4701_vm14, %v875_v29, %v1042_v20  ;;  %v3869_v14 = vsel %vm3863_vm11, %v3836_v41, %v5670_v43  ;;  %v2650_v27 = vrot.slane %v2649_v18, 4  ;;  %v611_v7 = vpack.c.bf16 %v579_v2, %v579_v2  ;;  %v5761_v16 = vld [vmem:[#allocation2 + $0x50] sm:$0x1] }
 0x1f3   : > { %1044 = vst [vmem:[#allocation2 + $0xc0] sm:$0xf] %v1043_v52  ;;  %4434 = vmatmul.msk.bf16.gmra.mxu1 %vm3910_vm12, %v3869_v14  ;;  %v1832_v3 = vshrl.u32 %v1673_v0, 16  ;;  %3194 = vrot.lane.b32.xlu0 %v4483_v57, %s4542_s30  ;;  %v2645_v44 = vsel %vm4671_vm13, %v2640_v4, %v2644_v63  ;;  %v2253_v43 = vsel %vm4660_vm10, %v4213_v39, %v2252_v45  ;;  %v2254_v20 = vrot.slane %v2252_v45, 4 }
 0x1f4   : > { %v1835_v13 = vshll.u32 %v1673_v0, 16  ;;  %v2655_v36 = vsel %vm4671_vm13, %v2650_v27, %v2654_v54  ;;  %v3482_v35 = vunpack.c.l.b16 %v2645_v44  ;;  %v878_v15 = vshrl.u32 %v611_v7, 16  ;;  %v2282_v44 = vld [vmem:[#allocation2 + $0x54] sm:$0xf] }
 0x1f5   : > { %v881_v62 = vshll.u32 %v611_v7, 16  ;;  %v3483_v29 = vunpack.c.l.b16 %v2655_v36  ;;  %v2256_v26 = vsel %vm4660_vm10, %v2254_v20, %v2255_v37  ;;  %v3306_v63 = vunpack.c.l.b16 %v2253_v43  ;;  %v1046_v52 = vld [vmem:[#allocation2 + $0xc8] sm:$0x1]  ;;  %v2717_v7 = vld [vmem:[#allocation2 + $0xb4] sm:$0xe] }
 0x1f6   : > { %v1834_v5 = vrot.slane %v1832_v3, 4  ;;  %v880_v18 = vrot.slane %v878_v15, 7  ;;  %v3307_v2 = vunpack.c.l.b16 %v2256_v26  ;;  %v1837_v41 = vrot.slane %v1835_v13, 5  ;;  %v4499_v37 = vld [vmem:[#allocation2 + $0xb4] sm:$0xff] }
 0x1f7   : > { %v1841_v39 = vshll.u32 %v5757_v30, 16  ;;  %v3501_v0 = vpack.c.b16 %v3483_v29, %v3482_v35  ;;  %v1845_v54 = vshrl.u32 %v5757_v30, 16  ;;  %v1851_v57 = vshll.u32 %v5761_v16, 16  ;;  %v5772_v36 = vld [vmem:[#allocation2 + $0x58] sm:$0xf]  ;;  %v5774_v35 = vpop.permute.xlu2 %3448 }
 0x1f8   : > { %v883_v4 = vor.u32 %v881_v62, %v880_v18  ;;  %v885_v14 = vrot.slane %v880_v18, 4  ;;  %v3325_v45 = vpack.c.b16 %v3307_v2, %v3306_v63  ;;  %v1838_v27 = vor.u32 %v1837_v41, %v1834_v5  ;;  %v5783_v63 = vld [vmem:[#allocation2 + $0x5c] sm:$0x1]  ;;  %v3273_v5 = vpop.permute.xlu0 %3272  ;;  %v3353_v18 = vpop.permute.xlu1 %3352 }
 0x1f9   : > { %3530 = vrot.lane.b32.xlu1 %v3501_v0, %s4547_s10  ;;  %v1843_v3 = vrot.slane %v1841_v39, 5  ;;  %v1847_v43 = vrot.slane %v1845_v54, 4  ;;  %v1853_v20 = vrot.slane %v1851_v57, 5  ;;  %v3673_v13 = vsel %vm3665_vm2, %v5662_v51, %v5574_v60 }
 0x1fa   : > { %v884_v15 = vsel %vm4715_vm0, %v876_v50, %v883_v4  ;;  %v1047_v62 = vsel %vm4620_vm4, %v885_v14, %v1046_v52  ;;  %3354 = vrot.lane.b32.xlu2 %v3325_v45, %s4543_s6  ;;  %v1839_v29 = vrot.slane %v1838_v27, 4  ;;  %v3706_v26 = vsel %vm3698_vm3, %v3673_v13, %v5708_v32 }
 0x1fb   : > { %1045 = vst.msk [vmem:[#allocation2 + $0xc4] sm:$0xf] %vm226_vm5, %v884_v15  ;;  %3450 = vrot.lane.b32.xlu0 %v4499_v37, %s4544_s7  ;;  %v1848_v60 = vor.u32 %v1847_v43, %v1843_v3  ;;  %v4229_v51 = vrot.slane %v2717_v7, 9  ;;  %v2861_v6 = vrot.slane %v5716_v40, 5  ;;  %v2864_v50 = vrot.slane %v5718_v61, 5 }
 0x1fc   : > { %1048 = vst [vmem:[#allocation2 + $0xc8] sm:$0x1] %v1047_v62  ;;  %v1844_v2 = vsel %vm4671_vm13, %v1839_v29, %v1843_v3  ;;  %v2441_v41 = vshrl.u32 %v2282_v44, 16  ;;  %v2444_v32 = vshll.u32 %v2282_v44, 16  ;;  %v2450_v39 = vshll.u32 %v5772_v36, 16  ;;  %v4475_v29 = vld [vmem:[#allocation2 + $0x48] sm:$0xff] }
 0x1fd   : > { %v1849_v0 = vrot.slane %v1848_v60, 4  ;;  %v3210_v52 = vunpack.c.l.b16 %v1844_v2  ;;  %v2862_v54 = vsel %vm4660_vm10, %v4229_v51, %v2861_v6  ;;  %v2863_v57 = vrot.slane %v2861_v6, 4  ;;  %v2100_v61 = vld [vmem:[#allocation2 + $0x48] sm:$0xe]  ;;  %v2709_v6 = vld [vmem:[#allocation2 + $0x54] sm:$0xe] }
 0x1fe   : > { %v3562_v4 = vunpack.c.l.b16 %v2862_v54  ;;  %v2443_v14 = vrot.slane %v2441_v41, 4  ;;  %v2446_v40 = vrot.slane %v2444_v32, 5  ;;  %v2452_v45 = vrot.slane %v2450_v39, 5  ;;  %v1498_v54 = vld [vmem:[#allocation2 + $0xa8] sm:$0xe] }
 0x1ff   : > { %v1854_v27 = vsel %vm4671_vm13, %v1849_v0, %v1853_v20  ;;  %v2865_v7 = vsel %vm4660_vm10, %v2863_v57, %v2864_v50  ;;  %v2454_v44 = vshrl.u32 %v5772_v36, 16  ;;  %v2460_v37 = vshll.u32 %v5783_v63, 16 }
 0x200   : > { %v3211_v3 = vunpack.c.l.b16 %v1854_v27  ;;  %v3563_v43 = vunpack.c.l.b16 %v2865_v7  ;;  %v2447_v13 = vor.u32 %v2446_v40, %v2443_v14  ;;  %v5803_v15 = vsel %vm3797_vm9, %v5658_v48, %v5748_v23  ;;  %v3083_v57 = vpop.permute.xlu0 %3082  ;;  %v3431_v27 = vpop.permute.xlu1 %3430 }
 0x201   : > { %v3739_v62 = vsel %vm3731_vm6, %v3706_v26, %v5699_v9  ;;  %v2456_v20 = vrot.slane %v2454_v44, 4  ;;  %v4205_v60 = vrot.slane %v2100_v61, 9  ;;  %v2196_v51 = vrot.slane %v5757_v30, 5  ;;  %v3003_v9 = vpop.permute.xlu2 %3002  ;;  %v4459_v44 = vld [vmem:[#allocation2 + $0x3c] sm:$0xff] }
 0x202   : > { %v3237_v50 = vpack.c.b16 %v3211_v3, %v3210_v52  ;;  %v3581_v2 = vpack.c.b16 %v3563_v43, %v3562_v4  ;;  %v2448_v41 = vrot.slane %v2447_v13, 4  ;;  %v2199_v32 = vrot.slane %v5761_v16, 5 }
 0x203   : > { %3178 = vrot.lane.b32.xlu0 %v4475_v29, %s4542_s30  ;;  %v2457_v39 = vor.u32 %v2456_v20, %v2452_v45  ;;  %v2462_v0 = vrot.slane %v2460_v37, 5  ;;  %v2197_v48 = vsel %vm4660_vm10, %v4205_v60, %v2196_v51  ;;  %v2198_v23 = vrot.slane %v2196_v51, 4  ;;  %v1691_v60 = vld [vmem:[#allocation2 + $0xb4] sm:$0xf] }
 0x204   : > { %3258 = vrot.lane.b32.xlu1 %v3237_v50, %s4545_s8  ;;  %3610 = vrot.lane.b32.xlu2 %v3581_v2, %s4546_s9  ;;  %v2453_v30 = vsel %vm4671_vm13, %v2448_v41, %v2452_v45  ;;  %v3290_v26 = vunpack.c.l.b16 %v2197_v48  ;;  %v3724_v16 = vsel %vm3698_vm3, %v5697_v24, %v5562_v17  ;;  %v4221_v52 = vrot.slane %v2709_v6, 9 }
 0x205   : > { %v2458_v4 = vrot.slane %v2457_v39, 4  ;;  %v3466_v14 = vunpack.c.l.b16 %v2453_v30  ;;  %v2200_v40 = vsel %vm4660_vm10, %v2198_v23, %v2199_v32  ;;  %v3757_v61 = vsel %vm3731_vm6, %v3724_v16, %v3273_v5  ;;  %v1709_v39 = vld [vmem:[#allocation2 + $0xbc] sm:$0x1] }
 0x206   : > { %v3291_v7 = vunpack.c.l.b16 %v2200_v40  ;;  %v5823_v45 = vsel %vm3764_vm8, %v3757_v61, %v3353_v18  ;;  %v2805_v37 = vrot.slane %v5772_v36, 5  ;;  %v2808_v17 = vrot.slane %v5783_v63, 5  ;;  %v4491_v36 = vld [vmem:[#allocation2 + $0x54] sm:$0xff] }
 0x207   : > { %v2463_v24 = vsel %vm4671_vm13, %v2458_v4, %v2462_v0  ;;  %v4198_v3 = vrot.slane %v1498_v54, 9  ;;  %v1651_v43 = vrot.slane %v5490_v58, 5  ;;  %v1654_v13 = vrot.slane %v5504_v19, 5  ;;  %v1692_v58 = vld [vmem:[#allocation2 + $0xb8] sm:$0xf] }
 0x208   : > { %v3467_v29 = vunpack.c.l.b16 %v2463_v24  ;;  %v3634_v5 = vsel %vm3616_vm1, %v4459_v44, %v3003_v9  ;;  %v2806_v20 = vsel %vm4660_vm10, %v4221_v52, %v2805_v37  ;;  %v2807_v18 = vrot.slane %v2805_v37, 4  ;;  %v2109_v0 = vld [vmem:[#allocation2 + $0xb4] sm:$0xe] }
 0x209   : > { %v3317_v51 = vpack.c.b16 %v3291_v7, %v3290_v26  ;;  %v1652_v63 = vsel %vm4660_vm10, %v4198_v3, %v1651_v43  ;;  %v1653_v6 = vrot.slane %v1651_v43, 4  ;;  %v5837_v50 = vsel %vm3665_vm2, %v3634_v5, %v3083_v57  ;;  %v3511_v57 = vpop.permute.xlu2 %3510  ;;  %v2300_v7 = vld [vmem:[#allocation2 + $0xc0] sm:$0xf] }
 0x20a   : > { %v3493_v2 = vpack.c.b16 %v3467_v29, %v3466_v14  ;;  %v2809_v19 = vsel %vm4660_vm10, %v2807_v18, %v2808_v17  ;;  %v3546_v41 = vunpack.c.l.b16 %v2806_v20  ;;  %v3052_v32 = vunpack.c.l.b16 %v1652_v63 }
 0x20b   : > { %3434 = vrot.lane.b32.xlu0 %v4491_v36, %s4544_s7  ;;  %v3547_v48 = vunpack.c.l.b16 %v2809_v19  ;;  %v1655_v23 = vsel %vm4660_vm10, %v1653_v6, %v1654_v13  ;;  %v3772_v9 = vsel %vm3764_vm8, %v3739_v62, %v5704_v34  ;;  %v2048_v30 = vshrl.u32 %v1691_v60, 16  ;;  %v3591_v62 = vpop.permute.xlu0 %3590 }
 0x20c   : > { %3514 = vrot.lane.b32.xlu1 %v3493_v2, %s4547_s10  ;;  %3338 = vrot.lane.b32.xlu2 %v3317_v51, %s4543_s6  ;;  %v3053_v26 = vunpack.c.l.b16 %v1655_v23  ;;  %v2051_v16 = vshll.u32 %v1691_v60, 16  ;;  %v2057_v52 = vshll.u32 %v1692_v58, 16  ;;  %v2061_v54 = vshrl.u32 %v1692_v58, 16  ;;  %v5849_v29 = vpop.permute.xlu1 %3018  ;;  %v4484_v2 = vld [vmem:[#allocation2 + $0xb4] sm:$0xff] }
 0x20d   : > { %v3805_v4 = vsel %vm3797_vm9, %v3772_v9, %v3431_v27  ;;  %v2050_v14 = vrot.slane %v2048_v30, 4  ;;  %v2067_v40 = vshll.u32 %v1709_v39, 16  ;;  %v4214_v61 = vrot.slane %v2109_v0, 9  ;;  %v2301_v27 = vld [vmem:[#allocation2 + $0xc4] sm:$0xf] }
 0x20e   : > { %v3573_v44 = vpack.c.b16 %v3547_v48, %v3546_v41  ;;  %v2053_v37 = vrot.slane %v2051_v16, 5  ;;  %v2059_v17 = vrot.slane %v2057_v52, 5  ;;  %v2063_v34 = vrot.slane %v2061_v54, 4  ;;  %v2718_v30 = vld [vmem:[#allocation2 + $0xc0] sm:$0xe] }
 0x20f   : > { %v3070_v24 = vpack.c.b16 %v3053_v26, %v3052_v32  ;;  %v2069_v3 = vrot.slane %v2067_v40, 5  ;;  %v2259_v43 = vrot.slane %v1692_v58, 5  ;;  %v2262_v13 = vrot.slane %v1709_v39, 5  ;;  %v2318_v32 = vld [vmem:[#allocation2 + $0xc8] sm:$0x1] }
 0x210   : > { %v2054_v5 = vor.u32 %v2053_v37, %v2050_v14  ;;  %v2064_v20 = vor.u32 %v2063_v34, %v2059_v17  ;;  %v3838_v18 = vsel %vm3830_vm15, %v3805_v4, %v3511_v57  ;;  %v2657_v60 = vshrl.u32 %v2300_v7, 16  ;;  %v5868_v54 = vld [vmem:[%s6218_s4] ss:$0 sm:$0xff] }
 0x211   : > { %v2260_v51 = vsel %vm4660_vm10, %v4214_v61, %v2259_v43  ;;  %v2261_v36 = vrot.slane %v2259_v43, 4  ;;  %v3871_v63 = vsel %vm3863_vm11, %v3838_v18, %v3591_v62  ;;  %v2660_v6 = vshll.u32 %v2300_v7, 16  ;;  %v3959_v61 = vpop.f32.mrf.mxu1 }
 0x212   : > { %v2055_v19 = vrot.slane %v2054_v5, 4  ;;  %v2065_v41 = vrot.slane %v2064_v20, 4  ;;  %v3308_v58 = vunpack.c.l.b16 %v2260_v51  ;;  %4435 = vmatmul.msk.bf16.gmra.mxu1 %vm3910_vm12, %v3871_v63  ;;  %v2659_v39 = vrot.slane %v2657_v60, 4  ;;  %v1675_v60 = vld [vmem:[#allocation2 + $0x54] sm:$0xf] }
 0x213   : > { %3100 = vrot.lane.b32.xlu0 %v3070_v24, %s4540_s26  ;;  %v2263_v0 = vsel %vm4660_vm10, %v2261_v36, %v2262_v13  ;;  %v2662_v48 = vrot.slane %v2660_v6, 5  ;;  %v2666_v23 = vshll.u32 %v2301_v27, 16  ;;  %v2670_v9 = vshrl.u32 %v2301_v27, 16  ;;  %v5870_v62 = vpop.permute.xlu2 %3020 }
 0x214   : > { %3196 = vrot.lane.b32.xlu1 %v4484_v2, %s4542_s30  ;;  %3594 = vrot.lane.b32.xlu2 %v3573_v44, %s4546_s9  ;;  %v2060_v26 = vsel %vm4671_vm13, %v2055_v19, %v2059_v17  ;;  %v2070_v16 = vsel %vm4671_vm13, %v2065_v41, %v2069_v3  ;;  %v3309_v52 = vunpack.c.l.b16 %v2263_v0  ;;  %v2676_v44 = vshll.u32 %v2318_v32, 16  ;;  %v1676_v2 = vld [vmem:[#allocation2 + $0x58] sm:$0xf]  ;;  %v4500_v19 = vld [vmem:[#allocation2 + $0xc0] sm:$0xff]  ;;  %v1701_v0 = vld [vmem:[#allocation2 + $0x5c] sm:$0x1] }
 0x215   : > { %v3228_v57 = vunpack.c.l.b16 %v2060_v26  ;;  %v3229_v4 = vunpack.c.l.b16 %v2070_v16  ;;  %v2663_v14 = vor.u32 %v2662_v48, %v2659_v39  ;;  %v2668_v40 = vrot.slane %v2666_v23, 5  ;;  %v5887_v6 = vpop.permute.xlu1 %3608 }
 0x216   : > { %v3326_v7 = vpack.c.b16 %v3309_v52, %v3308_v58  ;;  %v2672_v37 = vrot.slane %v2670_v9, 4  ;;  %v4230_v34 = vrot.slane %v2718_v30, 9  ;;  %v2868_v3 = vrot.slane %v2301_v27, 5  ;;  %v3529_v18 = vpop.permute.xlu0 %3528 }
 0x217   : > { %v3246_v17 = vpack.c.b16 %v3229_v4, %v3228_v57  ;;  %v2664_v24 = vrot.slane %v2663_v14, 4  ;;  %v2871_v43 = vrot.slane %v2318_v32, 5  ;;  %v2678_v5 = vrot.slane %v2676_v44, 5 }
 0x218   : > { %v2673_v13 = vor.u32 %v2672_v37, %v2668_v40  ;;  %v3960_v20 = vadd.f32 %v5868_v54, %v3959_v61  ;;  %vm4071_vm5 = vcmask 64512   ;;  %v2869_v36 = vsel %vm4660_vm10, %v4230_v34, %v2868_v3 }
 0x219   : > { %v2669_v51 = vsel %vm4671_vm13, %v2664_v24, %v2668_v40  ;;  %v2870_v63 = vrot.slane %v2868_v3, 4  ;;  %v3823_v27 = vsel %vm3797_vm9, %v5823_v45, %v5774_v35  ;;  %v3564_v32 = vunpack.c.l.b16 %v2869_v36  ;;  %v2101_v45 = vld [vmem:[#allocation2 + $0x54] sm:$0xe] }
 0x21a   : > { %v2674_v41 = vrot.slane %v2673_v13, 4  ;;  %v3484_v58 = vunpack.c.l.b16 %v2669_v51  ;;  %v4039_v39 = vmax.f32 %v3960_v20, 0.0  ;;  %v5893_v23 = vsel %vm3830_vm15, %v3823_v27, %v3529_v18  ;;  %v1499_v3 = vld [vmem:[#allocation2 + $0xb4] sm:$0xe]  ;;  %v3961_v18 = vpop.f32.mrf.mxu1 }
 0x21b   : > { %3356 = vrot.lane.b32.xlu0 %v3326_v7, %s4543_s6  ;;  %v2872_v48 = vsel %vm4660_vm10, %v2870_v63, %v2871_v43  ;;  %v1856_v9 = vshrl.u32 %v1675_v60, 16  ;;  %v1859_v35 = vshll.u32 %v1675_v60, 16  ;;  %v1865_v16 = vshll.u32 %v1676_v2, 16 }
 0x21c   : > { %3452 = vrot.lane.b32.xlu1 %v4500_v19, %s4544_s7  ;;  %3276 = vrot.lane.b32.xlu2 %v3246_v17, %s4545_s8  ;;  %v2679_v30 = vsel %vm4671_vm13, %v2674_v41, %v2678_v5  ;;  %v3565_v26 = vunpack.c.l.b16 %v2872_v48  ;;  %4072 = vst.msk [vmem:[%s5882_s12] sm:$0xff] %vm4071_vm5, %v4039_v39  ;;  %v1869_v52 = vshrl.u32 %v1676_v2, 16  ;;  %v1875_v40 = vshll.u32 %v1701_v0, 16  ;;  %v4528_v5 = vld [vmem:[#allocation2 + $0xb8] sm:$0xf]  ;;  %v5901_v51 = vpop.permute.xlu2 %3086 }
 0x21d   : > { %v3485_v57 = vunpack.c.l.b16 %v2679_v30  ;;  %v1858_v4 = vrot.slane %v1856_v9, 4  ;;  %v1861_v14 = vrot.slane %v1859_v35, 5  ;;  %v1867_v61 = vrot.slane %v1865_v16, 5  ;;  %v4476_v19 = vld [vmem:[#allocation2 + $0x54] sm:$0xff]  ;;  %v4460_v30 = vld [vmem:[#allocation2 + $0x48] sm:$0xff] }
 0x21e   : > { %v1871_v7 = vrot.slane %v1869_v52, 4  ;;  %v4206_v37 = vrot.slane %v2101_v45, 9  ;;  %v3582_v44 = vpack.c.b16 %v3565_v26, %v3564_v32  ;;  %v2203_v24 = vrot.slane %v1676_v2, 5  ;;  %v4529_v2 = vld [vmem:[#allocation2 + $0xbc] sm:$0x1] }
 0x21f   : > { %v1862_v34 = vor.u32 %v1861_v14, %v1858_v4  ;;  %v1877_v43 = vrot.slane %v1875_v40, 5  ;;  %v2206_v13 = vrot.slane %v1701_v0, 5  ;;  %v1658_v20 = vrot.slane %v4528_v5, 5  ;;  %v2284_v16 = vld [vmem:[#allocation2 + $0x60] sm:$0xf] }
 0x220   : > { %v1872_v17 = vor.u32 %v1871_v7, %v1867_v61  ;;  %v3502_v60 = vpack.c.b16 %v3485_v57, %v3484_v58  ;;  %v2204_v63 = vsel %vm4660_vm10, %v4206_v37, %v2203_v24  ;;  %v2205_v27 = vrot.slane %v2203_v24, 4  ;;  %v2285_v4 = vld [vmem:[#allocation2 + $0x64] sm:$0xf]  ;;  %v2310_v37 = vld [vmem:[#allocation2 + $0x68] sm:$0x1] }
 0x221   : > { %v1863_v36 = vrot.slane %v1862_v34, 4  ;;  %v3292_v32 = vunpack.c.l.b16 %v2204_v63  ;;  %v4199_v39 = vrot.slane %v1499_v3, 9  ;;  %v1661_v48 = vrot.slane %v4529_v2, 5  ;;  %v3085_v26 = vpop.permute.xlu1 %3084 }
 0x222   : > { %v1873_v41 = vrot.slane %v1872_v17, 4  ;;  %v2207_v58 = vsel %vm4660_vm10, %v2205_v27, %v2206_v13  ;;  %v1660_v35 = vrot.slane %v1658_v20, 4  ;;  %v3962_v45 = vadd.f32 %v5868_v54, %v3961_v18 }
 0x223   : > { %v3005_v9 = vpop.permute.xlu0 %3004  ;;  %3612 = vrot.lane.b32.xlu0 %v3582_v44, %s4546_s9  ;;  %v1868_v0 = vsel %vm4671_vm13, %v1863_v36, %v1867_v61  ;;  %v3293_v57 = vunpack.c.l.b16 %v2207_v58  ;;  %v2710_v44 = vld [vmem:[#allocation2 + $0x60] sm:$0xe]  ;;  %v5918_v34 = vsel %vm4660_vm10, %v4199_v39, %v1658_v20  ;;  %v2465_v3 = vshrl.u32 %v2284_v16, 16  ;;  %v5927_v20 = vld [vmem:[#allocation2 + $0xc8] sm:$0x1] }
 0x224   : > { %3180 = vrot.lane.b32.xlu1 %v4476_v19, %s4542_s30  ;;  %3532 = vrot.lane.b32.xlu2 %v3502_v60, %s4547_s10  ;;  %v1878_v52 = vsel %vm4671_vm13, %v1873_v41, %v1877_v43  ;;  %v3212_v14 = vunpack.c.l.b16 %v1868_v0  ;;  %v4040_v61 = vmax.f32 %v3962_v45, 0.0  ;;  %v3637_v7 = vsel %vm3616_vm1, %v4460_v30, %v3005_v9  ;;  %v2110_v60 = vld [vmem:[#allocation2 + $0xc0] sm:$0xe] }
 0x225   : > { %v3213_v40 = vunpack.c.l.b16 %v1878_v52  ;;  %v5921_v24 = vsel %vm3665_vm2, %v3637_v7, %v3085_v26  ;;  %v2468_v17 = vshll.u32 %v2284_v16, 16  ;;  %v3318_v13 = vpack.c.b16 %v3293_v57, %v3292_v32  ;;  %v1693_v0 = vld [vmem:[#allocation2 + $0xc0] sm:$0xf] }
 0x226   : > { %v1662_v43 = vsel %vm4660_vm10, %v1660_v35, %v1661_v48  ;;  %4073 = vst.msk [vmem:[%s5882_s12 + $0x8] sm:$0xff] %vm4071_vm5, %v4040_v61  ;;  %v2474_v5 = vshll.u32 %v2285_v4, 16  ;;  %v2478_v18 = vshrl.u32 %v2285_v4, 16  ;;  %v2467_v36 = vrot.slane %v2465_v3, 4  ;;  %v4492_v32 = vld [vmem:[#allocation2 + $0x60] sm:$0xff] }
 0x227   : > { %v2470_v63 = vrot.slane %v2468_v17, 5  ;;  %v2484_v27 = vshll.u32 %v2310_v37, 16  ;;  %v4222_v19 = vrot.slane %v2710_v44, 9  ;;  %v3238_v41 = vpack.c.b16 %v3213_v40, %v3212_v14  ;;  %v1694_v35 = vld [vmem:[#allocation2 + $0xc4] sm:$0xf] }
 0x228   : > { %v2476_v39 = vrot.slane %v2474_v5, 5  ;;  %v2480_v2 = vrot.slane %v2478_v18, 4  ;;  %v2812_v9 = vrot.slane %v2285_v4, 5  ;;  %v2815_v48 = vrot.slane %v2310_v37, 5  ;;  %v3009_v26 = vpop.permute.xlu2 %3008 }
 0x229   : > { %v2471_v58 = vor.u32 %v2470_v63, %v2467_v36  ;;  %v2486_v45 = vrot.slane %v2484_v27, 5  ;;  %v4215_v30 = vrot.slane %v2110_v60, 9  ;;  %v2266_v61 = vrot.slane %v1694_v35, 5  ;;  %v345_v36 = vld [vmem:[#allocation2 + $0xd4] sm:$0x1] }
 0x22a   : > { %v2481_v16 = vor.u32 %v2480_v2, %v2476_v39  ;;  %v2813_v52 = vsel %vm4660_vm10, %v4222_v19, %v2812_v9  ;;  %v2814_v57 = vrot.slane %v2812_v9, 4  ;;  %v2269_v40 = vrot.slane %v5927_v20, 5 }
 0x22b   : > { %3340 = vrot.lane.b32.xlu0 %v3318_v13, %s4543_s6  ;;  %v2472_v4 = vrot.slane %v2471_v58, 4  ;;  %v3548_v14 = vunpack.c.l.b16 %v2813_v52  ;;  %v2072_v7 = vshrl.u32 %v1693_v0, 16  ;;  %v2268_v3 = vrot.slane %v2266_v61, 4  ;;  %v289_v52 = vld [vmem:[#allocation2 + $0xcc] sm:$0x1] }
 0x22c   : > { %3436 = vrot.lane.b32.xlu1 %v4492_v32, %s4544_s7  ;;  %3260 = vrot.lane.b32.xlu2 %v3238_v41, %s4545_s8  ;;  %v2482_v37 = vrot.slane %v2481_v16, 4  ;;  %v2816_v44 = vsel %vm4660_vm10, %v2814_v57, %v2815_v48  ;;  %v3054_v17 = vunpack.c.l.b16 %v5918_v34  ;;  %v3055_v13 = vunpack.c.l.b16 %v1662_v43  ;;  %v2303_v32 = vld [vmem:[#allocation2 + $0xd0] sm:$0xf] }
 0x22d   : > { %v2477_v5 = vsel %vm4671_vm13, %v2472_v4, %v2476_v39  ;;  %v3549_v18 = vunpack.c.l.b16 %v2816_v44  ;;  %v2267_v19 = vsel %vm4660_vm10, %v4215_v30, %v2266_v61  ;;  %v2074_v41 = vrot.slane %v2072_v7, 4  ;;  %v2719_v39 = vld [vmem:[#allocation2 + $0xcc] sm:$0xe]  ;;  %v4462_v44 = vld [vmem:[#allocation2 + $0x60] sm:$0xff] }
 0x22e   : > { %v5940_v60 = vpop.permute.xlu0 %3022  ;;  %v2487_v63 = vsel %vm4671_vm13, %v2482_v37, %v2486_v45  ;;  %v3468_v27 = vunpack.c.l.b16 %v2477_v5  ;;  %v2270_v34 = vsel %vm4660_vm10, %v2268_v3, %v2269_v40  ;;  %v2075_v43 = vshll.u32 %v1693_v0, 16 }
 0x22f   : > { %v3469_v2 = vunpack.c.l.b16 %v2487_v63  ;;  %v3574_v9 = vpack.c.b16 %v3549_v18, %v3548_v14  ;;  %v2081_v58 = vshll.u32 %v1694_v35, 16  ;;  %v2085_v48 = vshrl.u32 %v1694_v35, 16 }
 0x230   : > { %v2091_v16 = vshll.u32 %v5927_v20, 16  ;;  %v346_v45 = vsel %vm4643_vm7, 0, %v345_v36  ;;  %v3071_v57 = vpack.c.b16 %v3055_v13, %v3054_v17  ;;  %v2077_v30 = vrot.slane %v2075_v43, 5 }
 0x231   : > { %v3494_v4 = vpack.c.b16 %v3469_v2, %v3468_v27  ;;  %347 = vst [vmem:[#allocation2 + $0xd4] sm:$0x1] %v346_v45  ;;  %v3310_v61 = vunpack.c.l.b16 %v2267_v19  ;;  %v3311_v14 = vunpack.c.l.b16 %v2270_v34  ;;  %v2083_v0 = vrot.slane %v2081_v58, 5  ;;  %v3265_v3 = vpop.permute.xlu2 %3264  ;;  %v1677_v34 = vld [vmem:[#allocation2 + $0x60] sm:$0xf] }
 0x232   : > { %v2087_v7 = vrot.slane %v2085_v48, 4  ;;  %v2078_v20 = vor.u32 %v2077_v30, %v2074_v41  ;;  %v4231_v33 = vrot.slane %v2719_v39, 9  ;;  %v2875_v35 = vrot.slane %v2303_v32, 5  ;;  %v5961_v41 = vld [vmem:[#allocation2 + $0x64] sm:$0xf] }
 0x233   : > { %3596 = vrot.lane.b32.xlu0 %v3574_v9, %s4546_s9  ;;  %v290_v37 = vsel %vm4620_vm4, 0, %v289_v52  ;;  %v2093_v13 = vrot.slane %v2091_v16, 5  ;;  %v2690_v5 = vshll.u32 %v2303_v32, 16  ;;  %v2694_v63 = vshrl.u32 %v2303_v32, 16  ;;  %v5967_v48 = vld [vmem:[#allocation2 + $0x68] sm:$0x1] }
 0x234   : > { %v5952_v40 = vpop.permute.xlu1 %3006  ;;  %3102 = vrot.lane.b32.xlu1 %v3071_v57, %s4540_s26  ;;  %3516 = vrot.lane.b32.xlu2 %v3494_v4, %s4547_s10  ;;  %v2088_v17 = vor.u32 %v2087_v7, %v2083_v0  ;;  %291 = vst [vmem:[#allocation2 + $0xcc] sm:$0x1] %v290_v37  ;;  %v2079_v18 = vrot.slane %v2078_v20, 4  ;;  %v3643_v27 = vsel %vm3616_vm1, %v4462_v44, %v3009_v26  ;;  %v2877_v39 = vrot.slane %v2875_v35, 4  ;;  %v2102_v32 = vld [vmem:[#allocation2 + $0x60] sm:$0xe] }
 0x235   : > { %v3327_v19 = vpack.c.b16 %v3311_v14, %v3310_v61  ;;  %v5959_v9 = vrot.slane %v2690_v5, 5  ;;  %v2876_v43 = vsel %vm4660_vm10, %v4231_v33, %v2875_v35  ;;  %v2696_v58 = vrot.slane %v2694_v63, 4  ;;  %v4485_v4 = vld [vmem:[#allocation2 + $0xc0] sm:$0xff] }
 0x236   : > { %v2089_v2 = vrot.slane %v2088_v17, 4  ;;  %v2084_v21 = vsel %vm4671_vm13, %v2079_v18, %v2083_v0  ;;  %v2210_v57 = vrot.slane %v5961_v41, 5  ;;  %v1880_v0 = vshrl.u32 %v1677_v34, 16 }
 0x237   : > { %v3089_v36 = vpop.permute.xlu0 %3088  ;;  %v3230_v16 = vunpack.c.l.b16 %v2084_v21  ;;  %v2697_v14 = vor.u32 %v2696_v58, %v5959_v9  ;;  %v3566_v7 = vunpack.c.l.b16 %v2876_v43  ;;  %v4207_v35 = vrot.slane %v2102_v32, 9 }
 0x238   : > { %v2094_v26 = vsel %vm4671_vm13, %v2089_v2, %v2093_v13  ;;  %v2319_v45 = vld [vmem:[#allocation2 + $0xd4] sm:$0x1]  ;;  %v3683_v52 = vsel %vm3665_vm2, %v3643_v27, %v3089_v36  ;;  %v2213_v37 = vrot.slane %v5967_v48, 5  ;;  %v2212_v21 = vrot.slane %v2210_v57, 4 }
 0x239   : > { %v3231_v30 = vunpack.c.l.b16 %v2094_v26  ;;  %v2878_v61 = vrot.slane %v2319_v45, 5  ;;  %v2700_v33 = vshll.u32 %v2319_v45, 16  ;;  %v2698_v18 = vrot.slane %v2697_v14, 4 }
 0x23a   : > { %v1882_v58 = vrot.slane %v1880_v0, 4  ;;  %v1889_v32 = vshll.u32 %v5961_v41, 16 }
 0x23b   : > { %v3247_v44 = vpack.c.b16 %v3231_v30, %v3230_v16  ;;  %v2879_v17 = vsel %vm4660_vm10, %v2877_v39, %v2878_v61  ;;  %v2302_v5 = vld [vmem:[#allocation2 + $0xcc] sm:$0xf]  ;;  %v2702_v2 = vrot.slane %v2700_v33, 5  ;;  %v5982_v16 = vpop.permute.xlu2 %3176 }
 0x23c   : > { %v3185_v20 = vpop.permute.xlu1 %3184  ;;  %3358 = vrot.lane.b32.xlu1 %v3327_v19, %s4543_s6  ;;  %3198 = vrot.lane.b32.xlu2 %v4485_v4, %s4542_s30  ;;  %v3567_v36 = vunpack.c.l.b16 %v2879_v17  ;;  %v2681_v63 = vshrl.u32 %v2302_v5, 16  ;;  %v2684_v27 = vshll.u32 %v2302_v5, 16  ;;  %v1883_v19 = vshll.u32 %v1677_v34, 16  ;;  %v4501_v61 = vld [vmem:[#allocation2 + $0xcc] sm:$0xff] }
 0x23d   : > { %v3716_v13 = vsel %vm3698_vm3, %v3683_v52, %v3185_v20  ;;  %3278 = vrot.lane.b32.xlu0 %v3247_v44, %s4545_s8  ;;  %v3964_v26 = vpop.f32.mrf.mxu1  ;;  %v2211_v52 = vsel %vm4660_vm10, %v4207_v35, %v2210_v57  ;;  %v2703_v14 = vsel %vm4671_vm13, %v2698_v18, %v2702_v2  ;;  %v1891_v44 = vrot.slane %v1889_v32, 5  ;;  %v2311_v2 = vld [vmem:[#allocation2 + $0x74] sm:$0x1] }
 0x23e   : > { %v2683_v39 = vrot.slane %v2681_v63, 4  ;;  %v2686_v45 = vrot.slane %v2684_v27, 5  ;;  %v3749_v4 = vsel %vm3731_vm6, %v3716_v13, %v3265_v3  ;;  %v3583_v30 = vpack.c.b16 %v3567_v36, %v3566_v7  ;;  %v2287_v13 = vld [vmem:[#allocation2 + $0x70] sm:$0xf]  ;;  %v2711_v63 = vld [vmem:[#allocation2 + $0x6c] sm:$0xe] }
 0x23f   : > { %v3345_v43 = vpop.permute.xlu0 %3344  ;;  %v1885_v34 = vrot.slane %v1883_v19, 5  ;;  %v1893_v17 = vshrl.u32 %v5961_v41, 16  ;;  %v2214_v57 = vsel %vm4660_vm10, %v2212_v21, %v2213_v37  ;;  %v1899_v35 = vshll.u32 %v5967_v48, 16  ;;  %v2286_v21 = vld [vmem:[#allocation2 + $0x6c] sm:$0xf] }
 0x240   : > { %v3782_v0 = vsel %vm3764_vm8, %v3749_v4, %v3345_v43  ;;  %v2687_v20 = vor.u32 %v2686_v45, %v2683_v39  ;;  %v3487_v41 = vunpack.c.l.b16 %v2703_v14  ;;  %v3295_v32 = vunpack.c.l.b16 %v2214_v57 }
 0x241   : > { %v3815_v33 = vsel %vm3797_vm9, %v3782_v0, %v5128_v46  ;;  %v1886_v7 = vor.u32 %v1885_v34, %v1882_v58  ;;  %v1895_v36 = vrot.slane %v1893_v17, 4  ;;  %v2819_v46 = vrot.slane %v2287_v13, 5 }
 0x242   : > { %v3848_v3 = vsel %vm3830_vm15, %v3815_v33, %v5161_v25  ;;  %v2688_v5 = vrot.slane %v2687_v20, 4  ;;  %v3965_v25 = vadd.f32 %v5868_v54, %v3964_v26  ;;  %v1901_v58 = vrot.slane %v1899_v35, 5  ;;  %v4477_v35 = vld [vmem:[#allocation2 + $0x60] sm:$0xff] }
 0x243   : > { %v3881_v18 = vsel %vm3863_vm11, %v3848_v3, %v5206_v42  ;;  %v1887_v27 = vrot.slane %v1886_v7, 4  ;;  %v3294_v42 = vunpack.c.l.b16 %v2211_v52  ;;  %v1896_v43 = vor.u32 %v1895_v36, %v1891_v44  ;;  %v3433_v20 = vpop.permute.xlu2 %3432 }
 0x244   : > { %3614 = vrot.lane.b32.xlu1 %v3583_v30, %s4546_s9  ;;  %3454 = vrot.lane.b32.xlu2 %v4501_v61, %s4544_s7  ;;  %v3091_v37 = vpop.permute.xlu1 %3090  ;;  %v2693_v48 = vsel %vm4671_vm13, %v2688_v5, %v5959_v9  ;;  %v4223_v39 = vrot.slane %v2711_v63, 9  ;;  %v4041_v45 = vmax.f32 %v3965_v25, 0.0  ;;  %v2821_v30 = vrot.slane %v2819_v46, 4 }
 0x245   : > { %4440 = vmatmul.msk.bf16.vlgmr.msra.gmra.mxu2 %vm3910_vm12, %v3881_v18  ;;  %v3486_v19 = vunpack.c.l.b16 %v2693_v48  ;;  %v1897_v4 = vrot.slane %v1896_v43, 4  ;;  %v2822_v61 = vrot.slane %v2311_v2, 5  ;;  %v2489_v14 = vshrl.u32 %v2286_v21, 16  ;;  %v3966_v34 = vpop.f32.mrf.mxu1 }
 0x246   : > { %v1892_v0 = vsel %vm4671_vm13, %v1887_v27, %v1891_v44  ;;  %4074 = vst.msk [vmem:[%s5882_s12 + $0x10] sm:$0xff] %vm4071_vm5, %v4041_v45  ;;  %v2492_v9 = vshll.u32 %v2286_v21, 16  ;;  %v2498_v52 = vshll.u32 %v2287_v13, 16  ;;  %v2502_v57 = vshrl.u32 %v2287_v13, 16 }
 0x247   : > { %v3503_v26 = vpack.c.b16 %v3487_v41, %v3486_v19  ;;  %v1902_v33 = vsel %vm4671_vm13, %v1897_v4, %v1901_v58  ;;  %v2491_v17 = vrot.slane %v2489_v14, 4  ;;  %v2508_v3 = vshll.u32 %v2311_v2, 16  ;;  %v4463_v2 = vld [vmem:[#allocation2 + $0x6c] sm:$0xff] }
 0x248   : > { %v3319_v7 = vpack.c.b16 %v3295_v32, %v3294_v42  ;;  %v2820_v5 = vsel %vm4660_vm10, %v4223_v39, %v2819_v46  ;;  %v2494_v44 = vrot.slane %v2492_v9, 5  ;;  %v2823_v18 = vsel %vm4660_vm10, %v2821_v30, %v2822_v61  ;;  %v4458_v4 = vld [vmem:[#allocation2 + $0x30] sm:$0xff] }
 0x249   : > { %3534 = vrot.lane.b32.xlu0 %v3503_v26, %s4547_s10  ;;  %v2500_v36 = vrot.slane %v2498_v52, 5  ;;  %v2504_v63 = vrot.slane %v2502_v57, 4  ;;  %v3967_v41 = vadd.f32 %v5868_v54, %v3966_v34  ;;  %v3214_v13 = vunpack.c.l.b16 %v1892_v0  ;;  %v4493_v52 = vld [vmem:[#allocation2 + $0x6c] sm:$0xff] }
 0x24a   : > { %v3215_v27 = vunpack.c.l.b16 %v1902_v33  ;;  %v2495_v25 = vor.u32 %v2494_v44, %v2491_v17  ;;  %v2510_v46 = vrot.slane %v2508_v3, 5  ;;  %v3550_v43 = vunpack.c.l.b16 %v2820_v5 }
 0x24b   : > { %v2505_v48 = vor.u32 %v2504_v63, %v2500_v36  ;;  %v4042_v42 = vmax.f32 %v3967_v41, 0.0  ;;  %v3551_v55 = vunpack.c.l.b16 %v2823_v18 }
 0x24c   : > { %3342 = vrot.lane.b32.xlu1 %v3319_v7, %s4543_s6  ;;  %3182 = vrot.lane.b32.xlu2 %v4477_v35, %s4542_s30  ;;  %v3337_v19 = vpop.permute.xlu1 %3336  ;;  %v2496_v32 = vrot.slane %v2495_v25, 4  ;;  %v3239_v30 = vpack.c.b16 %v3215_v27, %v3214_v13 }
 0x24d   : > { %v3011_v21 = vpop.permute.xlu0 %3010  ;;  %v2506_v45 = vrot.slane %v2505_v48, 4  ;;  %4075 = vst.msk [vmem:[%s5882_s12 + $0x18] sm:$0xff] %vm4071_vm5, %v4042_v42  ;;  %v3575_v9 = vpack.c.b16 %v3551_v55, %v3550_v43 }
 0x24e   : > { %v3646_v58 = vsel %vm3616_vm1, %v4463_v2, %v3011_v21  ;;  %v2501_v26 = vsel %vm4671_vm13, %v2496_v32, %v2500_v36  ;;  %v3852_v36 = vsel %vm3830_vm15, %v5556_v47, %v5500_v31 }
 0x24f   : > { %v3685_v39 = vsel %vm3665_vm2, %v3646_v58, %v3091_v37  ;;  %v2511_v0 = vsel %vm4671_vm13, %v2506_v45, %v2510_v46  ;;  %v3631_v37 = vsel %vm3616_vm1, %v4458_v4, %v5629_v38  ;;  %v3470_v11 = vunpack.c.l.b16 %v2501_v26 }
 0x250   : > { %v3718_v61 = vsel %vm3698_vm3, %v3685_v39, %v5174_v49  ;;  %v6038_v49 = vpop.permute.xlu2 %3098  ;;  %v3471_v33 = vunpack.c.l.b16 %v2511_v0  ;;  %v3675_v17 = vsel %vm3665_vm2, %v3631_v37, %v5602_v10  ;;  %v3885_v41 = vsel %vm3863_vm11, %v3852_v36, %v5566_v59 }
 0x251   : > { %v3751_v14 = vsel %vm3731_vm6, %v3718_v61, %v5198_v28  ;;  %3262 = vrot.lane.b32.xlu0 %v3239_v30, %s4545_s8  ;;  %v3708_v3 = vsel %vm3698_vm3, %v3675_v17, %v5982_v16  ;;  %v3854_v46 = vsel %vm3830_vm15, %v5803_v15, %v5737_v53 }
 0x252   : > { %v3784_v34 = vsel %vm3764_vm8, %v3751_v14, %v5254_v1  ;;  %v3495_v7 = vpack.c.b16 %v3471_v33, %v3470_v11  ;;  %v3887_v47 = vsel %vm3863_vm11, %v3854_v46, %v5741_v22  ;;  %v3889_v14 = vsel %vm3863_vm11, %v5893_v23, %v5887_v6 }
 0x253   : > { %v3817_v28 = vsel %vm3797_vm9, %v3784_v34, %v5337_v8 }
 0x254   : > { %3598 = vrot.lane.b32.xlu1 %v3575_v9, %s4546_s9  ;;  %3438 = vrot.lane.b32.xlu2 %v4493_v52, %s4544_s7  ;;  %v3850_v38 = vsel %vm3830_vm15, %v3817_v28, %v5356_v12  ;;  %v3593_v35 = vpop.permute.xlu1 %3592 }
 0x255   : > { %v3257_v57 = vpop.permute.xlu0 %3256  ;;  %v3883_v1 = vsel %vm3863_vm11, %v3850_v38, %v5447_v56 }
 0x256   : > { %4441 = vmatmul.msk.bf16.gmra.mxu2 %vm3910_vm12, %v3883_v1  ;;  %v3741_v8 = vsel %vm3731_vm6, %v3708_v3, %v3257_v57  ;;  %v4468_v57 = vld [vmem:[#allocation2 + $0xa8] sm:$0xff] }
 0x257   : > { %v3774_v12 = vsel %vm3764_vm8, %v3741_v8, %v3337_v19  ;;  %v3661_v3 = vsel %vm3616_vm1, %v4468_v57, %v5870_v62 }
 0x258   : > { %v3355_v5 = vpop.permute.xlu2 %3354  ;;  %v3807_v10 = vsel %vm3797_vm9, %v3774_v12, %v3433_v20 }
 0x259   : > { %3518 = vrot.lane.b32.xlu0 %v3495_v7, %s4547_s10 }
 0x25d   : > { %v3513_v44 = vpop.permute.xlu0 %3512 }
 0x25e   : > { %v3840_v18 = vsel %vm3830_vm15, %v3807_v10, %v3513_v44 }
 0x25f   : > { %v3873_v56 = vsel %vm3863_vm11, %v3840_v18, %v3593_v35 }
 0x260   : > { %4436 = vmatmul.msk.bf16.gmra.mxu1 %vm3910_vm12, %v3873_v56  ;;  %v3275_v16 = vpop.permute.xlu1 %3274  ;;  %v3611_v20 = vpop.permute.xlu2 %3610 }
 0x265   : > { %v3195_v63 = vpop.permute.xlu0 %3194 }
 0x266   : > { %4442 = vmatmul.msk.bf16.gmra.mxu2 %vm3910_vm12, %v3885_v41 }
 0x268   : > { %v3339_v21 = vpop.permute.xlu2 %3338 }
 0x26b   : > { %v3531_v13 = vpop.permute.xlu1 %3530 }
 0x26d   : > { %v3451_v27 = vpop.permute.xlu0 %3450 }
 0x270   : > { %v3969_v2 = vpop.f32.mrf.mxu1  ;;  %v3595_v32 = vpop.permute.xlu2 %3594 }
 0x271   : > { %v3970_v25 = vadd.f32 %v5868_v54, %v3969_v2 }
 0x273   : > { %v4043_v48 = vmax.f32 %v3970_v25, 0.0 }
 0x275   : > { %4076 = vst.msk [vmem:[%s5882_s12 + $0x20] sm:$0xff] %vm4071_vm5, %v4043_v48  ;;  %v3179_v31 = vpop.permute.xlu0 %3178 }
 0x276   : > { %v3259_v59 = vpop.permute.xlu1 %3258  ;;  %4443 = vmatmul.msk.bf16.gmra.mxu2 %vm3910_vm12, %v3887_v47  ;;  %v3710_v42 = vsel %vm3698_vm3, %v5837_v50, %v3179_v31  ;;  %v4467_v50 = vld [vmem:[#allocation2 + $0x9c] sm:$0xff]  ;;  %v4469_v47 = vld [vmem:[#allocation2 + $0xb4] sm:$0xff] }
 0x277   : > { %v3743_v58 = vsel %vm3731_vm6, %v3710_v42, %v3259_v59  ;;  %v3658_v26 = vsel %vm3616_vm1, %v4467_v50, %v5849_v29  ;;  %v3664_v42 = vsel %vm3616_vm1, %v4469_v47, %v5940_v60  ;;  %v4461_v50 = vld [vmem:[#allocation2 + $0x54] sm:$0xff] }
 0x278   : > { %v3971_v43 = vpop.f32.mrf.mxu1  ;;  %v3776_v53 = vsel %vm3764_vm8, %v3743_v58, %v3339_v21  ;;  %v3277_v30 = vpop.permute.xlu2 %3276  ;;  %v3693_v37 = vsel %vm3665_vm2, %v3658_v26, %v6038_v49  ;;  %v3640_v60 = vsel %vm3616_vm1, %v4461_v50, %v5952_v40 }
 0x279   : > { %v3972_v55 = vadd.f32 %v5868_v54, %v3971_v43  ;;  %v3726_v9 = vsel %vm3698_vm3, %v3693_v37, %v3195_v63 }
 0x27a   : > { %v3759_v52 = vsel %vm3731_vm6, %v3726_v9, %v3275_v16 }
 0x27b   : > { %v4044_v19 = vmax.f32 %v3972_v55, 0.0  ;;  %v3792_v28 = vsel %vm3764_vm8, %v3759_v52, %v3355_v5 }
 0x27c   : > { %v3825_v6 = vsel %vm3797_vm9, %v3792_v28, %v3451_v27 }
 0x27d   : > { %4077 = vst.msk [vmem:[%s5882_s12 + $0x28] sm:$0xff] %vm4071_vm5, %v4044_v19  ;;  %v3435_v15 = vpop.permute.xlu0 %3434  ;;  %v3858_v38 = vsel %vm3830_vm15, %v3825_v6, %v3531_v13 }
 0x27e   : > { %v3515_v39 = vpop.permute.xlu1 %3514  ;;  %v3809_v22 = vsel %vm3797_vm9, %v3776_v53, %v3435_v15  ;;  %v3891_v1 = vsel %vm3863_vm11, %v3858_v38, %v3611_v20 }
 0x27f   : > { %v3842_v45 = vsel %vm3830_vm15, %v3809_v22, %v3515_v39 }
 0x280   : > { %v3875_v4 = vsel %vm3863_vm11, %v3842_v45, %v3595_v32  ;;  %v3533_v23 = vpop.permute.xlu2 %3532 }
 0x281   : > { %4437 = vmatmul.msk.bf16.gmra.mxu1 %vm3910_vm12, %v3875_v4 }
 0x285   : > { %v3101_v61 = vpop.permute.xlu0 %3100 }
 0x286   : > { %v3197_v0 = vpop.permute.xlu1 %3196  ;;  %4444 = vmatmul.msk.bf16.gmra.mxu2 %vm3910_vm12, %v3889_v14  ;;  %v3695_v7 = vsel %vm3665_vm2, %v3661_v3, %v3101_v61  ;;  %v3681_v14 = vsel %vm3665_vm2, %v3640_v60, %v5901_v51 }
 0x287   : > { %v3728_v10 = vsel %vm3698_vm3, %v3695_v7, %v3197_v0 }
 0x288   : > { %v3261_v5 = vpop.permute.xlu2 %3260  ;;  %v3761_v56 = vsel %vm3731_vm6, %v3728_v10, %v3277_v30 }
 0x28d   : > { %v3357_v34 = vpop.permute.xlu0 %3356 }
 0x28e   : > { %v3453_v11 = vpop.permute.xlu1 %3452  ;;  %v3794_v16 = vsel %vm3764_vm8, %v3761_v56, %v3357_v34 }
 0x28f   : > { %v3974_v33 = vpop.f32.mrf.mxu1  ;;  %v3827_v20 = vsel %vm3797_vm9, %v3794_v16, %v3453_v11 }
 0x290   : > { %v3975_v29 = vadd.f32 %v5868_v54, %v3974_v33  ;;  %v3517_v27 = vpop.permute.xlu2 %3516  ;;  %v3860_v2 = vsel %vm3830_vm15, %v3827_v20, %v3533_v23 }
 0x292   : > { %v4045_v17 = vmax.f32 %v3975_v29, 0.0 }
 0x294   : > { %4078 = vst.msk [vmem:[%s5882_s12 + $0x30] sm:$0xff] %vm4071_vm5, %v4045_v17 }
 0x295   : > { %v3613_v49 = vpop.permute.xlu0 %3612 }
 0x296   : > { %v3181_v8 = vpop.permute.xlu1 %3180  ;;  %4445 = vmatmul.msk.bf16.gmra.mxu2 %vm3910_vm12, %v3891_v1  ;;  %v3893_v21 = vsel %vm3863_vm11, %v3860_v2, %v3613_v49 }
 0x297   : > { %v3976_v35 = vpop.f32.mrf.mxu1  ;;  %v3712_v18 = vsel %vm3698_vm3, %v5921_v24, %v3181_v8 }
 0x298   : > { %v3977_v12 = vadd.f32 %v5868_v54, %v3976_v35  ;;  %v3745_v63 = vsel %vm3731_vm6, %v3712_v18, %v3261_v5  ;;  %v3199_v31 = vpop.permute.xlu2 %3198 }
 0x29a   : > { %v4046_v44 = vmax.f32 %v3977_v12, 0.0 }
 0x29c   : > { %4079 = vst.msk [vmem:[%s5882_s12 + $0x38] sm:$0xff] %vm4071_vm5, %v4046_v44 }
 0x29d   : > { %v3341_v62 = vpop.permute.xlu0 %3340 }
 0x29e   : > { %v3437_v36 = vpop.permute.xlu1 %3436  ;;  %v3778_v41 = vsel %vm3764_vm8, %v3745_v63, %v3341_v62 }
 0x29f   : > { %v3811_v13 = vsel %vm3797_vm9, %v3778_v41, %v3437_v36 }
 0x2a0   : > { %v3844_v25 = vsel %vm3830_vm15, %v3811_v13, %v3517_v27  ;;  %v3455_v32 = vpop.permute.xlu2 %3454 }
 0x2a5   : > { %v3597_v24 = vpop.permute.xlu0 %3596 }
 0x2a6   : > { %v3103_v48 = vpop.permute.xlu1 %3102  ;;  %v3877_v46 = vsel %vm3863_vm11, %v3844_v25, %v3597_v24  ;;  %4446 = vmatmul.msk.bf16.gmra.mxu2 %vm3910_vm12, %v3893_v21 }
 0x2a7   : > { %4438 = vmatmul.msk.bf16.gmra.mxu1 %vm3910_vm12, %v3877_v46  ;;  %v3697_v43 = vsel %vm3665_vm2, %v3664_v42, %v3103_v48 }
 0x2a8   : > { %v3730_v58 = vsel %vm3698_vm3, %v3697_v43, %v3199_v31  ;;  %v3183_v30 = vpop.permute.xlu2 %3182 }
 0x2a9   : > { %v3714_v0 = vsel %vm3698_vm3, %v3681_v14, %v3183_v30 }
 0x2ae   : > { %v3359_v59 = vpop.permute.xlu1 %3358 }
 0x2af   : > { %v3279_v55 = vpop.permute.xlu0 %3278 }
 0x2b0   : > { %v3763_v19 = vsel %vm3731_vm6, %v3730_v58, %v3279_v55  ;;  %v3439_v28 = vpop.permute.xlu2 %3438 }
 0x2b1   : > { %v3796_v53 = vsel %vm3764_vm8, %v3763_v19, %v3359_v59 }
 0x2b2   : > { %v3829_v39 = vsel %vm3797_vm9, %v3796_v53, %v3455_v32 }
 0x2b6   : > { %v3615_v15 = vpop.permute.xlu1 %3614 }
 0x2bb   : > { %v3535_v22 = vpop.permute.xlu0 %3534 }
 0x2bc   : > { %v3862_v45 = vsel %vm3830_vm15, %v3829_v39, %v3535_v22 }
 0x2bd   : > { %v3895_v4 = vsel %vm3863_vm11, %v3862_v45, %v3615_v15  ;;  %v4530_v15 = vld [vmem:[%s6218_s4] ss:$0 sm:$0xff] }
 0x2be   : > { %4447 = vmatmul.msk.bf16.gmra.mxu2 %vm3910_vm12, %v3895_v4  ;;  %v3343_v61 = vpop.permute.xlu1 %3342 }
 0x2c3   : > { %v3263_v26 = vpop.permute.xlu0 %3262 }
 0x2c4   : > { %v3747_v37 = vsel %vm3731_vm6, %v3714_v0, %v3263_v26 }
 0x2c5   : > { %v3780_v52 = vsel %vm3764_vm8, %v3747_v37, %v3343_v61 }
 0x2c6   : > { %v3813_v40 = vsel %vm3797_vm9, %v3780_v52, %v3439_v28  ;;  %v3599_v23 = vpop.permute.xlu1 %3598 }
 0x2c8   : > { %v3999_v9 = vpop.f32.mrf.mxu2 }
 0x2c9   : > { %v4000_v34 = vadd.f32 %v5868_v54, %v3999_v9 }
 0x2cb   : > { %v4055_v11 = vmax.f32 %v4000_v34, 0.0  ;;  %v3519_v6 = vpop.permute.xlu0 %3518 }
 0x2cc   : > { %v3846_v51 = vsel %vm3830_vm15, %v3813_v40, %v3519_v6 }
 0x2cd   : > { %4088 = vst.msk [vmem:[%s5882_s12 + $0x80] sm:$0xff] %vm4071_vm5, %v4055_v11  ;;  %v3879_v33 = vsel %vm3863_vm11, %v3846_v51, %v3599_v23 }
 0x2ce   : > { %4439 = vmatmul.msk.bf16.gmra.mxu1 %vm3910_vm12, %v3879_v33 }
 0x2d0   : > { %v4001_v29 = vpop.f32.mrf.mxu2 }
 0x2d1   : > { %v4002_v38 = vadd.f32 %v5868_v54, %v4001_v29 }
 0x2d3   : > { %v4056_v17 = vmax.f32 %v4002_v38, 0.0 }
 0x2d5   : > { %4089 = vst.msk [vmem:[%s5882_s12 + $0x88] sm:$0xff] %vm4071_vm5, %v4056_v17 }
 0x2d9   : > { %v4004_v57 = vpop.f32.mrf.mxu2 }
 0x2da   : > { %v4005_v49 = vadd.f32 %v5868_v54, %v4004_v57 }
 0x2dc   : > { %v4057_v1 = vmax.f32 %v4005_v49, 0.0 }
 0x2dd   : > { %v3979_v3 = vpop.f32.mrf.mxu1 }
 0x2de   : > { %v3980_v8 = vadd.f32 %v5868_v54, %v3979_v3  ;;  %4090 = vst.msk [vmem:[%s5882_s12 + $0x90] sm:$0xff] %vm4071_vm5, %v4057_v1 }
 0x2e0   : > { %v4047_v7 = vmax.f32 %v3980_v8, 0.0 }
 0x2e1   : > { %v4006_v35 = vpop.f32.mrf.mxu2 }
 0x2e2   : > { %4080 = vst.msk [vmem:[%s5882_s12 + $0x40] sm:$0xff] %vm4071_vm5, %v4047_v7  ;;  %v4007_v12 = vadd.f32 %v5868_v54, %v4006_v35 }
 0x2e4   : > { %v4058_v5 = vmax.f32 %v4007_v12, 0.0 }
 0x2e5   : > { %v3981_v10 = vpop.f32.mrf.mxu1 }
 0x2e6   : > { %v3982_v44 = vadd.f32 %v5868_v54, %v3981_v10  ;;  %4091 = vst.msk [vmem:[%s5882_s12 + $0x98] sm:$0xff] %vm4071_vm5, %v4058_v5 }
 0x2e8   : > { %v4048_v18 = vmax.f32 %v3982_v44, 0.0 }
 0x2e9   : > { %v4009_v56 = vpop.f32.mrf.mxu2 }
 0x2ea   : > { %4081 = vst.msk [vmem:[%s5882_s12 + $0x48] sm:$0xff] %vm4071_vm5, %v4048_v18  ;;  %v4010_v62 = vadd.f32 %v5868_v54, %v4009_v56 }
 0x2ec   : > { %v4059_v16 = vmax.f32 %v4010_v62, 0.0 }
 0x2ee   : > { %4092 = vst.msk [vmem:[%s5882_s12 + $0xa0] sm:$0xff] %vm4071_vm5, %v4059_v16 }
 0x2f1   : > { %v4011_v36 = vpop.f32.mrf.mxu2 }
 0x2f2   : > { %v4012_v63 = vadd.f32 %v5868_v54, %v4011_v36 }
 0x2f4   : > { %v4060_v41 = vmax.f32 %v4012_v63, 0.0 }
 0x2f6   : > { %4093 = vst.msk [vmem:[%s5882_s12 + $0xa8] sm:$0xff] %vm4071_vm5, %v4060_v41 }
 0x2f9   : > { %v4014_v20 = vpop.f32.mrf.mxu2 }
 0x2fa   : > { %v4015_v13 = vadd.f32 %v5868_v54, %v4014_v20 }
 0x2fc   : > { %v4061_v27 = vmax.f32 %v4015_v13, 0.0 }
 0x2fe   : > { %4094 = vst.msk [vmem:[%s5882_s12 + $0xb0] sm:$0xff] %vm4071_vm5, %v4061_v27  ;;  %v3984_v2 = vpop.f32.mrf.mxu1 }
 0x2ff   : > { %v3985_v24 = vadd.f32 %v5868_v54, %v3984_v2 }
 0x301   : > { %v4049_v25 = vmax.f32 %v3985_v24, 0.0  ;;  %v4016_v21 = vpop.f32.mrf.mxu2 }
 0x302   : > { %v4017_v48 = vadd.f32 %v5868_v54, %v4016_v21 }
 0x303   : > { %4082 = vst.msk [vmem:[%s5882_s12 + $0x50] sm:$0xff] %vm4071_vm5, %v4049_v25 }
 0x304   : > { %v4062_v46 = vmax.f32 %v4017_v48, 0.0 }
 0x306   : > { %4095 = vst.msk [vmem:[%s5882_s12 + $0xb8] sm:$0xff] %vm4071_vm5, %v4062_v46  ;;  %v3986_v31 = vpop.f32.mrf.mxu1 }
 0x307   : > { %v3987_v47 = vadd.f32 %v5868_v54, %v3986_v31 }
 0x309   : > { %v4050_v59 = vmax.f32 %v3987_v47, 0.0  ;;  %v4019_v42 = vpop.f32.mrf.mxu2 }
 0x30a   : > { %v4020_v43 = vadd.f32 %v5868_v54, %v4019_v42 }
 0x30b   : > { %4083 = vst.msk [vmem:[%s5882_s12 + $0x58] sm:$0xff] %vm4071_vm5, %v4050_v59 }
 0x30c   : > { %v4063_v55 = vmax.f32 %v4020_v43, 0.0 }
 0x30e   : > { %4096 = vst.msk [vmem:[%s5882_s12 + $0xc0] sm:$0xff] %vm4071_vm5, %v4063_v55 }
 0x311   : > { %v4021_v58 = vpop.f32.mrf.mxu2 }
 0x312   : > { %v4022_v19 = vadd.f32 %v5868_v54, %v4021_v58 }
 0x314   : > { %v4064_v32 = vmax.f32 %v4022_v19, 0.0 }
 0x316   : > { %4097 = vst.msk [vmem:[%s5882_s12 + $0xc8] sm:$0xff] %vm4071_vm5, %v4064_v32 }
 0x319   : > { %v4024_v53 = vpop.f32.mrf.mxu2 }
 0x31a   : > { %v4025_v39 = vadd.f32 %v4530_v15, %v4024_v53 }
 0x31c   : > { %v4065_v22 = vmax.f32 %v4025_v39, 0.0 }
 0x31e   : > { %4098 = vst.msk [vmem:[%s5882_s12 + $0xd0] sm:$0xff] %vm4071_vm5, %v4065_v22 }
 0x321   : > { %v4026_v45 = vpop.f32.mrf.mxu2 }
 0x322   : > { %v4027_v4 = vadd.f32 %v4530_v15, %v4026_v45 }
 0x324   : > { %v3989_v50 = vpop.f32.mrf.mxu1  ;;  %v4066_v60 = vmax.f32 %v4027_v4, 0.0 }
 0x325   : > { %v3990_v54 = vadd.f32 %v4530_v15, %v3989_v50 }
 0x326   : > { %4099 = vst.msk [vmem:[%s5882_s12 + $0xd8] sm:$0xff] %vm4071_vm5, %v4066_v60 }
 0x327   : > { %v4051_v30 = vmax.f32 %v3990_v54, 0.0 }
 0x329   : > { %4084 = vst.msk [vmem:[%s5882_s12 + $0x60] sm:$0xff] %vm4071_vm5, %v4051_v30  ;;  %v4029_v61 = vpop.f32.mrf.mxu2 }
 0x32a   : > { %v4030_v14 = vadd.f32 %v4530_v15, %v4029_v61 }
 0x32c   : > { %v3991_v26 = vpop.f32.mrf.mxu1  ;;  %v4067_v0 = vmax.f32 %v4030_v14, 0.0 }
 0x32d   : > { %v3992_v37 = vadd.f32 %v4530_v15, %v3991_v26 }
 0x32e   : > { %4100 = vst.msk [vmem:[%s5882_s12 + $0xe0] sm:$0xff] %vm4071_vm5, %v4067_v0 }
 0x32f   : > { %v4052_v9 = vmax.f32 %v3992_v37, 0.0 }
 0x331   : > { %4085 = vst.msk [vmem:[%s5882_s12 + $0x68] sm:$0xff] %vm4071_vm5, %v4052_v9  ;;  %v4031_v52 = vpop.f32.mrf.mxu2 }
 0x332   : > { %v4032_v34 = vadd.f32 %v4530_v15, %v4031_v52 }
 0x334   : > { %v4068_v28 = vmax.f32 %v4032_v34, 0.0 }
 0x336   : > { %4101 = vst.msk [vmem:[%s5882_s12 + $0xe8] sm:$0xff] %vm4071_vm5, %v4068_v28 }
 0x341   : > { %v4034_v11 = vpop.f32.mrf.mxu2 }
 0x342   : > { %v4035_v40 = vadd.f32 %v4530_v15, %v4034_v11 }
 0x344   : > { %v4069_v6 = vmax.f32 %v4035_v40, 0.0 }
 0x346   : > { %4102 = vst.msk [vmem:[%s5882_s12 + $0xf0] sm:$0xff] %vm4071_vm5, %v4069_v6 }
 0x349   : > { %v4036_v23 = vpop.f32.mrf.mxu2 }
 0x34a   : > { %v4037_v51 = vadd.f32 %v4530_v15, %v4036_v23 }
 0x34b   : > { %v3994_v33 = vpop.f32.mrf.mxu1 }
 0x34c   : > { %v3995_v29 = vadd.f32 %v4530_v15, %v3994_v33  ;;  %v4070_v38 = vmax.f32 %v4037_v51, 0.0 }
 0x34e   : > { %v4053_v17 = vmax.f32 %v3995_v29, 0.0  ;;  %4103 = vst.msk [vmem:[%s5882_s12 + $0xf8] sm:$0xff] %vm4071_vm5, %v4070_v38 }
 0x350   : > { %4086 = vst.msk [vmem:[%s5882_s12 + $0x70] sm:$0xff] %vm4071_vm5, %v4053_v17 }
 0x353   : > { %v3996_v57 = vpop.f32.mrf.mxu1 }
 0x354   : > { %v3997_v49 = vadd.f32 %v4530_v15, %v3996_v57 }
 0x356   : > { %v4054_v1 = vmax.f32 %v3997_v49, 0.0 }
 0x358   : > { %4087 = vst.msk [vmem:[%s5882_s12 + $0x78] sm:$0xff] %vm4071_vm5, %v4054_v1 }
 0x359 PF: > { %s15_s18 = sadd.s32 1, %s4537_s18  }
 0x35a   : > { %p12_p4 = scmp.ge.s32.totalorder %s15_s18, 4  }
 0x35c   :  { %14 = sbr.rel (!%p12_p4) target bundleno = 1 (0x1), region = 73 }

</bundles_post_ra>
